<compile_context>
chip_gen: v5e
topology: v5e:2x2
jax: 0.10.0
libtpu: 0.0.40
codegen_flags: <defaults>
</compile_context>

<pallas_src>
import jax
import jax.numpy as jnp
from jax.experimental import pallas as pl
from jax.experimental.pallas import tpu as pltpu


# ----------------------------------------------------------------------------
# Pallas kernel (one batch tile per grid step)
# ----------------------------------------------------------------------------
def domain_classifier_kernel(x_ref, w1_ref, b1_ref, w2_ref, b2_ref,
                             w3_ref, b3_ref, o_ref):
    # Layer 1: (TB, 3136) @ (3136, 256) + (1, 256) -> ReLU   (bf16 MXU, f32 acc)
    x = x_ref[...]
    if x.dtype != jnp.bfloat16:          # accept bf16 input directly
        x = x.astype(jnp.bfloat16)
    h1 = jnp.dot(x, w1_ref[...], preferred_element_type=jnp.float32)
    h1 = jnp.maximum(h1 + b1_ref[...], 0.0)

    # Layer 2: (TB, 256) @ (256, 128) + (1, 128) -> ReLU
    h2 = jnp.dot(h1.astype(jnp.bfloat16), w2_ref[...],
                 preferred_element_type=jnp.float32)
    h2 = jnp.maximum(h2 + b2_ref[...], 0.0)

    # Layer 3: N=1 matmul done on VPU (multiply) + XLU (lane reduction).
    # w3 is passed as a (1, 128) f32 row.
    logits = jnp.sum(h2 * w3_ref[...], axis=-1, keepdims=True) + b3_ref[...]

    # Sigmoid: exp on EUP; exact reciprocal (still hidden under the input DMA).
    o_ref[...] = pl.reciprocal(1.0 + jnp.exp(-logits))


# ----------------------------------------------------------------------------
# Generation-aware tiling
# ----------------------------------------------------------------------------
def _vmem_capacity_bytes():
    try:
        info = pltpu.get_tpu_info()
        cap = getattr(info, "vmem_capacity_bytes", None)
        if cap:
            return int(cap)
    except Exception:
        pass
    return 64 << 20  # conservative (v7x-sized) default


def _pick_tiling(batch):
    vmem_cap = _vmem_capacity_bytes()
    if vmem_cap >= (96 << 20):
        # v5e / v6e: 128 MiB physical VMEM -> big tiles, raised scoped limit.
        cap, vmem_limit = 1024, 64 << 20
    else:
        # v7x (64 MiB per TC) or unknown: stay inside budget; 512-row DMAs are
        # already near the HBM roofline.
        cap, vmem_limit = 512, 40 << 20
    # cap is a multiple of 8; if the whole batch fits in one tile, use the full
    # batch dim (always a legal block shape).
    tile_b = batch if batch <= cap else cap
    return tile_b, vmem_limit


# ----------------------------------------------------------------------------
# Wrapper
# ----------------------------------------------------------------------------
def domain_classifier_forward(x, params, tile_b=None):
    """x: (B, in_channel*in_dim*in_dim) float32 or bfloat16.  Returns (B, 1) f32."""
    w1, b1, w2, b2, w3, b3 = params
    B, F = x.shape

    auto_tile, vmem_limit = _pick_tiling(B)
    if tile_b is None:
        tile_b = auto_tile

    # bf16 weights for the MXU matmuls; layer-3 weight as an f32 (1, 128) row.
    w1b = w1.astype(jnp.bfloat16)
    w2b = w2.astype(jnp.bfloat16)
    w3_row = w3.reshape(1, -1).astype(jnp.float32)

    grid = (pl.cdiv(B, tile_b),)   # no padding copy; ragged last block is fine

    flops = 2 * B * (F * 256 + 256 * 128 + 128)
    bytes_accessed = (B * F * x.dtype.itemsize          # streamed input
                      + w1b.size * 2 + w2b.size * 2     # bf16 weights
                      + (b1.size + b2.size + w3_row.size + b3.size) * 4
                      + B * 4)                          # output
    cost = pl.CostEstimate(flops=flops, transcendentals=B,
                           bytes_accessed=bytes_accessed)

    def build(single_buffer_weights):
        # Weights/biases: full block, constant index_map -> VMEM-resident.
        if single_buffer_weights:
            const = lambda a: pl.BlockSpec(a.shape, lambda i: (0, 0),
                                           pipeline_mode=pl.Buffered(1))
        else:
            const = lambda a: pl.BlockSpec(a.shape, lambda i: (0, 0))
        return pl.pallas_call(
            domain_classifier_kernel,
            out_shape=jax.ShapeDtypeStruct((B, 1), jnp.float32),
            grid=grid,
            in_specs=[
                pl.BlockSpec((tile_b, F), lambda i: (i, 0)),   # x tile, pipelined
                const(w1b), const(b1),
                const(w2b), const(b2),
                const(w3_row), const(b3),
            ],
            out_specs=pl.BlockSpec((tile_b, 1), lambda i: (i, 0)),
            compiler_params=pltpu.CompilerParams(
                dimension_semantics=("parallel",),   # megacore split on v7x
                vmem_limit_bytes=vmem_limit,
            ),
            cost_estimate=cost,
        )

    args = (x, w1b, b1, w2b, b2, w3_row, b3)
    try:
        out = build(single_buffer_weights=True)(*args)
    except Exception:
        # Fallback if this runtime rejects single-buffered constant blocks.
        out = build(single_buffer_weights=False)(*args)
    return out


# ----------------------------------------------------------------------------
# Deterministic parameter init (mimics nn.Linear's U(-1/sqrt(fan_in), +..) )
# ----------------------------------------------------------------------------
def init_params(key, in_features=64 * 7 * 7, h1=256, h2=128, out=1):
    ks = jax.random.split(key, 6)

    def linear(kw, kb, fan_in, fan_out):
        bound = 1.0 / jnp.sqrt(jnp.float32(fan_in))
        # stored as (in, out): transpose of PyTorch's (out, in)
        w = jax.random.uniform(kw, (fan_in, fan_out), jnp.float32, -bound, bound)
        b = jax.random.uniform(kb, (1, fan_out), jnp.float32, -bound, bound)
        return w, b

    w1, b1 = linear(ks[0], ks[1], in_features, h1)
    w2, b2 = linear(ks[2], ks[3], h1, h2)
    w3, b3 = linear(ks[4], ks[5], h2, out)
    return (w1, b1, w2, b2, w3, b3)


# Pure-JAX reference (f32 end-to-end) for a sanity check.
def reference_forward(x, params):
    w1, b1, w2, b2, w3, b3 = params
    h = jnp.maximum(x @ w1 + b1, 0.0)
    h = jnp.maximum(h @ w2 + b2, 0.0)
    return jax.nn.sigmoid(h @ w3 + b3)


if __name__ == "__main__":
    key = jax.random.PRNGKey(0)
    k_x, k_p = jax.random.split(key)

    B = 8
    IN_CHANNEL, IN_DIM = 64, 7
    in_features = IN_CHANNEL * IN_DIM * IN_DIM  # 3136, as in the module

    # The PyTorch module expects an already-flattened (B, 3136) input.
    x = jax.random.normal(k_x, (B, in_features), jnp.float32)
    params = init_params(k_p, in_features)

    out = domain_classifier_forward(x, params)
    out = jax.block_until_ready(out)

    ref = reference_forward(x, params)
    assert out.shape == (B, 1)
    # Tolerance reflects bf16 matmul inputs (f32 accumulation kept).
    assert jnp.allclose(out, ref, atol=2e-2, rtol=2e-2), (
        f"max abs err {jnp.max(jnp.abs(out - ref))}")

    print("KERNEL_OK")
</pallas_src>

<mosaic_0001>
module attributes {stable_mosaic.version = 11 : i64} {
  func.func @domain_classifier_kernel(%arg0: i32, %arg1: memref<8x3136xf32, #tpu.memory_space<vmem>>, %arg2: memref<3136x256xbf16, #tpu.memory_space<vmem>>, %arg3: memref<1x256xf32, #tpu.memory_space<vmem>>, %arg4: memref<256x128xbf16, #tpu.memory_space<vmem>>, %arg5: memref<1x128xf32, #tpu.memory_space<vmem>>, %arg6: memref<1x128xf32, #tpu.memory_space<vmem>>, %arg7: memref<1x1xf32, #tpu.memory_space<vmem>>, %arg8: memref<8x1xf32, #tpu.memory_space<vmem>>) attributes {dimension_semantics = [#tpu.dimension_semantics<parallel>], iteration_bounds = array<i64: 1>, scalar_prefetch = 0 : i64, scratch_operands = 0 : i64, tpu.core_type = #tpu.core_type<tc>, window_params = [{transform_indices = @transform_0, window_bounds = array<i64: 8, 3136>}, {pipeline_mode = #tpu.pipeline_mode<synchronous>, transform_indices = @transform_1, window_bounds = array<i64: 3136, 256>}, {pipeline_mode = #tpu.pipeline_mode<synchronous>, transform_indices = @transform_2, window_bounds = array<i64: 1, 256>}, {pipeline_mode = #tpu.pipeline_mode<synchronous>, transform_indices = @transform_3, window_bounds = array<i64: 256, 128>}, {pipeline_mode = #tpu.pipeline_mode<synchronous>, transform_indices = @transform_4, window_bounds = array<i64: 1, 128>}, {pipeline_mode = #tpu.pipeline_mode<synchronous>, transform_indices = @transform_5, window_bounds = array<i64: 1, 128>}, {pipeline_mode = #tpu.pipeline_mode<synchronous>, transform_indices = @transform_6, window_bounds = array<i64: 1, 1>}, {transform_indices = @transform_7, window_bounds = array<i64: 8, 1>}]} {
    %c0 = arith.constant 0 : index
    %c0_0 = arith.constant 0 : index
    %0 = vector.load %arg1[%c0, %c0_0] : memref<8x3136xf32, #tpu.memory_space<vmem>>, vector<8x3136xf32>
    %1 = arith.truncf %0 : vector<8x3136xf32> to vector<8x3136xbf16>
    %c0_1 = arith.constant 0 : index
    %c0_2 = arith.constant 0 : index
    %2 = vector.load %arg2[%c0_1, %c0_2] : memref<3136x256xbf16, #tpu.memory_space<vmem>>, vector<3136x256xbf16>
    %cst = arith.constant dense<0.000000e+00> : vector<8x256xf32>
    %3 = tpu.matmul %1, %2, %cst {dimension_numbers = #tpu.dot_dimension_numbers<[1], [0], [0], [1], [0, 0, 1, 1], [], []>} : vector<8x3136xbf16>, vector<3136x256xbf16>, vector<8x256xf32> -> vector<8x256xf32>
    %c0_3 = arith.constant 0 : index
    %c0_4 = arith.constant 0 : index
    %4 = vector.load %arg3[%c0_3, %c0_4] : memref<1x256xf32, #tpu.memory_space<vmem>>, vector<1x256xf32>
    %5 = vector.broadcast %4 : vector<1x256xf32> to vector<8x256xf32>
    %6 = arith.addf %3, %5 : vector<8x256xf32>
    %cst_5 = arith.constant 0.000000e+00 : f32
    %7 = vector.broadcast %cst_5 : f32 to vector<8x256xf32>
    %8 = arith.maximumf %6, %7 : vector<8x256xf32>
    %9 = arith.truncf %8 : vector<8x256xf32> to vector<8x256xbf16>
    %c0_6 = arith.constant 0 : index
    %c0_7 = arith.constant 0 : index
    %10 = vector.load %arg4[%c0_6, %c0_7] : memref<256x128xbf16, #tpu.memory_space<vmem>>, vector<256x128xbf16>
    %cst_8 = arith.constant dense<0.000000e+00> : vector<8x128xf32>
    %11 = tpu.matmul %9, %10, %cst_8 {dimension_numbers = #tpu.dot_dimension_numbers<[1], [0], [0], [1], [0, 0, 1, 1], [], []>} : vector<8x256xbf16>, vector<256x128xbf16>, vector<8x128xf32> -> vector<8x128xf32>
    %c0_9 = arith.constant 0 : index
    %c0_10 = arith.constant 0 : index
    %12 = vector.load %arg5[%c0_9, %c0_10] : memref<1x128xf32, #tpu.memory_space<vmem>>, vector<1x128xf32>
    %13 = vector.broadcast %12 : vector<1x128xf32> to vector<8x128xf32>
    %14 = arith.addf %11, %13 : vector<8x128xf32>
    %cst_11 = arith.constant 0.000000e+00 : f32
    %15 = vector.broadcast %cst_11 : f32 to vector<8x128xf32>
    %16 = arith.maximumf %14, %15 : vector<8x128xf32>
    %c0_12 = arith.constant 0 : index
    %c0_13 = arith.constant 0 : index
    %17 = vector.load %arg6[%c0_12, %c0_13] : memref<1x128xf32, #tpu.memory_space<vmem>>, vector<1x128xf32>
    %18 = vector.broadcast %17 : vector<1x128xf32> to vector<8x128xf32>
    %19 = arith.mulf %16, %18 : vector<8x128xf32>
    %cst_14 = arith.constant dense<0.000000e+00> : vector<8xf32>
    %20 = vector.multi_reduction <add>, %19, %cst_14 [1] : vector<8x128xf32> to vector<8xf32>
    %21 = vector.shape_cast %20 : vector<8xf32> to vector<8x1xf32>
    %c0_15 = arith.constant 0 : index
    %c0_16 = arith.constant 0 : index
    %22 = vector.load %arg7[%c0_15, %c0_16] : memref<1x1xf32, #tpu.memory_space<vmem>>, vector<1x1xf32>
    %23 = vector.broadcast %22 : vector<1x1xf32> to vector<8x1xf32>
    %24 = arith.addf %21, %23 : vector<8x1xf32>
    %cst_17 = arith.constant 0.000000e+00 : f32
    %25 = vector.broadcast %cst_17 : f32 to vector<8x1xf32>
    %26 = arith.subf %25, %24 : vector<8x1xf32>
    %27 = math.exp %26 : vector<8x1xf32>
    %cst_18 = arith.constant 1.000000e+00 : f32
    %28 = vector.broadcast %cst_18 : f32 to vector<8x1xf32>
    %29 = arith.addf %28, %27 : vector<8x1xf32>
    %30 = tpu.reciprocal %29 : vector<8x1xf32> -> vector<8x1xf32>
    %c0_19 = arith.constant 0 : index
    %c0_20 = arith.constant 0 : index
    %31 = vector.load %arg8[%c0_19, %c0_20] : memref<8x1xf32, #tpu.memory_space<vmem>>, vector<8x1xf32>
    tpu.vector_store %arg8[%c0_19, %c0_20], %30 {strides = array<i32>} : memref<8x1xf32, #tpu.memory_space<vmem>>, vector<8x1xf32>,
    return
  }
  func.func @transform_0(%arg0: i32) -> (i32, i32) {
    %c0_i32 = arith.constant 0 : i32
    %c0_i32_0 = arith.constant 0 : i32
    return %arg0, %c0_i32 : i32, i32
  }
  func.func @transform_1(%arg0: i32) -> (i32, i32) {
    %c0_i32 = arith.constant 0 : i32
    %c0_i32_0 = arith.constant 0 : i32
    %c0_i32_1 = arith.constant 0 : i32
    return %c0_i32, %c0_i32_0 : i32, i32
  }
  func.func @transform_2(%arg0: i32) -> (i32, i32) {
    %c0_i32 = arith.constant 0 : i32
    %c0_i32_0 = arith.constant 0 : i32
    %c0_i32_1 = arith.constant 0 : i32
    return %c0_i32, %c0_i32_0 : i32, i32
  }
  func.func @transform_3(%arg0: i32) -> (i32, i32) {
    %c0_i32 = arith.constant 0 : i32
    %c0_i32_0 = arith.constant 0 : i32
    %c0_i32_1 = arith.constant 0 : i32
    return %c0_i32, %c0_i32_0 : i32, i32
  }
  func.func @transform_4(%arg0: i32) -> (i32, i32) {
    %c0_i32 = arith.constant 0 : i32
    %c0_i32_0 = arith.constant 0 : i32
    %c0_i32_1 = arith.constant 0 : i32
    return %c0_i32, %c0_i32_0 : i32, i32
  }
  func.func @transform_5(%arg0: i32) -> (i32, i32) {
    %c0_i32 = arith.constant 0 : i32
    %c0_i32_0 = arith.constant 0 : i32
    %c0_i32_1 = arith.constant 0 : i32
    return %c0_i32, %c0_i32_0 : i32, i32
  }
  func.func @transform_6(%arg0: i32) -> (i32, i32) {
    %c0_i32 = arith.constant 0 : i32
    %c0_i32_0 = arith.constant 0 : i32
    %c0_i32_1 = arith.constant 0 : i32
    return %c0_i32, %c0_i32_0 : i32, i32
  }
  func.func @transform_7(%arg0: i32) -> (i32, i32) {
    %c0_i32 = arith.constant 0 : i32
    %c0_i32_0 = arith.constant 0 : i32
    return %arg0, %c0_i32 : i32, i32
  }
}

module attributes {stable_mosaic.version = 11 : i64} {
  func.func @domain_classifier_kernel(%arg0: i32, %arg1: memref<8x3136xf32, #tpu.memory_space<vmem>>, %arg2: memref<3136x256xbf16, #tpu.memory_space<vmem>>, %arg3: memref<1x256xf32, #tpu.memory_space<vmem>>, %arg4: memref<256x128xbf16, #tpu.memory_space<vmem>>, %arg5: memref<1x128xf32, #tpu.memory_space<vmem>>, %arg6: memref<1x128xf32, #tpu.memory_space<vmem>>, %arg7: memref<1x1xf32, #tpu.memory_space<vmem>>, %arg8: memref<8x1xf32, #tpu.memory_space<vmem>>) attributes {dimension_semantics = [#tpu.dimension_semantics<parallel>], iteration_bounds = array<i64: 1>, scalar_prefetch = 0 : i64, scratch_operands = 0 : i64, tpu.core_type = #tpu.core_type<tc>, window_params = [{transform_indices = @transform_0, window_bounds = array<i64: 8, 3136>}, {pipeline_mode = #tpu.pipeline_mode<synchronous>, transform_indices = @transform_1, window_bounds = array<i64: 3136, 256>}, {pipeline_mode = #tpu.pipeline_mode<synchronous>, transform_indices = @transform_2, window_bounds = array<i64: 1, 256>}, {pipeline_mode = #tpu.pipeline_mode<synchronous>, transform_indices = @transform_3, window_bounds = array<i64: 256, 128>}, {pipeline_mode = #tpu.pipeline_mode<synchronous>, transform_indices = @transform_4, window_bounds = array<i64: 1, 128>}, {pipeline_mode = #tpu.pipeline_mode<synchronous>, transform_indices = @transform_5, window_bounds = array<i64: 1, 128>}, {pipeline_mode = #tpu.pipeline_mode<synchronous>, transform_indices = @transform_6, window_bounds = array<i64: 1, 1>}, {transform_indices = @transform_7, window_bounds = array<i64: 8, 1>}]} {
    %c0 = arith.constant 0 : index
    %c0_0 = arith.constant 0 : index
    %0 = vector.load %arg1[%c0, %c0_0] : memref<8x3136xf32, #tpu.memory_space<vmem>>, vector<8x3136xf32>
    %1 = arith.truncf %0 : vector<8x3136xf32> to vector<8x3136xbf16>
    %c0_1 = arith.constant 0 : index
    %c0_2 = arith.constant 0 : index
    %2 = vector.load %arg2[%c0_1, %c0_2] : memref<3136x256xbf16, #tpu.memory_space<vmem>>, vector<3136x256xbf16>
    %cst = arith.constant dense<0.000000e+00> : vector<8x256xf32>
    %3 = tpu.matmul %1, %2, %cst {dimension_numbers = #tpu.dot_dimension_numbers<[1], [0], [0], [1], [0, 0, 1, 1], [], []>} : vector<8x3136xbf16>, vector<3136x256xbf16>, vector<8x256xf32> -> vector<8x256xf32>
    %c0_3 = arith.constant 0 : index
    %c0_4 = arith.constant 0 : index
    %4 = vector.load %arg3[%c0_3, %c0_4] : memref<1x256xf32, #tpu.memory_space<vmem>>, vector<1x256xf32>
    %5 = vector.broadcast %4 : vector<1x256xf32> to vector<8x256xf32>
    %6 = arith.addf %3, %5 : vector<8x256xf32>
    %cst_5 = arith.constant 0.000000e+00 : f32
    %7 = vector.broadcast %cst_5 : f32 to vector<8x256xf32>
    %8 = arith.maximumf %6, %7 : vector<8x256xf32>
    %9 = arith.truncf %8 : vector<8x256xf32> to vector<8x256xbf16>
    %c0_6 = arith.constant 0 : index
    %c0_7 = arith.constant 0 : index
    %10 = vector.load %arg4[%c0_6, %c0_7] : memref<256x128xbf16, #tpu.memory_space<vmem>>, vector<256x128xbf16>
    %cst_8 = arith.constant dense<0.000000e+00> : vector<8x128xf32>
    %11 = tpu.matmul %9, %10, %cst_8 {dimension_numbers = #tpu.dot_dimension_numbers<[1], [0], [0], [1], [0, 0, 1, 1], [], []>} : vector<8x256xbf16>, vector<256x128xbf16>, vector<8x128xf32> -> vector<8x128xf32>
    %c0_9 = arith.constant 0 : index
    %c0_10 = arith.constant 0 : index
    %12 = vector.load %arg5[%c0_9, %c0_10] : memref<1x128xf32, #tpu.memory_space<vmem>>, vector<1x128xf32>
    %13 = vector.broadcast %12 : vector<1x128xf32> to vector<8x128xf32>
    %14 = arith.addf %11, %13 : vector<8x128xf32>
    %cst_11 = arith.constant 0.000000e+00 : f32
    %15 = vector.broadcast %cst_11 : f32 to vector<8x128xf32>
    %16 = arith.maximumf %14, %15 : vector<8x128xf32>
    %c0_12 = arith.constant 0 : index
    %c0_13 = arith.constant 0 : index
    %17 = vector.load %arg6[%c0_12, %c0_13] : memref<1x128xf32, #tpu.memory_space<vmem>>, vector<1x128xf32>
    %18 = vector.broadcast %17 : vector<1x128xf32> to vector<8x128xf32>
    %19 = arith.mulf %16, %18 : vector<8x128xf32>
    %cst_14 = arith.constant dense<0.000000e+00> : vector<8xf32>
    %20 = vector.multi_reduction <add>, %19, %cst_14 [1] : vector<8x128xf32> to vector<8xf32>
    %21 = vector.shape_cast %20 : vector<8xf32> to vector<8x1xf32>
    %c0_15 = arith.constant 0 : index
    %c0_16 = arith.constant 0 : index
    %22 = vector.load %arg7[%c0_15, %c0_16] : memref<1x1xf32, #tpu.memory_space<vmem>>, vector<1x1xf32>
    %23 = vector.broadcast %22 : vector<1x1xf32> to vector<8x1xf32>
    %24 = arith.addf %21, %23 : vector<8x1xf32>
    %cst_17 = arith.constant 0.000000e+00 : f32
    %25 = vector.broadcast %cst_17 : f32 to vector<8x1xf32>
    %26 = arith.subf %25, %24 : vector<8x1xf32>
    %27 = math.exp %26 : vector<8x1xf32>
    %cst_18 = arith.constant 1.000000e+00 : f32
    %28 = vector.broadcast %cst_18 : f32 to vector<8x1xf32>
    %29 = arith.addf %28, %27 : vector<8x1xf32>
    %30 = tpu.reciprocal %29 : vector<8x1xf32> -> vector<8x1xf32>
    %c0_19 = arith.constant 0 : index
    %c0_20 = arith.constant 0 : index
    %31 = vector.load %arg8[%c0_19, %c0_20] : memref<8x1xf32, #tpu.memory_space<vmem>>, vector<8x1xf32>
    tpu.vector_store %arg8[%c0_19, %c0_20], %30 {strides = array<i32>} : memref<8x1xf32, #tpu.memory_space<vmem>>, vector<8x1xf32>,
    return
  }
  func.func @transform_0(%arg0: i32) -> (i32, i32) {
    %c0_i32 = arith.constant 0 : i32
    %c0_i32_0 = arith.constant 0 : i32
    return %arg0, %c0_i32 : i32, i32
  }
  func.func @transform_1(%arg0: i32) -> (i32, i32) {
    %c0_i32 = arith.constant 0 : i32
    %c0_i32_0 = arith.constant 0 : i32
    %c0_i32_1 = arith.constant 0 : i32
    return %c0_i32, %c0_i32_0 : i32, i32
  }
  func.func @transform_2(%arg0: i32) -> (i32, i32) {
    %c0_i32 = arith.constant 0 : i32
    %c0_i32_0 = arith.constant 0 : i32
    %c0_i32_1 = arith.constant 0 : i32
    return %c0_i32, %c0_i32_0 : i32, i32
  }
  func.func @transform_3(%arg0: i32) -> (i32, i32) {
    %c0_i32 = arith.constant 0 : i32
    %c0_i32_0 = arith.constant 0 : i32
    %c0_i32_1 = arith.constant 0 : i32
    return %c0_i32, %c0_i32_0 : i32, i32
  }
  func.func @transform_4(%arg0: i32) -> (i32, i32) {
    %c0_i32 = arith.constant 0 : i32
    %c0_i32_0 = arith.constant 0 : i32
    %c0_i32_1 = arith.constant 0 : i32
    return %c0_i32, %c0_i32_0 : i32, i32
  }
  func.func @transform_5(%arg0: i32) -> (i32, i32) {
    %c0_i32 = arith.constant 0 : i32
    %c0_i32_0 = arith.constant 0 : i32
    %c0_i32_1 = arith.constant 0 : i32
    return %c0_i32, %c0_i32_0 : i32, i32
  }
  func.func @transform_6(%arg0: i32) -> (i32, i32) {
    %c0_i32 = arith.constant 0 : i32
    %c0_i32_0 = arith.constant 0 : i32
    %c0_i32_1 = arith.constant 0 : i32
    return %c0_i32, %c0_i32_0 : i32, i32
  }
  func.func @transform_7(%arg0: i32) -> (i32, i32) {
    %c0_i32 = arith.constant 0 : i32
    %c0_i32_0 = arith.constant 0 : i32
    return %arg0, %c0_i32 : i32, i32
  }
}

</mosaic_0001>

<bundles_post_ra>
// kernel: tpu_custom_call.1
= control target key start
LH: loop header
LB: loop body
LE: loop exit
PB: predicated region body
PF: predicated region fallthrough
CT: control target
= control target key end

     0   :  { %s5792_s0 = inlined_call_operand.hbm [shape: f32[8,3136], index: 0, kind: input, shape index: {}]   ;;  %s5793_s1 = inlined_call_operand.hbm [shape: bf16[3136,256], index: 1, kind: input, shape index: {}]   ;;  %s5794_s2 = inlined_call_operand.hbm [shape: f32[1,256], index: 2, kind: input, shape index: {}]   ;;  %s5795_s3 = inlined_call_operand.hbm [shape: bf16[256,128], index: 3, kind: input, shape index: {}]   ;;  %s5796_s4 = inlined_call_operand.hbm [shape: f32[1,128], index: 4, kind: input, shape index: {}]   ;;  %s5797_s5 = inlined_call_operand.hbm [shape: f32[1,128], index: 5, kind: input, shape index: {}]   ;;  %s5798_s6 = inlined_call_operand.<no memory space> [shape: f32[1,1], index: 6, kind: input, shape index: {}]   ;;  %s5799_s7 = inlined_call_operand.vmem [shape: f32[8,1], index: 7, kind: output, shape index: {}]  }
   0x1   :  { %v12_v0 = vstv %s5798_s6 }
   0x2   :  { %13 = vst [vmem:[#allocation2] sm:$0x1] %v12_v0 }
   0x3   :  { %14 = vsyncpa [#allocation4], 0 }
   0x4   :  { %15 = vsyncpa [#allocation6], 0 }
   0x5   :  { %16 = vsyncpa [#allocation9], 0  ;;  %s33_s28 = sshll.u32 %s5793_s1, 4  ;;  %s34_s28 = int_to_ptr.hbm [resolvable:$true] %s33_s28 }
   0x6   :  { %17 = vsyncpa [#allocation12], 0  ;;  %s5592_s29 = smov [#allocation5]   ;;  %s57_s10 = sshll.u32 %s5795_s3, 4  ;;  %s58_s10 = int_to_ptr.hbm [resolvable:$true] %s57_s10 }
   0x7   :  { %s35_s30 = sshll.u32 %s5592_s29, 4  ;;  %s5593_s11 = smov 128   ;;  %s36_s30 = int_to_ptr.vmem [resolvable:$true] %s35_s30 }
   0x8   :  { %s5594_s12 = smov 8   ;;  %s5595_s6 = smov [#allocation8]  }
   0x9   :  { %41 = dma.hbm_to_vmem [thread:$0]  %s34_s28, 50176, %s36_s30, [#allocation6], %s5593_s11, %s5593_s11, %s5594_s12  }
   0xa   :  { %s59_s13 = sshll.u32 %s5595_s6, 4  ;;  %s5596_s14 = smov 64   ;;  %s60_s13 = int_to_ptr.vmem [resolvable:$true] %s59_s13 }
   0xb   :  { %s5597_s15 = smov 4   ;;  %s23_s17 = sshll.u32 %s5792_s0, 4  ;;  %s24_s17 = int_to_ptr.hbm [resolvable:$true] %s23_s17 }
   0xc   :  { %65 = dma.hbm_to_vmem [thread:$0]  %s58_s10, 2048, %s60_s13, [#allocation9], %s5596_s14, %s5596_s14, %s5597_s15  }
   0xd   :  { %s5598_s18 = smov [#allocation3]   ;;  %s47_s21 = sshll.u32 %s5794_s2, 4  ;;  %s48_s21 = int_to_ptr.hbm [resolvable:$true] %s47_s21 }
   0xe   :  { %s25_s19 = sshll.u32 %s5598_s18, 4  ;;  %s5599_s22 = smov [#allocation7]   ;;  %s26_s19 = int_to_ptr.vmem [resolvable:$true] %s25_s19 }
   0xf   :  { %28 = dma.hbm_to_vmem [thread:$0]  %s24_s17, 3200, %s26_s19, [#allocation4]  }
  0x10   :  { %s49_s23 = sshll.u32 %s5599_s22, 4  ;;  %s71_s26 = sshll.u32 %s5796_s4, 4  ;;  %s50_s23 = int_to_ptr.vmem [resolvable:$true] %s49_s23  ;;  %s72_s26 = int_to_ptr.hbm [resolvable:$true] %s71_s26 }
  0x11   :  { %52 = dma.hbm_to_vmem [thread:$0]  %s48_s21, 32, %s50_s23, [#allocation6]  }
  0x12   :  { %s82_s28 = sshll.u32 %s5797_s5, 4  ;;  %s5600_s29 = smov [#allocation10]   ;;  %s83_s28 = int_to_ptr.hbm [resolvable:$true] %s82_s28 }
  0x13   :  { %s73_s30 = sshll.u32 %s5600_s29, 4  ;;  %s5601_s2 = smov [#allocation11]   ;;  %s74_s30 = int_to_ptr.vmem [resolvable:$true] %s73_s30 }
  0x14   :  { %76 = dma.hbm_to_vmem [thread:$0]  %s72_s26, 16, %s74_s30, [#allocation9]  }
  0x15   :  { %s84_s8 = sshll.u32 %s5601_s2, 4  ;;  %s85_s8 = int_to_ptr.vmem [resolvable:$true] %s84_s8 }
  0x16   :  { %87 = dma.hbm_to_vmem [thread:$0]  %s83_s28, 16, %s85_s8, [#allocation12]  }
  0x17   :  { %5584 = dma.done.wait [#allocation4], 3200  }
  0x18   :  { %5585 = vsyncadd [#allocation4], 4294964096 }
  0x19   :  { %5586 = dma.done.wait [#allocation6], 50208  }
  0x1a   :  { %5587 = vsyncadd [#allocation6], 4294917088 }
  0x1b   :  { %5588 = dma.done.wait [#allocation9], 2064  }
  0x1c   :  { %5589 = vsyncadd [#allocation9], 4294965232 }
  0x1d   :  { %5590 = dma.done.wait [#allocation12], 16  }
  0x1e   :  { %5591 = vsyncadd [#allocation12], 4294967280  ;;  %v3438_v1 = vld [vmem:[#allocation5 + $0x70] sm:$0xf]  ;;  %v5029_v2 = vld [vmem:[#allocation5 + $0x74] sm:$0xf0] }
  0x1f   :  { %v3502_v3 = vld [vmem:[#allocation5 + $0xf0] sm:$0xf]  ;;  %v3439_v4 = vor.u32 %v5029_v2, %v3438_v1  ;;  %v5045_v5 = vld [vmem:[#allocation5 + $0xf4] sm:$0xf0]  ;;  %v3430_v12 = vld [vmem:[#allocation5 + $0x60] sm:$0xf] }
  0x20   :  { %v3566_v6 = vld [vmem:[#allocation5 + $0x170] sm:$0xf]  ;;  %v5061_v7 = vld [vmem:[#allocation5 + $0x174] sm:$0xf0]  ;;  %v3503_v8 = vor.u32 %v5045_v5, %v3502_v3  ;;  %v5027_v14 = vld [vmem:[#allocation5 + $0x64] sm:$0xf0] }
  0x21   :  { %v3567_v9 = vor.u32 %v5061_v7, %v3566_v6  ;;  %v3630_v10 = vld [vmem:[#allocation5 + $0x1f0] sm:$0xf]  ;;  %v5077_v11 = vld [vmem:[#allocation5 + $0x1f4] sm:$0xf0]  ;;  %2527 = vmatpush.bf16.msra.mxu0 %v3439_v4  ;;  %v3494_v15 = vld [vmem:[#allocation5 + $0xe0] sm:$0xf]  ;;  %v3431_v17 = vor.u32 %v5027_v14, %v3430_v12 }
  0x22   :  { %v3631_v13 = vor.u32 %v5077_v11, %v3630_v10  ;;  %v5043_v16 = vld [vmem:[#allocation5 + $0xe4] sm:$0xf0]  ;;  %2540 = vmatpush.bf16.msra.mxu1 %v3503_v8  ;;  %v3558_v19 = vld [vmem:[#allocation5 + $0x160] sm:$0xf]  ;;  %v3422_v24 = vld [vmem:[#allocation5 + $0x50] sm:$0xf] }
  0x23   :  { %2553 = vmatpush.bf16.msra.mxu2 %v3567_v9  ;;  %v3495_v18 = vor.u32 %v5043_v16, %v3494_v15  ;;  %v5059_v20 = vld [vmem:[#allocation5 + $0x164] sm:$0xf0]  ;;  %v3622_v21 = vld [vmem:[#allocation5 + $0x1e0] sm:$0xf]  ;;  %v5025_v25 = vld [vmem:[#allocation5 + $0x54] sm:$0xf0] }
  0x24   :  { %2566 = vmatpush.bf16.msra.mxu3 %v3631_v13  ;;  %v3559_v22 = vor.u32 %v5059_v20, %v3558_v19  ;;  %v5075_v23 = vld [vmem:[#allocation5 + $0x1e4] sm:$0xf0]  ;;  %v3486_v27 = vld [vmem:[#allocation5 + $0xd0] sm:$0xf]  ;;  %v5041_v28 = vld [vmem:[#allocation5 + $0xd4] sm:$0xf0]  ;;  %v3423_v30 = vor.u32 %v5025_v25, %v3422_v24 }
  0x25   :  { %v3623_v26 = vor.u32 %v5075_v23, %v3622_v21  ;;  %v3550_v29 = vld [vmem:[#allocation5 + $0x150] sm:$0xf]  ;;  %2528 = vmatpush.bf16.msra.mxu0 %v3431_v17  ;;  %v5057_v31 = vld [vmem:[#allocation5 + $0x154] sm:$0xf0]  ;;  %v3487_v34 = vor.u32 %v5041_v28, %v3486_v27  ;;  %v3414_v36 = vld [vmem:[#allocation5 + $0x40] sm:$0xf] }
  0x26   :  { %v3614_v32 = vld [vmem:[#allocation5 + $0x1d0] sm:$0xf]  ;;  %v5073_v33 = vld [vmem:[#allocation5 + $0x1d4] sm:$0xf0]  ;;  %2541 = vmatpush.bf16.msra.mxu1 %v3495_v18  ;;  %v3551_v35 = vor.u32 %v5057_v31, %v3550_v29  ;;  %v5023_v37 = vld [vmem:[#allocation5 + $0x44] sm:$0xf0] }
  0x27   :  { %2554 = vmatpush.bf16.msra.mxu2 %v3559_v22  ;;  %v3478_v38 = vld [vmem:[#allocation5 + $0xc0] sm:$0xf]  ;;  %v3615_v39 = vor.u32 %v5073_v33, %v3614_v32  ;;  %v5039_v40 = vld [vmem:[#allocation5 + $0xc4] sm:$0xf0]  ;;  %v3415_v45 = vor.u32 %v5023_v37, %v3414_v36  ;;  %v3406_v48 = vld [vmem:[#allocation5 + $0x30] sm:$0xf] }
  0x28   :  { %2567 = vmatpush.bf16.msra.mxu3 %v3623_v26  ;;  %v3542_v41 = vld [vmem:[#allocation5 + $0x140] sm:$0xf]  ;;  %v5055_v42 = vld [vmem:[#allocation5 + $0x144] sm:$0xf0]  ;;  %v3479_v46 = vor.u32 %v5039_v40, %v3478_v38  ;;  %v5021_v49 = vld [vmem:[#allocation5 + $0x34] sm:$0xf0] }
  0x29   :  { %v3606_v43 = vld [vmem:[#allocation5 + $0x1c0] sm:$0xf]  ;;  %v5071_v44 = vld [vmem:[#allocation5 + $0x1c4] sm:$0xf0]  ;;  %2529 = vmatpush.bf16.msra.mxu0 %v3423_v30  ;;  %v3543_v47 = vor.u32 %v5055_v42, %v3542_v41  ;;  %v3470_v50 = vld [vmem:[#allocation5 + $0xb0] sm:$0xf]  ;;  %v3407_v57 = vor.u32 %v5021_v49, %v3406_v48 }
  0x2a   :  { %2542 = vmatpush.bf16.msra.mxu1 %v3487_v34  ;;  %v3607_v51 = vor.u32 %v5071_v44, %v3606_v43  ;;  %v5037_v52 = vld [vmem:[#allocation5 + $0xb4] sm:$0xf0]  ;;  %v3534_v53 = vld [vmem:[#allocation5 + $0x130] sm:$0xf]  ;;  %v3398_v60 = vld [vmem:[#allocation5 + $0x20] sm:$0xf] }
  0x2b   :  { %2555 = vmatpush.bf16.msra.mxu2 %v3551_v35  ;;  %v5053_v54 = vld [vmem:[#allocation5 + $0x134] sm:$0xf0]  ;;  %v3598_v55 = vld [vmem:[#allocation5 + $0x1b0] sm:$0xf]  ;;  %v3471_v58 = vor.u32 %v5037_v52, %v3470_v50  ;;  %v5019_v61 = vld [vmem:[#allocation5 + $0x24] sm:$0xf0] }
  0x2c   :  { %2568 = vmatpush.bf16.msra.mxu3 %v3615_v39  ;;  %v5069_v56 = vld [vmem:[#allocation5 + $0x1b4] sm:$0xf0]  ;;  %v3535_v59 = vor.u32 %v5053_v54, %v3534_v53  ;;  %v3462_v62 = vld [vmem:[#allocation5 + $0xa0] sm:$0xf]  ;;  %v5035_v0 = vld [vmem:[#allocation5 + $0xa4] sm:$0xf0]  ;;  %v3399_v5 = vor.u32 %v5019_v61, %v3398_v60 }
  0x2d   :  { %2530 = vmatpush.bf16.msra.mxu0 %v3415_v45  ;;  %v3599_v63 = vor.u32 %v5069_v56, %v3598_v55  ;;  %v3526_v1 = vld [vmem:[#allocation5 + $0x120] sm:$0xf]  ;;  %v5051_v2 = vld [vmem:[#allocation5 + $0x124] sm:$0xf0]  ;;  %v3463_v6 = vor.u32 %v5035_v0, %v3462_v62  ;;  %v3390_v8 = vld [vmem:[#allocation5 + $0x10] sm:$0xf] }
  0x2e   :  { %2543 = vmatpush.bf16.msra.mxu1 %v3479_v46  ;;  %v3590_v3 = vld [vmem:[#allocation5 + $0x1a0] sm:$0xf]  ;;  %v5067_v4 = vld [vmem:[#allocation5 + $0x1a4] sm:$0xf0]  ;;  %v3527_v7 = vor.u32 %v5051_v2, %v3526_v1  ;;  %v5017_v9 = vld [vmem:[#allocation5 + $0x14] sm:$0xf0] }
  0x2f   :  { %2556 = vmatpush.bf16.msra.mxu2 %v3543_v47  ;;  %v3454_v10 = vld [vmem:[#allocation5 + $0x90] sm:$0xf]  ;;  %v3591_v11 = vor.u32 %v5067_v4, %v3590_v3  ;;  %v5033_v12 = vld [vmem:[#allocation5 + $0x94] sm:$0xf0]  ;;  %v3391_v17 = vor.u32 %v5017_v9, %v3390_v8  ;;  %v3382_v18 = vld [vmem:[#allocation5] sm:$0xf] }
  0x30   :  { %2569 = vmatpush.bf16.msra.mxu3 %v3607_v51  ;;  %v3518_v13 = vld [vmem:[#allocation5 + $0x110] sm:$0xf]  ;;  %v5049_v14 = vld [vmem:[#allocation5 + $0x114] sm:$0xf0]  ;;  %v5015_v19 = vld [vmem:[#allocation5 + $0x4] sm:$0xf0]  ;;  %v3455_v20 = vor.u32 %v5033_v12, %v3454_v10 }
  0x31   :  { %2531 = vmatpush.bf16.msra.mxu0 %v3407_v57  ;;  %v3582_v15 = vld [vmem:[#allocation5 + $0x190] sm:$0xf]  ;;  %v5065_v16 = vld [vmem:[#allocation5 + $0x194] sm:$0xf0]  ;;  %v3519_v21 = vor.u32 %v5049_v14, %v3518_v13  ;;  %v3446_v22 = vld [vmem:[#allocation5 + $0x80] sm:$0xf]  ;;  %v3383_v32 = vor.u32 %v5015_v19, %v3382_v18 }
  0x32   :  { %2544 = vmatpush.bf16.msra.mxu1 %v3471_v58  ;;  %v5031_v23 = vld [vmem:[#allocation5 + $0x84] sm:$0xf0]  ;;  %v3510_v24 = vld [vmem:[#allocation5 + $0x100] sm:$0xf]  ;;  %v3583_v25 = vor.u32 %v5065_v16, %v3582_v15  ;;  %v3694_v29 = vld [vmem:[#allocation5 + $0x270] sm:$0xf] }
  0x33   :  { %2557 = vmatpush.bf16.msra.mxu2 %v3535_v59  ;;  %v5047_v26 = vld [vmem:[#allocation5 + $0x104] sm:$0xf0]  ;;  %v3574_v27 = vld [vmem:[#allocation5 + $0x180] sm:$0xf]  ;;  %v5093_v30 = vld [vmem:[#allocation5 + $0x274] sm:$0xf0]  ;;  %v3447_v36 = vor.u32 %v5031_v23, %v3446_v22 }
  0x34   :  { %2570 = vmatpush.bf16.msra.mxu3 %v3599_v63  ;;  %v5063_v28 = vld [vmem:[#allocation5 + $0x184] sm:$0xf0]  ;;  %v3758_v31 = vld [vmem:[#allocation5 + $0x2f0] sm:$0xf]  ;;  %v5109_v33 = vld [vmem:[#allocation5 + $0x2f4] sm:$0xf0]  ;;  %v3511_v37 = vor.u32 %v5047_v26, %v3510_v24  ;;  %v3695_v41 = vor.u32 %v5093_v30, %v3694_v29 }
  0x35   :  { %2532 = vmatpush.bf16.msra.mxu0 %v3399_v5  ;;  %v3822_v34 = vld [vmem:[#allocation5 + $0x370] sm:$0xf]  ;;  %v5125_v35 = vld [vmem:[#allocation5 + $0x374] sm:$0xf0]  ;;  %v3575_v40 = vor.u32 %v5063_v28, %v3574_v27  ;;  %v3759_v42 = vor.u32 %v5109_v33, %v3758_v31  ;;  %v3686_v44 = vld [vmem:[#allocation5 + $0x260] sm:$0xf] }
  0x36   :  { %2545 = vmatpush.bf16.msra.mxu1 %v3463_v6  ;;  %v3886_v38 = vld [vmem:[#allocation5 + $0x3f0] sm:$0xf]  ;;  %v5141_v39 = vld [vmem:[#allocation5 + $0x3f4] sm:$0xf0]  ;;  %v3823_v43 = vor.u32 %v5125_v35, %v3822_v34  ;;  %v5091_v45 = vld [vmem:[#allocation5 + $0x264] sm:$0xf0] }
  0x37   :  { %2558 = vmatpush.bf16.msra.mxu2 %v3527_v7  ;;  %v3750_v46 = vld [vmem:[#allocation5 + $0x2e0] sm:$0xf]  ;;  %v3887_v47 = vor.u32 %v5141_v39, %v3886_v38  ;;  %v5107_v48 = vld [vmem:[#allocation5 + $0x2e4] sm:$0xf0]  ;;  %v3687_v53 = vor.u32 %v5091_v45, %v3686_v44  ;;  %v3678_v54 = vld [vmem:[#allocation5 + $0x250] sm:$0xf] }
  0x38   :  { %2571 = vmatpush.bf16.msra.mxu3 %v3591_v11  ;;  %v3814_v49 = vld [vmem:[#allocation5 + $0x360] sm:$0xf]  ;;  %v5123_v50 = vld [vmem:[#allocation5 + $0x364] sm:$0xf0]  ;;  %v5089_v55 = vld [vmem:[#allocation5 + $0x254] sm:$0xf0]  ;;  %v3751_v57 = vor.u32 %v5107_v48, %v3750_v46 }
  0x39   :  { %2533 = vmatpush.bf16.msra.mxu0 %v3391_v17  ;;  %v3878_v51 = vld [vmem:[#allocation5 + $0x3e0] sm:$0xf]  ;;  %v5139_v52 = vld [vmem:[#allocation5 + $0x3e4] sm:$0xf0]  ;;  %v3742_v56 = vld [vmem:[#allocation5 + $0x2d0] sm:$0xf]  ;;  %v3815_v58 = vor.u32 %v5123_v50, %v3814_v49  ;;  %v3679_v7 = vor.u32 %v5089_v55, %v3678_v54 }
  0x3a   :  { %2546 = vmatpush.bf16.msra.mxu1 %v3455_v20  ;;  %v5105_v59 = vld [vmem:[#allocation5 + $0x2d4] sm:$0xf0]  ;;  %v3806_v60 = vld [vmem:[#allocation5 + $0x350] sm:$0xf]  ;;  %v117_v61 = vld [vmem:[#allocation3 + $0x10] sm:$0xff]  ;;  %v3879_v62 = vor.u32 %v5139_v52, %v3878_v51  ;;  %vm2523_vm0 = vcmask 523264  }
  0x3b   :  { %2559 = vmatpush.bf16.msra.mxu2 %v3519_v21  ;;  %v5121_v63 = vld [vmem:[#allocation5 + $0x354] sm:$0xf0]  ;;  %v5663_v0 = vpack.c.bf16 %v117_v61, %v117_v61  ;;  %v118_v2 = vld [vmem:[#allocation3 + $0x18] sm:$0xff]  ;;  %v3670_v8 = vld [vmem:[#allocation5 + $0x240] sm:$0xf]  ;;  %v3743_v9 = vor.u32 %v5105_v59, %v3742_v56  ;;  %vm3370_vm4 = vcmask 7168  }
  0x3c   :  { %2572 = vmatpush.bf16.msra.mxu3 %v3583_v25  ;;  %v115_v1 = vld [vmem:[#allocation3] sm:$0xff]  ;;  %v3870_v3 = vld [vmem:[#allocation5 + $0x3d0] sm:$0xf]  ;;  %v5667_v6 = vpack.c.bf16 %v118_v2, %v118_v2  ;;  %v3807_v10 = vor.u32 %v5121_v63, %v3806_v60  ;;  %v5087_v11 = vld [vmem:[#allocation5 + $0x244] sm:$0xf0] }
  0x3d   :  { %2534 = vmatpush.bf16.msra.mxu0 %v3383_v32  ;;  %v5137_v4 = vld [vmem:[#allocation5 + $0x3d4] sm:$0xf0]  ;;  %v5665_v5 = vpack.c.bf16 %v115_v1, %v115_v1  ;;  %v3734_v12 = vld [vmem:[#allocation5 + $0x2c0] sm:$0xf]  ;;  %v5103_v15 = vld [vmem:[#allocation5 + $0x2c4] sm:$0xf0]  ;;  %v3671_v21 = vor.u32 %v5087_v11, %v3670_v8 }
  0x3e   :  { %2547 = vmatpush.bf16.msra.mxu1 %v3447_v36  ;;  %v116_v13 = vld [vmem:[#allocation3 + $0x8] sm:$0xff]  ;;  %v3871_v14 = vor.u32 %v5137_v4, %v3870_v3  ;;  %v5119_v17 = vld [vmem:[#allocation5 + $0x344] sm:$0xf0]  ;;  %v3735_v22 = vor.u32 %v5103_v15, %v3734_v12  ;;  %v3662_v24 = vld [vmem:[#allocation5 + $0x230] sm:$0xf] }
  0x3f   :  { %2560 = vmatpush.bf16.msra.mxu2 %v3511_v37  ;;  %v3798_v16 = vld [vmem:[#allocation5 + $0x340] sm:$0xf]  ;;  %v5671_v18 = vpack.c.bf16 %v116_v13, %v116_v13  ;;  %v5135_v20 = vld [vmem:[#allocation5 + $0x3c4] sm:$0xf0]  ;;  %v5085_v25 = vld [vmem:[#allocation5 + $0x234] sm:$0xf0] }
  0x40   :  { %2573 = vmatpush.bf16.msra.mxu3 %v3575_v40  ;;  %2535 = vmatmul.bf16.vlgmr.msra.gmra.mxu0 %v5665_v5  ;;  %v3862_v19 = vld [vmem:[#allocation5 + $0x3c0] sm:$0xf]  ;;  %v3799_v23 = vor.u32 %v5119_v17, %v3798_v16  ;;  %v3726_v26 = vld [vmem:[#allocation5 + $0x2b0] sm:$0xf]  ;;  %v5101_v28 = vld [vmem:[#allocation5 + $0x2b4] sm:$0xf0]  ;;  %v3663_v33 = vor.u32 %v5085_v25, %v3662_v24 }
  0x41   :  { %2579 = vmatpush.bf16.msrb.mxu0 %v3695_v41  ;;  %2548 = vmatmul.bf16.vlgmr.msra.gmra.mxu1 %v5671_v18  ;;  %v3863_v27 = vor.u32 %v5135_v20, %v3862_v19  ;;  %v3790_v29 = vld [vmem:[#allocation5 + $0x330] sm:$0xf]  ;;  %v5117_v30 = vld [vmem:[#allocation5 + $0x334] sm:$0xf0]  ;;  %v3727_v34 = vor.u32 %v5101_v28, %v3726_v26  ;;  %v3654_v36 = vld [vmem:[#allocation5 + $0x220] sm:$0xf] }
  0x42   :  { %2592 = vmatpush.bf16.msrb.mxu1 %v3759_v42  ;;  %2561 = vmatmul.bf16.vlgmr.msra.gmra.mxu2 %v5663_v0  ;;  %v3854_v31 = vld [vmem:[#allocation5 + $0x3b0] sm:$0xf]  ;;  %v5133_v32 = vld [vmem:[#allocation5 + $0x3b4] sm:$0xf0]  ;;  %v3791_v35 = vor.u32 %v5117_v30, %v3790_v29  ;;  %v5083_v37 = vld [vmem:[#allocation5 + $0x224] sm:$0xf0] }
  0x43   :  { %2605 = vmatpush.bf16.msrb.mxu2 %v3823_v43  ;;  %2574 = vmatmul.bf16.vlgmr.msra.gmra.mxu3 %v5667_v6  ;;  %v3718_v38 = vld [vmem:[#allocation5 + $0x2a0] sm:$0xf]  ;;  %v3855_v39 = vor.u32 %v5133_v32, %v3854_v31  ;;  %v5099_v40 = vld [vmem:[#allocation5 + $0x2a4] sm:$0xf0]  ;;  %v3655_v45 = vor.u32 %v5083_v37, %v3654_v36  ;;  %v3646_v48 = vld [vmem:[#allocation5 + $0x210] sm:$0xf] }
  0x44   :  { %2618 = vmatpush.bf16.msrb.mxu3 %v3887_v47  ;;  %v3782_v41 = vld [vmem:[#allocation5 + $0x320] sm:$0xf]  ;;  %v5115_v42 = vld [vmem:[#allocation5 + $0x324] sm:$0xf0]  ;;  %v3719_v46 = vor.u32 %v5099_v40, %v3718_v38  ;;  %v5081_v49 = vld [vmem:[#allocation5 + $0x214] sm:$0xf0] }
  0x45   :  { %2580 = vmatpush.bf16.msrb.mxu0 %v3687_v53  ;;  %v3846_v43 = vld [vmem:[#allocation5 + $0x3a0] sm:$0xf]  ;;  %v5131_v44 = vld [vmem:[#allocation5 + $0x3a4] sm:$0xf0]  ;;  %v3783_v47 = vor.u32 %v5115_v42, %v3782_v41  ;;  %v3710_v50 = vld [vmem:[#allocation5 + $0x290] sm:$0xf] }
  0x46   :  { %2593 = vmatpush.bf16.msrb.mxu1 %v3751_v57  ;;  %v3847_v51 = vor.u32 %v5131_v44, %v3846_v43  ;;  %v5097_v52 = vld [vmem:[#allocation5 + $0x294] sm:$0xf0]  ;;  %v3774_v53 = vld [vmem:[#allocation5 + $0x310] sm:$0xf]  ;;  %v3647_v57 = vor.u32 %v5081_v49, %v3646_v48  ;;  %v5079_v59 = vld [vmem:[#allocation5 + $0x204] sm:$0xf0] }
  0x47   :  { %2606 = vmatpush.bf16.msrb.mxu2 %v3815_v58  ;;  %v5113_v54 = vld [vmem:[#allocation5 + $0x314] sm:$0xf0]  ;;  %v3838_v55 = vld [vmem:[#allocation5 + $0x390] sm:$0xf]  ;;  %v3638_v58 = vld [vmem:[#allocation5 + $0x200] sm:$0xf]  ;;  %v3711_v60 = vor.u32 %v5097_v52, %v3710_v50 }
  0x48   :  { %2619 = vmatpush.bf16.msrb.mxu3 %v3879_v62  ;;  %v5129_v56 = vld [vmem:[#allocation5 + $0x394] sm:$0xf0]  ;;  %v3775_v61 = vor.u32 %v5113_v54, %v3774_v53  ;;  %v3702_v62 = vld [vmem:[#allocation5 + $0x280] sm:$0xf]  ;;  %v5095_v63 = vld [vmem:[#allocation5 + $0x284] sm:$0xf0]  ;;  %v3639_v11 = vor.u32 %v5079_v59, %v3638_v58 }
  0x49   :  { %2581 = vmatpush.bf16.msrb.mxu0 %v3679_v7  ;;  %v3766_v1 = vld [vmem:[#allocation5 + $0x300] sm:$0xf]  ;;  %v3839_v2 = vor.u32 %v5129_v56, %v3838_v55  ;;  %v5111_v3 = vld [vmem:[#allocation5 + $0x304] sm:$0xf0]  ;;  %v3950_v8 = vld [vmem:[#allocation5 + $0x470] sm:$0xf]  ;;  %v3703_v15 = vor.u32 %v5095_v63, %v3702_v62 }
  0x4a   :  { %2594 = vmatpush.bf16.msrb.mxu1 %v3743_v9  ;;  %v3830_v4 = vld [vmem:[#allocation5 + $0x380] sm:$0xf]  ;;  %v5127_v7 = vld [vmem:[#allocation5 + $0x384] sm:$0xf0]  ;;  %v5157_v9 = vld [vmem:[#allocation5 + $0x474] sm:$0xf0]  ;;  %v3767_v16 = vor.u32 %v5111_v3, %v3766_v1 }
  0x4b   :  { %2607 = vmatpush.bf16.msrb.mxu2 %v3807_v10  ;;  %v4014_v10 = vld [vmem:[#allocation5 + $0x4f0] sm:$0xf]  ;;  %v5173_v12 = vld [vmem:[#allocation5 + $0x4f4] sm:$0xf0]  ;;  %v121_v20 = vld [vmem:[#allocation3 + $0x30] sm:$0xff] }
  0x4c   :  { %2620 = vmatpush.bf16.msrb.mxu3 %v3871_v14  ;;  %v4078_v13 = vld [vmem:[#allocation5 + $0x570] sm:$0xf]  ;;  %v5189_v14 = vld [vmem:[#allocation5 + $0x574] sm:$0xf0]  ;;  %v4015_v26 = vor.u32 %v5173_v12, %v4014_v10  ;;  %v5155_v28 = vld [vmem:[#allocation5 + $0x464] sm:$0xf0]  ;;  %v5675_v32 = vpack.c.bf16 %v121_v20, %v121_v20 }
  0x4d   :  { %2582 = vmatpush.bf16.msrb.mxu0 %v3671_v21  ;;  %v4142_v17 = vld [vmem:[#allocation5 + $0x5f0] sm:$0xf]  ;;  %v5205_v19 = vld [vmem:[#allocation5 + $0x5f4] sm:$0xf0]  ;;  %v3831_v21 = vor.u32 %v5127_v7, %v3830_v4  ;;  %v4006_v29 = vld [vmem:[#allocation5 + $0x4e0] sm:$0xf] }
  0x4e   :  { %2595 = vmatpush.bf16.msrb.mxu1 %v3735_v22  ;;  %v3951_v22 = vor.u32 %v5157_v9, %v3950_v8  ;;  %v119_v24 = vld [vmem:[#allocation3 + $0x20] sm:$0xff]  ;;  %v122_v25 = vld [vmem:[#allocation3 + $0x38] sm:$0xff]  ;;  %v120_v30 = vld [vmem:[#allocation3 + $0x28] sm:$0xff]  ;;  %v4143_v31 = vor.u32 %v5205_v19, %v4142_v17 }
  0x4f   :  { %2608 = vmatpush.bf16.msrb.mxu2 %v3799_v23  ;;  %v3942_v23 = vld [vmem:[#allocation5 + $0x460] sm:$0xf]  ;;  %v5203_v37 = vld [vmem:[#allocation5 + $0x5e4] sm:$0xf0]  ;;  %v5677_v38 = vpack.c.bf16 %v119_v24, %v119_v24  ;;  %v5681_v41 = vpack.c.bf16 %v120_v30, %v120_v30  ;;  %v3934_v44 = vld [vmem:[#allocation5 + $0x450] sm:$0xf] }
  0x50   :  { %2621 = vmatpush.bf16.msrb.mxu3 %v3863_v27  ;;  %v4079_v27 = vor.u32 %v5189_v14, %v4078_v13  ;;  %v4134_v36 = vld [vmem:[#allocation5 + $0x5e0] sm:$0xf]  ;;  %v3943_v40 = vor.u32 %v5155_v28, %v3942_v23  ;;  %v5169_v48 = vld [vmem:[#allocation5 + $0x4d4] sm:$0xf0]  ;;  %v4062_v49 = vld [vmem:[#allocation5 + $0x550] sm:$0xf] }
  0x51   :  { %2583 = vmatpush.bf16.msrb.mxu0 %v3663_v33  ;;  %v5171_v33 = vld [vmem:[#allocation5 + $0x4e4] sm:$0xf0]  ;;  %v5185_v50 = vld [vmem:[#allocation5 + $0x554] sm:$0xf0]  ;;  %v3926_v56 = vld [vmem:[#allocation5 + $0x440] sm:$0xf] }
  0x52   :  { %2596 = vmatpush.bf16.msrb.mxu1 %v3727_v34  ;;  %v4070_v34 = vld [vmem:[#allocation5 + $0x560] sm:$0xf]  ;;  %v4007_v42 = vor.u32 %v5171_v33, %v4006_v29  ;;  %v5201_v52 = vld [vmem:[#allocation5 + $0x5d4] sm:$0xf0]  ;;  %v4063_v55 = vor.u32 %v5185_v50, %v4062_v49  ;;  %v5183_v62 = vld [vmem:[#allocation5 + $0x544] sm:$0xf0] }
  0x53   :  { %2609 = vmatpush.bf16.msrb.mxu2 %v3791_v35  ;;  %v5187_v35 = vld [vmem:[#allocation5 + $0x564] sm:$0xf0]  ;;  %v3990_v58 = vld [vmem:[#allocation5 + $0x4c0] sm:$0xf]  ;;  %v3918_v7 = vld [vmem:[#allocation5 + $0x430] sm:$0xf] }
  0x54   :  { %2622 = vmatpush.bf16.msrb.mxu3 %v3855_v39  ;;  %v5679_v39 = vpack.c.bf16 %v122_v25, %v122_v25  ;;  %v4071_v43 = vor.u32 %v5187_v35, %v4070_v34  ;;  %v4118_v63 = vld [vmem:[#allocation5 + $0x5c0] sm:$0xf]  ;;  %v5199_v1 = vld [vmem:[#allocation5 + $0x5c4] sm:$0xf0]  ;;  %v5149_v8 = vld [vmem:[#allocation5 + $0x434] sm:$0xf0] }
  0x55   :  { %2584 = vmatpush.bf16.msrb.mxu0 %v3655_v45  ;;  %v5153_v45 = vld [vmem:[#allocation5 + $0x454] sm:$0xf0]  ;;  %v3982_v9 = vld [vmem:[#allocation5 + $0x4b0] sm:$0xf]  ;;  %v4119_v10 = vor.u32 %v5199_v1, %v4118_v63  ;;  %v3910_v20 = vld [vmem:[#allocation5 + $0x420] sm:$0xf] }
  0x56   :  { %2597 = vmatpush.bf16.msrb.mxu1 %v3719_v46  ;;  %v3998_v46 = vld [vmem:[#allocation5 + $0x4d0] sm:$0xf]  ;;  %v3935_v53 = vor.u32 %v5153_v45, %v3934_v44  ;;  %v5181_v13 = vld [vmem:[#allocation5 + $0x534] sm:$0xf0]  ;;  %v5163_v24 = vld [vmem:[#allocation5 + $0x4a4] sm:$0xf0] }
  0x57   :  { %2610 = vmatpush.bf16.msrb.mxu2 %v3783_v47  ;;  %v4135_v47 = vor.u32 %v5203_v37, %v4134_v36  ;;  %v3999_v54 = vor.u32 %v5169_v48, %v3998_v46  ;;  %v4046_v12 = vld [vmem:[#allocation5 + $0x530] sm:$0xf]  ;;  %v4038_v25 = vld [vmem:[#allocation5 + $0x520] sm:$0xf]  ;;  %v5195_v28 = vld [vmem:[#allocation5 + $0x5a4] sm:$0xf0] }
  0x58   :  { %2623 = vmatpush.bf16.msrb.mxu3 %v3847_v51  ;;  %v4126_v51 = vld [vmem:[#allocation5 + $0x5d0] sm:$0xf]  ;;  %v4047_v19 = vor.u32 %v5181_v13, %v4046_v12  ;;  %v5145_v34 = vld [vmem:[#allocation5 + $0x414] sm:$0xf0]  ;;  %v3894_v45 = vld [vmem:[#allocation5 + $0x400] sm:$0xf] }
  0x59   :  { %2585 = vmatpush.bf16.msrb.mxu0 %v3647_v57  ;;  %v5151_v57 = vld [vmem:[#allocation5 + $0x444] sm:$0xf0]  ;;  %v4127_v59 = vor.u32 %v5201_v52, %v4126_v51  ;;  %v4110_v14 = vld [vmem:[#allocation5 + $0x5b0] sm:$0xf]  ;;  %v5161_v37 = vld [vmem:[#allocation5 + $0x494] sm:$0xf0] }
  0x5a   :  { %2598 = vmatpush.bf16.msrb.mxu1 %v3711_v60  ;;  %v5167_v60 = vld [vmem:[#allocation5 + $0x4c4] sm:$0xf0]  ;;  %v3902_v33 = vld [vmem:[#allocation5 + $0x410] sm:$0xf]  ;;  %v5193_v44 = vld [vmem:[#allocation5 + $0x594] sm:$0xf0] }
  0x5b   :  { %2611 = vmatpush.bf16.msrb.mxu2 %v3775_v61  ;;  %v4054_v61 = vld [vmem:[#allocation5 + $0x540] sm:$0xf]  ;;  %v3991_v3 = vor.u32 %v5167_v60, %v3990_v58  ;;  %v3966_v35 = vld [vmem:[#allocation5 + $0x490] sm:$0xf]  ;;  %v3903_v46 = vor.u32 %v5145_v34, %v3902_v33  ;;  %v5159_v49 = vld [vmem:[#allocation5 + $0x484] sm:$0xf0] }
  0x5c   :  { %2624 = vmatpush.bf16.msrb.mxu3 %v3839_v2  ;;  %v3927_v2 = vor.u32 %v5151_v57, %v3926_v56  ;;  %v4055_v4 = vor.u32 %v5183_v62, %v4054_v61  ;;  %v3958_v48 = vld [vmem:[#allocation5 + $0x480] sm:$0xf]  ;;  %v3967_v50 = vor.u32 %v5161_v37, %v3966_v35  ;;  %v5191_v56 = vld [vmem:[#allocation5 + $0x584] sm:$0xf0]  ;;  %v4206_v57 = vld [vmem:[#allocation5 + $0x670] sm:$0xf] }
  0x5d   :  { %2586 = vmatpush.bf16.msrb.mxu0 %v3639_v11  ;;  %v5165_v11 = vld [vmem:[#allocation5 + $0x4b4] sm:$0xf0]  ;;  %v4022_v52 = vld [vmem:[#allocation5 + $0x500] sm:$0xf]  ;;  %v4334_v62 = vld [vmem:[#allocation5 + $0x770] sm:$0xf]  ;;  %v3959_v1 = vor.u32 %v5159_v49, %v3958_v48 }
  0x5e   :  { %2599 = vmatpush.bf16.msrb.mxu1 %v3703_v15  ;;  %v5197_v15 = vld [vmem:[#allocation5 + $0x5b4] sm:$0xf0]  ;;  %v3983_v17 = vor.u32 %v5165_v11, %v3982_v9  ;;  %v124_v11 = vld [vmem:[#allocation3 + $0x48] sm:$0xff]  ;;  %v126_v12 = vld [vmem:[#allocation3 + $0x58] sm:$0xff] }
  0x5f   :  { %2612 = vmatpush.bf16.msrb.mxu2 %v3767_v16  ;;  %v3919_v16 = vor.u32 %v5149_v8, %v3918_v7  ;;  %v4111_v23 = vor.u32 %v5197_v15, %v4110_v14  ;;  %v5221_v58 = vld [vmem:[#allocation5 + $0x674] sm:$0xf0]  ;;  %v4198_v15 = vld [vmem:[#allocation5 + $0x660] sm:$0xf]  ;;  %v4190_v33 = vld [vmem:[#allocation5 + $0x650] sm:$0xf] }
  0x60   :  { %2625 = vmatpush.bf16.msrb.mxu3 %v3831_v21  ;;  %2587 = vmatmul.bf16.vlgmr.msrb.gmra.mxu0 %v5677_v38  ;;  %v5147_v21 = vld [vmem:[#allocation5 + $0x424] sm:$0xf0]  ;;  %v5237_v60 = vld [vmem:[#allocation5 + $0x6f4] sm:$0xf0]  ;;  %v4207_v9 = vor.u32 %v5221_v58, %v4206_v57  ;;  %v4254_v35 = vld [vmem:[#allocation5 + $0x6d0] sm:$0xf] }
  0x61   :  { %2631 = vmatpush.bf16.msra.mxu0 %v3951_v22  ;;  %2600 = vmatmul.bf16.vlgmr.msrb.gmra.mxu1 %v5681_v41  ;;  %v3974_v22 = vld [vmem:[#allocation5 + $0x4a0] sm:$0xf]  ;;  %v3911_v29 = vor.u32 %v5147_v21, %v3910_v20  ;;  %v5253_v63 = vld [vmem:[#allocation5 + $0x774] sm:$0xf0]  ;;  %v5235_v21 = vld [vmem:[#allocation5 + $0x6e4] sm:$0xf0] }
  0x62   :  { %2644 = vmatpush.bf16.msra.mxu1 %v4015_v26  ;;  %2613 = vmatmul.bf16.vlgmr.msrb.gmra.mxu2 %v5675_v32  ;;  %v5179_v26 = vld [vmem:[#allocation5 + $0x524] sm:$0xf0]  ;;  %v3975_v30 = vor.u32 %v5163_v24, %v3974_v22  ;;  %v123_v7 = vld [vmem:[#allocation3 + $0x40] sm:$0xff]  ;;  %v4335_v14 = vor.u32 %v5253_v63, %v4334_v62  ;;  %v4326_v22 = vld [vmem:[#allocation5 + $0x760] sm:$0xf] }
  0x63   :  { %2657 = vmatpush.bf16.msra.mxu2 %v4079_v27  ;;  %2626 = vmatmul.bf16.vlgmr.msrb.gmra.mxu3 %v5679_v39  ;;  %v4102_v27 = vld [vmem:[#allocation5 + $0x5a0] sm:$0xf]  ;;  %v5687_v20 = vpack.c.bf16 %v123_v7, %v123_v7  ;;  %v5217_v34 = vld [vmem:[#allocation5 + $0x654] sm:$0xf0]  ;;  %v5215_v49 = vld [vmem:[#allocation5 + $0x644] sm:$0xf0] }
  0x64   :  { %2670 = vmatpush.bf16.msra.mxu3 %v4143_v31  ;;  %v4039_v31 = vor.u32 %v5179_v26, %v4038_v25  ;;  %v4103_v36 = vor.u32 %v5195_v28, %v4102_v27  ;;  %v5691_v25 = vpack.c.bf16 %v124_v11, %v124_v11  ;;  %v4390_v26 = vld [vmem:[#allocation5 + $0x7e0] sm:$0xf]  ;;  %v5267_v27 = vld [vmem:[#allocation5 + $0x7e4] sm:$0xf0]  ;;  %v5693_v28 = vpack.c.bf16 %v126_v12, %v126_v12  ;;  %v5233_v37 = vld [vmem:[#allocation5 + $0x6d4] sm:$0xf0] }
  0x65   :  { %2632 = vmatpush.bf16.msra.mxu0 %v3943_v40  ;;  %v4030_v40 = vld [vmem:[#allocation5 + $0x510] sm:$0xf]  ;;  %v4182_v48 = vld [vmem:[#allocation5 + $0x640] sm:$0xf]  ;;  %v5261_v7 = vld [vmem:[#allocation5 + $0x7b4] sm:$0xf0] }
  0x66   :  { %2645 = vmatpush.bf16.msra.mxu1 %v4007_v42  ;;  %v5177_v42 = vld [vmem:[#allocation5 + $0x514] sm:$0xf0]  ;;  %v4183_v57 = vor.u32 %v5215_v49, %v4182_v48  ;;  %v4238_v62 = vld [vmem:[#allocation5 + $0x6b0] sm:$0xf]  ;;  %v4166_v11 = vld [vmem:[#allocation5 + $0x620] sm:$0xf] }
  0x67   :  { %2658 = vmatpush.bf16.msra.mxu2 %v4071_v43  ;;  %v4094_v43 = vld [vmem:[#allocation5 + $0x590] sm:$0xf]  ;;  %v4031_v51 = vor.u32 %v5177_v42, %v4030_v40  ;;  %v5249_v42 = vld [vmem:[#allocation5 + $0x754] sm:$0xf0]  ;;  %v5211_v12 = vld [vmem:[#allocation5 + $0x624] sm:$0xf0] }
  0x68   :  { %2671 = vmatpush.bf16.msra.mxu3 %v4135_v47  ;;  %v5143_v47 = vld [vmem:[#allocation5 + $0x404] sm:$0xf0]  ;;  %v4318_v40 = vld [vmem:[#allocation5 + $0x750] sm:$0xf]  ;;  %v4278_v48 = vld [vmem:[#allocation5 + $0x700] sm:$0xf] }
  0x69   :  { %2633 = vmatpush.bf16.msra.mxu0 %v3935_v53  ;;  %v5175_v53 = vld [vmem:[#allocation5 + $0x504] sm:$0xf0]  ;;  %v3895_v61 = vor.u32 %v5143_v47, %v3894_v45  ;;  %v4191_v45 = vor.u32 %v5217_v34, %v4190_v33  ;;  %v4319_v47 = vor.u32 %v5249_v42, %v4318_v40  ;;  %v5225_v33 = vld [vmem:[#allocation5 + $0x694] sm:$0xf0]  ;;  %v4286_v34 = vld [vmem:[#allocation5 + $0x710] sm:$0xf] }
  0x6a   :  { %2646 = vmatpush.bf16.msra.mxu1 %v3999_v54  ;;  %v4086_v54 = vld [vmem:[#allocation5 + $0x580] sm:$0xf] }
  0x6b   :  { %2659 = vmatpush.bf16.msra.mxu2 %v4063_v55  ;;  %v4095_v55 = vor.u32 %v5193_v44, %v4094_v43  ;;  %v4087_v8 = vor.u32 %v5191_v56, %v4086_v54  ;;  %v4382_v43 = vld [vmem:[#allocation5 + $0x7d0] sm:$0xf]  ;;  %v5265_v44 = vld [vmem:[#allocation5 + $0x7d4] sm:$0xf0]  ;;  %v5247_v54 = vld [vmem:[#allocation5 + $0x744] sm:$0xf0] }
  0x6c   :  { %2672 = vmatpush.bf16.msra.mxu3 %v4127_v59  ;;  %v4270_v59 = vld [vmem:[#allocation5 + $0x6f0] sm:$0xf]  ;;  %v5263_v56 = vld [vmem:[#allocation5 + $0x7c4] sm:$0xf0]  ;;  %v4150_v42 = vld [vmem:[#allocation5 + $0x600] sm:$0xf] }
  0x6d   :  { %2634 = vmatpush.bf16.msra.mxu0 %v3927_v2  ;;  %v4023_v2 = vor.u32 %v5175_v53, %v4022_v52  ;;  %v4271_v13 = vor.u32 %v5237_v60, %v4270_v59  ;;  %v5231_v52 = vld [vmem:[#allocation5 + $0x6c4] sm:$0xf0]  ;;  %v4310_v53 = vld [vmem:[#allocation5 + $0x740] sm:$0xf]  ;;  %v4174_v60 = vld [vmem:[#allocation5 + $0x630] sm:$0xf] }
  0x6e   :  { %2647 = vmatpush.bf16.msra.mxu1 %v3991_v3  ;;  %v4398_v3 = vld [vmem:[#allocation5 + $0x7f0] sm:$0xf]  ;;  %v4311_v59 = vor.u32 %v5247_v54, %v4310_v53  ;;  %v5285_v54 = vld [vmem:[#allocation5 + $0x874] sm:$0xf0] }
  0x6f   :  { %2660 = vmatpush.bf16.msra.mxu2 %v4055_v4  ;;  %v5269_v4 = vld [vmem:[#allocation5 + $0x7f4] sm:$0xf0]  ;;  %v4462_v53 = vld [vmem:[#allocation5 + $0x870] sm:$0xf] }
  0x70   :  { %2673 = vmatpush.bf16.msra.mxu3 %v4119_v10  ;;  %v125_v10 = vld [vmem:[#allocation3 + $0x50] sm:$0xff] }
  0x71   :  { %2635 = vmatpush.bf16.msra.mxu0 %v3919_v16  ;;  %v5219_v16 = vld [vmem:[#allocation5 + $0x664] sm:$0xf0]  ;;  %v5689_v24 = vpack.c.bf16 %v125_v10, %v125_v10 }
  0x72   :  { %2648 = vmatpush.bf16.msra.mxu1 %v3983_v17  ;;  %v4262_v17 = vld [vmem:[#allocation5 + $0x6e0] sm:$0xf] }
  0x73   :  { %2661 = vmatpush.bf16.msra.mxu2 %v4047_v19  ;;  %v4399_v19 = vor.u32 %v5269_v4, %v4398_v3  ;;  %v5245_v3 = vld [vmem:[#allocation5 + $0x734] sm:$0xf0]  ;;  %v4366_v4 = vld [vmem:[#allocation5 + $0x7b0] sm:$0xf] }
  0x74   :  { %2674 = vmatpush.bf16.msra.mxu3 %v4111_v23  ;;  %v5251_v23 = vld [vmem:[#allocation5 + $0x764] sm:$0xf0] }
  0x75   :  { %2636 = vmatpush.bf16.msra.mxu0 %v3911_v29  ;;  %v4199_v29 = vor.u32 %v5219_v16, %v4198_v15  ;;  %v5227_v15 = vld [vmem:[#allocation5 + $0x6a4] sm:$0xf0]  ;;  %v4294_v16 = vld [vmem:[#allocation5 + $0x720] sm:$0xf] }
  0x76   :  { %2649 = vmatpush.bf16.msra.mxu1 %v3975_v30  ;;  %v4263_v30 = vor.u32 %v5235_v21, %v4262_v17  ;;  %v5243_v17 = vld [vmem:[#allocation5 + $0x724] sm:$0xf0] }
  0x77   :  { %2662 = vmatpush.bf16.msra.mxu2 %v4039_v31  ;;  %v4327_v31 = vor.u32 %v5251_v23, %v4326_v22  ;;  %v5259_v21 = vld [vmem:[#allocation5 + $0x7a4] sm:$0xf0]  ;;  %v4167_v22 = vor.u32 %v5211_v12, %v4166_v11  ;;  %v4454_v11 = vld [vmem:[#allocation5 + $0x860] sm:$0xf] }
  0x78   :  { %2675 = vmatpush.bf16.msra.mxu3 %v4103_v36  ;;  %v4391_v36 = vor.u32 %v5267_v27, %v4390_v26  ;;  %v4295_v26 = vor.u32 %v5243_v17, %v4294_v16  ;;  %v4158_v27 = vld [vmem:[#allocation5 + $0x610] sm:$0xf]  ;;  %v5283_v12 = vld [vmem:[#allocation5 + $0x864] sm:$0xf0]  ;;  %v4582_v17 = vld [vmem:[#allocation5 + $0x960] sm:$0xf] }
  0x79   :  { %2637 = vmatpush.bf16.msra.mxu0 %v3903_v46  ;;  %v4255_v46 = vor.u32 %v5233_v37, %v4254_v35  ;;  %v5241_v35 = vld [vmem:[#allocation5 + $0x714] sm:$0xf0]  ;;  %v5299_v16 = vld [vmem:[#allocation5 + $0x8e4] sm:$0xf0] }
  0x7a   :  { %2650 = vmatpush.bf16.msra.mxu1 %v3967_v50  ;;  %v4246_v50 = vld [vmem:[#allocation5 + $0x6c0] sm:$0xf]  ;;  %v5257_v37 = vld [vmem:[#allocation5 + $0x794] sm:$0xf0] }
  0x7b   :  { %2663 = vmatpush.bf16.msra.mxu2 %v4031_v51  ;;  %v4383_v51 = vor.u32 %v5265_v44, %v4382_v43  ;;  %v4247_v58 = vor.u32 %v5231_v52, %v4246_v50  ;;  %v5207_v43 = vld [vmem:[#allocation5 + $0x604] sm:$0xf0] }
  0x7c   :  { %2676 = vmatpush.bf16.msra.mxu3 %v4095_v55  ;;  %v4374_v55 = vld [vmem:[#allocation5 + $0x7c0] sm:$0xf]  ;;  %v5239_v50 = vld [vmem:[#allocation5 + $0x704] sm:$0xf0] }
  0x7d   :  { %2638 = vmatpush.bf16.msra.mxu0 %v3895_v61  ;;  %v5213_v61 = vld [vmem:[#allocation5 + $0x634] sm:$0xf0]  ;;  %v4375_v63 = vor.u32 %v5263_v56, %v4374_v55  ;;  %v5255_v52 = vld [vmem:[#allocation5 + $0x784] sm:$0xf0]  ;;  %v4526_v55 = vld [vmem:[#allocation5 + $0x8f0] sm:$0xf]  ;;  %v4151_v56 = vor.u32 %v5207_v43, %v4150_v42 }
  0x7e   :  { %2651 = vmatpush.bf16.msra.mxu1 %v3959_v1  ;;  %v5229_v1 = vld [vmem:[#allocation5 + $0x6b4] sm:$0xf0]  ;;  %v4638_v43 = vld [vmem:[#allocation5 + $0x9d0] sm:$0xf] }
  0x7f   :  { %2664 = vmatpush.bf16.msra.mxu2 %v4023_v2  ;;  %v4302_v2 = vld [vmem:[#allocation5 + $0x730] sm:$0xf]  ;;  %v5313_v42 = vld [vmem:[#allocation5 + $0x954] sm:$0xf0] }
  0x80   :  { %2677 = vmatpush.bf16.msra.mxu3 %v4087_v8  ;;  %2639 = vmatmul.bf16.vlgmr.msra.gmra.mxu0 %v5687_v20  ;;  %v4175_v8 = vor.u32 %v5213_v61, %v4174_v60  ;;  %v4303_v10 = vor.u32 %v5245_v3, %v4302_v2  ;;  %v4279_v61 = vor.u32 %v5239_v50, %v4278_v48  ;;  %v4438_v48 = vld [vmem:[#allocation5 + $0x840] sm:$0xf] }
  0x81   :  { %2683 = vmatpush.bf16.msrb.mxu0 %v4207_v9  ;;  %2652 = vmatmul.bf16.vlgmr.msra.gmra.mxu1 %v5691_v25  ;;  %v4239_v9 = vor.u32 %v5229_v1, %v4238_v62  ;;  %v4654_v62 = vld [vmem:[#allocation5 + $0x9f0] sm:$0xf]  ;;  %v127_v1 = vld [vmem:[#allocation3 + $0x60] sm:$0xff]  ;;  %v4463_v3 = vor.u32 %v5285_v54, %v4462_v53  ;;  %v4502_v50 = vld [vmem:[#allocation5 + $0x8c0] sm:$0xf] }
  0x82   :  { %2696 = vmatpush.bf16.msrb.mxu1 %v4271_v13  ;;  %2665 = vmatmul.bf16.vlgmr.msra.gmra.mxu2 %v5689_v24  ;;  %v4230_v13 = vld [vmem:[#allocation5 + $0x6a0] sm:$0xf]  ;;  %v5311_v54 = vld [vmem:[#allocation5 + $0x944] sm:$0xf0] }
  0x83   :  { %2709 = vmatpush.bf16.msrb.mxu2 %v4335_v14  ;;  %2678 = vmatmul.bf16.vlgmr.msra.gmra.mxu3 %v5693_v28  ;;  %v4367_v14 = vor.u32 %v5261_v7, %v4366_v4  ;;  %v4231_v23 = vor.u32 %v5227_v15, %v4230_v13  ;;  %v129_v4 = vld [vmem:[#allocation3 + $0x70] sm:$0xff]  ;;  %v128_v7 = vld [vmem:[#allocation3 + $0x68] sm:$0xff]  ;;  %v5699_v15 = vpack.c.bf16 %v127_v1, %v127_v1  ;;  %v5293_v1 = vld [vmem:[#allocation5 + $0x8b4] sm:$0xf0] }
  0x84   :  { %2722 = vmatpush.bf16.msrb.mxu3 %v4399_v19  ;;  %v4358_v19 = vld [vmem:[#allocation5 + $0x7a0] sm:$0xf] }
  0x85   :  { %2684 = vmatpush.bf16.msrb.mxu0 %v4199_v29  ;;  %v5209_v29 = vld [vmem:[#allocation5 + $0x614] sm:$0xf0]  ;;  %v4518_v13 = vld [vmem:[#allocation5 + $0x8e0] sm:$0xf] }
  0x86   :  { %2697 = vmatpush.bf16.msrb.mxu1 %v4263_v30  ;;  %v4222_v30 = vld [vmem:[#allocation5 + $0x690] sm:$0xf]  ;;  %v4159_v40 = vor.u32 %v5209_v29, %v4158_v27  ;;  %v4455_v29 = vor.u32 %v5283_v12, %v4454_v11  ;;  %v4566_v53 = vld [vmem:[#allocation5 + $0x940] sm:$0xf]  ;;  %v5275_v12 = vld [vmem:[#allocation5 + $0x824] sm:$0xf0] }
  0x87   :  { %2710 = vmatpush.bf16.msrb.mxu2 %v4327_v31  ;;  %v4359_v31 = vor.u32 %v5259_v21, %v4358_v19  ;;  %v4223_v44 = vor.u32 %v5225_v33, %v4222_v30  ;;  %v5315_v19 = vld [vmem:[#allocation5 + $0x964] sm:$0xf0]  ;;  %v5701_v21 = vpack.c.bf16 %v129_v4, %v129_v4  ;;  %v4519_v30 = vor.u32 %v5299_v16, %v4518_v13  ;;  %v4446_v33 = vld [vmem:[#allocation5 + $0x850] sm:$0xf]  ;;  %v4422_v11 = vld [vmem:[#allocation5 + $0x820] sm:$0xf] }
  0x88   :  { %2723 = vmatpush.bf16.msrb.mxu3 %v4391_v36  ;;  %v4350_v36 = vld [vmem:[#allocation5 + $0x790] sm:$0xf]  ;;  %v4486_v13 = vld [vmem:[#allocation5 + $0x8a0] sm:$0xf]  ;;  %v5291_v16 = vld [vmem:[#allocation5 + $0x8a4] sm:$0xf0] }
  0x89   :  { %2685 = vmatpush.bf16.msrb.mxu0 %v4191_v45  ;;  %v4287_v45 = vor.u32 %v5241_v35, %v4286_v34  ;;  %v4351_v49 = vor.u32 %v5257_v37, %v4350_v36  ;;  %v5281_v34 = vld [vmem:[#allocation5 + $0x854] sm:$0xf0]  ;;  %v4510_v35 = vld [vmem:[#allocation5 + $0x8d0] sm:$0xf] }
  0x8a   :  { %2698 = vmatpush.bf16.msrb.mxu1 %v4255_v46  ;;  %v4214_v46 = vld [vmem:[#allocation5 + $0x680] sm:$0xf]  ;;  %v5297_v37 = vld [vmem:[#allocation5 + $0x8d4] sm:$0xf0]  ;;  %v4622_v4 = vld [vmem:[#allocation5 + $0x9b0] sm:$0xf] }
  0x8b   :  { %2711 = vmatpush.bf16.msrb.mxu2 %v4319_v47  ;;  %v5223_v47 = vld [vmem:[#allocation5 + $0x684] sm:$0xf0] }
  0x8c   :  { %2724 = vmatpush.bf16.msrb.mxu3 %v4383_v51  ;;  %v4342_v51 = vld [vmem:[#allocation5 + $0x780] sm:$0xf]  ;;  %v4215_v60 = vor.u32 %v5223_v47, %v4214_v46  ;;  %v4511_v46 = vor.u32 %v5297_v37, %v4510_v35  ;;  %v4478_v35 = vld [vmem:[#allocation5 + $0x890] sm:$0xf]  ;;  %v5289_v37 = vld [vmem:[#allocation5 + $0x894] sm:$0xf0] }
  0x8d   :  { %2686 = vmatpush.bf16.msrb.mxu0 %v4183_v57  ;;  %v5301_v57 = vld [vmem:[#allocation5 + $0x8f4] sm:$0xf0]  ;;  %v4343_v2 = vor.u32 %v5255_v52, %v4342_v51  ;;  %v5295_v52 = vld [vmem:[#allocation5 + $0x8c4] sm:$0xf0] }
  0x8e   :  { %2699 = vmatpush.bf16.msrb.mxu1 %v4247_v58  ;;  %v4590_v58 = vld [vmem:[#allocation5 + $0x970] sm:$0xf] }
  0x8f   :  { %2712 = vmatpush.bf16.msrb.mxu2 %v4311_v59  ;;  %v5317_v59 = vld [vmem:[#allocation5 + $0x974] sm:$0xf0] }
  0x90   :  { %2725 = vmatpush.bf16.msrb.mxu3 %v4375_v63  ;;  %v5333_v63 = vld [vmem:[#allocation5 + $0x9f4] sm:$0xf0] }
  0x91   :  { %2687 = vmatpush.bf16.msrb.mxu0 %v4175_v8  ;;  %v130_v8 = vld [vmem:[#allocation3 + $0x78] sm:$0xff] }
  0x92   :  { %2700 = vmatpush.bf16.msrb.mxu1 %v4239_v9  ;;  %v4527_v9 = vor.u32 %v5301_v57, %v4526_v55  ;;  %v5705_v27 = vpack.c.bf16 %v130_v8, %v130_v8  ;;  %v4630_v55 = vld [vmem:[#allocation5 + $0x9c0] sm:$0xf] }
  0x93   :  { %2713 = vmatpush.bf16.msrb.mxu2 %v4303_v10  ;;  %v4591_v10 = vor.u32 %v5317_v59, %v4590_v58  ;;  %v4503_v58 = vor.u32 %v5295_v52, %v4502_v50  ;;  %v4567_v59 = vor.u32 %v5311_v54, %v4566_v53  ;;  %v4470_v50 = vld [vmem:[#allocation5 + $0x880] sm:$0xf]  ;;  %v5303_v54 = vld [vmem:[#allocation5 + $0x904] sm:$0xf0] }
  0x94   :  { %2726 = vmatpush.bf16.msrb.mxu3 %v4367_v14  ;;  %v4655_v14 = vor.u32 %v5333_v63, %v4654_v62  ;;  %v4494_v62 = vld [vmem:[#allocation5 + $0x8b0] sm:$0xf]  ;;  %v4534_v52 = vld [vmem:[#allocation5 + $0x900] sm:$0xf] }
  0x95   :  { %2688 = vmatpush.bf16.msrb.mxu0 %v4167_v22  ;;  %v5703_v22 = vpack.c.bf16 %v128_v7, %v128_v7  ;;  %v5325_v7 = vld [vmem:[#allocation5 + $0x9b4] sm:$0xf0] }
  0x96   :  { %2701 = vmatpush.bf16.msrb.mxu1 %v4231_v23  ;;  %v4646_v23 = vld [vmem:[#allocation5 + $0x9e0] sm:$0xf] }
  0x97   :  { %2714 = vmatpush.bf16.msrb.mxu2 %v4295_v26  ;;  %v5331_v26 = vld [vmem:[#allocation5 + $0x9e4] sm:$0xf0] }
  0x98   :  { %2727 = vmatpush.bf16.msrb.mxu3 %v4359_v31  ;;  %v4583_v31 = vor.u32 %v5315_v19, %v4582_v17  ;;  %v4647_v36 = vor.u32 %v5331_v26, %v4646_v23  ;;  %v4550_v17 = vld [vmem:[#allocation5 + $0x920] sm:$0xf]  ;;  %v5307_v19 = vld [vmem:[#allocation5 + $0x924] sm:$0xf0] }
  0x99   :  { %2689 = vmatpush.bf16.msrb.mxu0 %v4159_v40  ;;  %v4574_v40 = vld [vmem:[#allocation5 + $0x950] sm:$0xf]  ;;  %v4614_v23 = vld [vmem:[#allocation5 + $0x9a0] sm:$0xf]  ;;  %v5323_v26 = vld [vmem:[#allocation5 + $0x9a4] sm:$0xf0] }
  0x9a   :  { %2702 = vmatpush.bf16.msrb.mxu1 %v4223_v44  ;;  %v5329_v44 = vld [vmem:[#allocation5 + $0x9d4] sm:$0xf0]  ;;  %v4575_v47 = vor.u32 %v5313_v42, %v4574_v40  ;;  %v4542_v40 = vld [vmem:[#allocation5 + $0x910] sm:$0xf] }
  0x9b   :  { %2715 = vmatpush.bf16.msrb.mxu2 %v4287_v45  ;;  %v4447_v45 = vor.u32 %v5281_v34, %v4446_v33  ;;  %v4639_v51 = vor.u32 %v5329_v44, %v4638_v43  ;;  %v4414_v33 = vld [vmem:[#allocation5 + $0x810] sm:$0xf]  ;;  %v5273_v34 = vld [vmem:[#allocation5 + $0x814] sm:$0xf0] }
  0x9c   :  { %2728 = vmatpush.bf16.msrb.mxu3 %v4351_v49  ;;  %v5279_v49 = vld [vmem:[#allocation5 + $0x844] sm:$0xf0]  ;;  %v5305_v42 = vld [vmem:[#allocation5 + $0x914] sm:$0xf0]  ;;  %v4606_v43 = vld [vmem:[#allocation5 + $0x990] sm:$0xf] }
  0x9d   :  { %2690 = vmatpush.bf16.msrb.mxu0 %v4151_v56  ;;  %v5327_v56 = vld [vmem:[#allocation5 + $0x9c4] sm:$0xf0]  ;;  %v4439_v57 = vor.u32 %v5279_v49, %v4438_v48  ;;  %v5321_v44 = vld [vmem:[#allocation5 + $0x994] sm:$0xf0]  ;;  %v4479_v48 = vor.u32 %v5289_v37, %v4478_v35  ;;  %v4543_v49 = vor.u32 %v5305_v42, %v4542_v40  ;;  %v4902_v35 = vld [vmem:[#allocation5 + $0xbe0] sm:$0xf] }
  0x9e   :  { %2703 = vmatpush.bf16.msrb.mxu1 %v4215_v60  ;;  %v4430_v60 = vld [vmem:[#allocation5 + $0x830] sm:$0xf]  ;;  %v4631_v63 = vor.u32 %v5327_v56, %v4630_v55  ;;  %v4607_v53 = vor.u32 %v5321_v44, %v4606_v43  ;;  %v4598_v55 = vld [vmem:[#allocation5 + $0x980] sm:$0xf]  ;;  %v5319_v56 = vld [vmem:[#allocation5 + $0x984] sm:$0xf0] }
  0x9f   :  { %2716 = vmatpush.bf16.msrb.mxu2 %v4279_v61  ;;  %v5277_v61 = vld [vmem:[#allocation5 + $0x834] sm:$0xf0]  ;;  %v4702_v44 = vld [vmem:[#allocation5 + $0xa50] sm:$0xf] }
  0xa0   :  { %2729 = vmatpush.bf16.msrb.mxu3 %v4343_v2  ;;  %2691 = vmatmul.bf16.vlgmr.msrb.gmra.mxu0 %v5699_v15  ;;  %v4558_v2 = vld [vmem:[#allocation5 + $0x930] sm:$0xf]  ;;  %v4431_v8 = vor.u32 %v5277_v61, %v4430_v60  ;;  %v5365_v61 = vld [vmem:[#allocation5 + $0xaf4] sm:$0xf0] }
  0xa1   :  { %2735 = vmatpush.bf16.msra.mxu0 %v4463_v3  ;;  %2704 = vmatmul.bf16.vlgmr.msrb.gmra.mxu1 %v5703_v22  ;;  %v5309_v3 = vld [vmem:[#allocation5 + $0x934] sm:$0xf0] }
  0xa2   :  { %2748 = vmatpush.bf16.msra.mxu1 %v4527_v9  ;;  %2717 = vmatmul.bf16.vlgmr.msrb.gmra.mxu2 %v5701_v21  ;;  %v4495_v9 = vor.u32 %v5293_v1, %v4494_v62  ;;  %v4846_v62 = vld [vmem:[#allocation5 + $0xb70] sm:$0xf] }
  0xa3   :  { %2761 = vmatpush.bf16.msra.mxu2 %v4591_v10  ;;  %2730 = vmatmul.bf16.vlgmr.msrb.gmra.mxu3 %v5705_v27  ;;  %v4559_v10 = vor.u32 %v5309_v3, %v4558_v2  ;;  %v4535_v2 = vor.u32 %v5303_v54, %v4534_v52  ;;  %v4910_v3 = vld [vmem:[#allocation5 + $0xbf0] sm:$0xf]  ;;  %v5393_v52 = vld [vmem:[#allocation5 + $0xbd4] sm:$0xf0]  ;;  %v4694_v54 = vld [vmem:[#allocation5 + $0xa40] sm:$0xf] }
  0xa4   :  { %2774 = vmatpush.bf16.msra.mxu3 %v4655_v14  ;;  %v4623_v14 = vor.u32 %v5325_v7, %v4622_v4  ;;  %v5397_v4 = vld [vmem:[#allocation5 + $0xbf4] sm:$0xf0] }
  0xa5   :  { %2736 = vmatpush.bf16.msra.mxu0 %v4455_v29  ;;  %v4423_v29 = vor.u32 %v5275_v12, %v4422_v11  ;;  %v131_v7 = vld [vmem:[#allocation3 + $0x80] sm:$0xff]  ;;  %v132_v11 = vld [vmem:[#allocation3 + $0x88] sm:$0xff]  ;;  %v134_v12 = vld [vmem:[#allocation3 + $0x98] sm:$0xff] }
  0xa6   :  { %2749 = vmatpush.bf16.msra.mxu1 %v4519_v30  ;;  %v4487_v30 = vor.u32 %v5291_v16, %v4486_v13  ;;  %v4710_v16 = vld [vmem:[#allocation5 + $0xa60] sm:$0xf]  ;;  %v5717_v37 = vpack.c.bf16 %v134_v12, %v134_v12 }
  0xa7   :  { %2762 = vmatpush.bf16.msra.mxu2 %v4583_v31  ;;  %v4551_v31 = vor.u32 %v5307_v19, %v4550_v17  ;;  %v5347_v17 = vld [vmem:[#allocation5 + $0xa64] sm:$0xf0]  ;;  %v4774_v19 = vld [vmem:[#allocation5 + $0xae0] sm:$0xf] }
  0xa8   :  { %2775 = vmatpush.bf16.msra.mxu3 %v4647_v36  ;;  %v4615_v36 = vor.u32 %v5323_v26, %v4614_v23  ;;  %v4911_v23 = vor.u32 %v5397_v4, %v4910_v3  ;;  %v5711_v26 = vpack.c.bf16 %v131_v7, %v131_v7  ;;  %v4711_v40 = vor.u32 %v5347_v17, %v4710_v16  ;;  %v5373_v16 = vld [vmem:[#allocation5 + $0xb34] sm:$0xf0]  ;;  %v4878_v17 = vld [vmem:[#allocation5 + $0xbb0] sm:$0xf] }
  0xa9   :  { %2737 = vmatpush.bf16.msra.mxu0 %v4447_v45  ;;  %v4415_v45 = vor.u32 %v5273_v34, %v4414_v33  ;;  %v5715_v34 = vpack.c.bf16 %v132_v11, %v132_v11  ;;  %v4750_v11 = vld [vmem:[#allocation5 + $0xab0] sm:$0xf] }
  0xaa   :  { %2750 = vmatpush.bf16.msra.mxu1 %v4511_v46  ;;  %v4406_v46 = vld [vmem:[#allocation5 + $0x800] sm:$0xf] }
  0xab   :  { %2763 = vmatpush.bf16.msra.mxu2 %v4575_v47  ;;  %v5271_v47 = vld [vmem:[#allocation5 + $0x804] sm:$0xf0] }
  0xac   :  { %2776 = vmatpush.bf16.msra.mxu3 %v4639_v51  ;;  %v5287_v51 = vld [vmem:[#allocation5 + $0x884] sm:$0xf0]  ;;  %v4407_v60 = vor.u32 %v5271_v47, %v4406_v46  ;;  %v4766_v46 = vld [vmem:[#allocation5 + $0xad0] sm:$0xf] }
  0xad   :  { %2738 = vmatpush.bf16.msra.mxu0 %v4439_v57  ;;  %v4718_v57 = vld [vmem:[#allocation5 + $0xa70] sm:$0xf]  ;;  %v4471_v1 = vor.u32 %v5287_v51, %v4470_v50  ;;  %v5377_v50 = vld [vmem:[#allocation5 + $0xb54] sm:$0xf0] }
  0xae   :  { %2751 = vmatpush.bf16.msra.mxu1 %v4503_v58  ;;  %v5349_v58 = vld [vmem:[#allocation5 + $0xa74] sm:$0xf0]  ;;  %v4894_v51 = vld [vmem:[#allocation5 + $0xbd0] sm:$0xf] }
  0xaf   :  { %2764 = vmatpush.bf16.msra.mxu2 %v4567_v59  ;;  %v4782_v59 = vld [vmem:[#allocation5 + $0xaf0] sm:$0xf] }
  0xb0   :  { %2777 = vmatpush.bf16.msra.mxu3 %v4631_v63  ;;  %v5381_v63 = vld [vmem:[#allocation5 + $0xb74] sm:$0xf0]  ;;  %v4783_v13 = vor.u32 %v5365_v61, %v4782_v59  ;;  %v557_v59 = vld [vmem:[#allocation7] sm:$0x3]  ;;  %v5359_v61 = vld [vmem:[#allocation5 + $0xac4] sm:$0xf0] }
  0xb1   :  { %2739 = vmatpush.bf16.msra.mxu0 %v4431_v8  ;;  %v4599_v8 = vor.u32 %v5319_v56, %v4598_v55  ;;  %v559_v4 = vperm.slane %v557_v59, 0 }
  0xb2   :  { %2752 = vmatpush.bf16.msra.mxu1 %v4495_v9  ;;  %v4719_v9 = vor.u32 %v5349_v58, %v4718_v57  ;;  %v5343_v57 = vld [vmem:[#allocation5 + $0xa44] sm:$0xf0]  ;;  %v4758_v58 = vld [vmem:[#allocation5 + $0xac0] sm:$0xf] }
  0xb3   :  { %2765 = vmatpush.bf16.msra.mxu2 %v4559_v10  ;;  %v133_v10 = vld [vmem:[#allocation3 + $0x90] sm:$0xff]  ;;  %v4695_v3 = vor.u32 %v5343_v57, %v4694_v54  ;;  %v4759_v7 = vor.u32 %v5359_v61, %v4758_v58  ;;  %v5337_v57 = vld [vmem:[#allocation5 + $0xa14] sm:$0xf0]  ;;  %v4734_v58 = vld [vmem:[#allocation5 + $0xa90] sm:$0xf] }
  0xb4   :  { %2778 = vmatpush.bf16.msra.mxu3 %v4623_v14  ;;  %v4847_v14 = vor.u32 %v5381_v63, %v4846_v62  ;;  %v5713_v33 = vpack.c.bf16 %v133_v10, %v133_v10  ;;  %v4822_v62 = vld [vmem:[#allocation5 + $0xb40] sm:$0xf]  ;;  %v5375_v63 = vld [vmem:[#allocation5 + $0xb44] sm:$0xf0]  ;;  %v5341_v10 = vld [vmem:[#allocation5 + $0xa34] sm:$0xf0] }
  0xb5   :  { %2740 = vmatpush.bf16.msra.mxu0 %v4423_v29  ;;  %v5363_v29 = vld [vmem:[#allocation5 + $0xae4] sm:$0xf0]  ;;  %v4798_v61 = vld [vmem:[#allocation5 + $0xb10] sm:$0xf] }
  0xb6   :  { %2753 = vmatpush.bf16.msra.mxu1 %v4487_v30  ;;  %v4838_v30 = vld [vmem:[#allocation5 + $0xb60] sm:$0xf]  ;;  %v4775_v42 = vor.u32 %v5363_v29, %v4774_v19  ;;  %v5389_v19 = vld [vmem:[#allocation5 + $0xbb4] sm:$0xf0] }
  0xb7   :  { %2766 = vmatpush.bf16.msra.mxu2 %v4551_v31  ;;  %v5379_v31 = vld [vmem:[#allocation5 + $0xb64] sm:$0xf0] }
  0xb8   :  { %2779 = vmatpush.bf16.msra.mxu3 %v4615_v36  ;;  %v5395_v36 = vld [vmem:[#allocation5 + $0xbe4] sm:$0xf0]  ;;  %v4839_v43 = vor.u32 %v5379_v31, %v4838_v30 }
  0xb9   :  { %2741 = vmatpush.bf16.msra.mxu0 %v4415_v45  ;;  %v5345_v45 = vld [vmem:[#allocation5 + $0xa54] sm:$0xf0]  ;;  %v4903_v47 = vor.u32 %v5395_v36, %v4902_v35  ;;  %v4678_v36 = vld [vmem:[#allocation5 + $0xa20] sm:$0xf] }
  0xba   :  { %2754 = vmatpush.bf16.msra.mxu1 %v4479_v48  ;;  %v5361_v48 = vld [vmem:[#allocation5 + $0xad4] sm:$0xf0] }
  0xbb   :  { %2767 = vmatpush.bf16.msra.mxu2 %v4543_v49  ;;  %v4830_v49 = vld [vmem:[#allocation5 + $0xb50] sm:$0xf]  ;;  %v4767_v55 = vor.u32 %v5361_v48, %v4766_v46  ;;  %v4806_v46 = vld [vmem:[#allocation5 + $0xb20] sm:$0xf] }
  0xbc   :  { %2780 = vmatpush.bf16.msra.mxu3 %v4607_v53  ;;  %v4703_v53 = vor.u32 %v5345_v45, %v4702_v44  ;;  %v4831_v56 = vor.u32 %v5377_v50, %v4830_v49  ;;  %v4879_v44 = vor.u32 %v5389_v19, %v4878_v17  ;;  %v5355_v45 = vld [vmem:[#allocation5 + $0xaa4] sm:$0xf0]  ;;  %v4870_v49 = vld [vmem:[#allocation5 + $0xba0] sm:$0xf] }
  0xbd   :  { %2742 = vmatpush.bf16.msra.mxu0 %v4407_v60  ;;  %v4895_v60 = vor.u32 %v5393_v52, %v4894_v51  ;;  %v5387_v50 = vld [vmem:[#allocation5 + $0xba4] sm:$0xf0] }
  0xbe   :  { %2755 = vmatpush.bf16.msra.mxu1 %v4471_v1  ;;  %v4886_v1 = vld [vmem:[#allocation5 + $0xbc0] sm:$0xf]  ;;  %v4871_v59 = vor.u32 %v5387_v50, %v4870_v49  ;;  %v5367_v19 = vld [vmem:[#allocation5 + $0xb04] sm:$0xf0]  ;;  %v135_v49 = vld [vmem:[#allocation3 + $0xa0] sm:$0xff] }
  0xbf   :  { %2768 = vmatpush.bf16.msra.mxu2 %v4535_v2  ;;  %v5391_v2 = vld [vmem:[#allocation5 + $0xbc4] sm:$0xf0] }
  0xc0   :  { %2781 = vmatpush.bf16.msra.mxu3 %v4599_v8  ;;  %2743 = vmatmul.bf16.vlgmr.msra.gmra.mxu0 %v5711_v26  ;;  %v4823_v8 = vor.u32 %v5375_v63, %v4822_v62  ;;  %v4887_v12 = vor.u32 %v5391_v2, %v4886_v1  ;;  %v5369_v62 = vld [vmem:[#allocation5 + $0xb14] sm:$0xf0]  ;;  %v4862_v1 = vld [vmem:[#allocation5 + $0xb90] sm:$0xf] }
  0xc1   :  { %2787 = vmatpush.bf16.msrb.mxu0 %v4719_v9  ;;  %2756 = vmatmul.bf16.vlgmr.msra.gmra.mxu1 %v5715_v34  ;;  %v4686_v9 = vld [vmem:[#allocation5 + $0xa30] sm:$0xf]  ;;  %v5385_v2 = vld [vmem:[#allocation5 + $0xb94] sm:$0xf0] }
  0xc2   :  { %2800 = vmatpush.bf16.msrb.mxu1 %v4783_v13  ;;  %2769 = vmatmul.bf16.vlgmr.msra.gmra.mxu2 %v5713_v33  ;;  %v5357_v13 = vld [vmem:[#allocation5 + $0xab4] sm:$0xf0]  ;;  %v4687_v29 = vor.u32 %v5341_v10, %v4686_v9  ;;  %v5335_v9 = vld [vmem:[#allocation5 + $0xa04] sm:$0xf0]  ;;  %v4863_v17 = vor.u32 %v5385_v2, %v4862_v1  ;;  %v5042_v1 = vld [vmem:[#allocation5 + $0xe4] sm:$0xf] }
  0xc3   :  { %2813 = vmatpush.bf16.msrb.mxu2 %v4847_v14  ;;  %2782 = vmatmul.bf16.vlgmr.msra.gmra.mxu3 %v5717_v37  ;;  %v4814_v14 = vld [vmem:[#allocation5 + $0xb30] sm:$0xf]  ;;  %v4751_v31 = vor.u32 %v5357_v13, %v4750_v11  ;;  %v4799_v11 = vor.u32 %v5369_v62, %v4798_v61  ;;  %v5351_v13 = vld [vmem:[#allocation5 + $0xa84] sm:$0xf0]  ;;  %v5725_v62 = vpack.c.bf16 %v135_v49, %v135_v49  ;;  %v3496_v2 = vld [vmem:[#allocation5 + $0xe8] sm:$0xf0] }
  0xc4   :  { %2826 = vmatpush.bf16.msrb.mxu3 %v4911_v23  ;;  %v2536_v23 = vpop.f32.mrf.mxu0  ;;  %v4815_v35 = vor.u32 %v5373_v16, %v4814_v14  ;;  %v4790_v14 = vld [vmem:[#allocation5 + $0xb00] sm:$0xf]  ;;  %v3480_v49 = vld [vmem:[#allocation5 + $0xc8] sm:$0xf0] }
  0xc5   :  { %2788 = vmatpush.bf16.msrb.mxu0 %v4711_v40  ;;  %v2537_v30 = vadd.f32 %v2536_v23, %v559_v4  ;;  %v5339_v40 = vld [vmem:[#allocation5 + $0xa24] sm:$0xf0]  ;;  %v2562_v51 = vpop.f32.mrf.mxu2  ;;  %v4854_v23 = vld [vmem:[#allocation5 + $0xb80] sm:$0xf] }
  0xc6   :  { %2801 = vmatpush.bf16.msrb.mxu1 %v4775_v42  ;;  %v4742_v42 = vld [vmem:[#allocation5 + $0xaa0] sm:$0xf]  ;;  %v4679_v52 = vor.u32 %v5339_v40, %v4678_v36  ;;  %v2575_v63 = vpop.f32.mrf.mxu3 }
  0xc7   :  { %2814 = vmatpush.bf16.msrb.mxu2 %v4839_v43  ;;  %v2549_v43 = vpop.f32.mrf.mxu1  ;;  %v4743_v54 = vor.u32 %v5355_v45, %v4742_v42  ;;  %v3440_v42 = vld [vmem:[#allocation5 + $0x78] sm:$0xf0] }
  0xc8   :  { %2827 = vmatpush.bf16.msrb.mxu3 %v4903_v47  ;;  %v5371_v47 = vld [vmem:[#allocation5 + $0xb24] sm:$0xf0]  ;;  %v2550_v48 = vadd.f32 %v2549_v43, %v2537_v30  ;;  %v4942_v30 = vld [vmem:[#allocation5 + $0xc30] sm:$0xf]  ;;  %v5044_v43 = vld [vmem:[#allocation5 + $0xf4] sm:$0xf] }
  0xc9   :  { %2789 = vmatpush.bf16.msrb.mxu0 %v4703_v53 }
  0xca   :  { %2802 = vmatpush.bf16.msrb.mxu1 %v4767_v55  ;;  %v2563_v53 = vadd.f32 %v2562_v51, %v2550_v48  ;;  %v4807_v55 = vor.u32 %v5371_v47, %v4806_v46  ;;  %v4791_v46 = vor.u32 %v5367_v19, %v4790_v14  ;;  %v5060_v47 = vld [vmem:[#allocation5 + $0x174] sm:$0xf]  ;;  %v3568_v48 = vld [vmem:[#allocation5 + $0x178] sm:$0xf0]  ;;  %v4926_v14 = vld [vmem:[#allocation5 + $0xc10] sm:$0xf] }
  0xcb   :  { %2815 = vmatpush.bf16.msrb.mxu2 %v4831_v56  ;;  %v4670_v56 = vld [vmem:[#allocation5 + $0xa10] sm:$0xf]  ;;  %v3571_v61 = vor.u32 %v5060_v47, %v3568_v48  ;;  %v5038_v48 = vld [vmem:[#allocation5 + $0xc4] sm:$0xf] }
  0xcc   :  { %2828 = vmatpush.bf16.msrb.mxu3 %v4895_v60  ;;  %v5353_v60 = vld [vmem:[#allocation5 + $0xa94] sm:$0xf0]  ;;  %v2538_v4 = vpop.f32.mrf.mxu0 }
  0xcd   :  { %2790 = vmatpush.bf16.msrb.mxu0 %v4695_v3  ;;  %v5723_v3 = vadd.f32 %v2575_v63, %v2563_v53  ;;  %v4735_v10 = vor.u32 %v5353_v60, %v4734_v58  ;;  %v2564_v36 = vpop.f32.mrf.mxu2  ;;  %v136_v53 = vld [vmem:[#allocation3 + $0xa8] sm:$0xff]  ;;  %v3432_v63 = vld [vmem:[#allocation5 + $0x68] sm:$0xf0] }
  0xce   :  { %2803 = vmatpush.bf16.msrb.mxu1 %v4759_v7  ;;  %v4671_v7 = vor.u32 %v5337_v57, %v4670_v56  ;;  %v4934_v58 = vld [vmem:[#allocation5 + $0xc20] sm:$0xf]  ;;  %v5026_v60 = vld [vmem:[#allocation5 + $0x64] sm:$0xf] }
  0xcf   :  { %2816 = vmatpush.bf16.msrb.mxu2 %v4823_v8  ;;  %v4662_v8 = vld [vmem:[#allocation5 + $0xa00] sm:$0xf]  ;;  %v2551_v16 = vpop.f32.mrf.mxu1 }
  0xd0   :  { %2829 = vmatpush.bf16.msrb.mxu3 %v4887_v12  ;;  %v4726_v12 = vld [vmem:[#allocation5 + $0xa80] sm:$0xf]  ;;  %v4663_v40 = vor.u32 %v5335_v9, %v4662_v8  ;;  %v5058_v8 = vld [vmem:[#allocation5 + $0x164] sm:$0xf]  ;;  %v3560_v9 = vld [vmem:[#allocation5 + $0x168] sm:$0xf0] }
  0xd1   :  { %2791 = vmatpush.bf16.msrb.mxu0 %v4687_v29  ;;  %v5383_v29 = vld [vmem:[#allocation5 + $0xb84] sm:$0xf0]  ;;  %v4727_v45 = vor.u32 %v5351_v13, %v4726_v12  ;;  %v3435_v12 = vor.u32 %v5026_v60, %v3432_v63  ;;  %v3499_v13 = vor.u32 %v5042_v1, %v3496_v2  ;;  %v5401_v16 = vld [vmem:[#allocation5 + $0xc14] sm:$0xf0]  ;;  %v3563_v19 = vor.u32 %v5058_v8, %v3560_v9  ;;  %v3408_v60 = vld [vmem:[#allocation5 + $0x38] sm:$0xf0] }
  0xd2   :  { %2804 = vmatpush.bf16.msrb.mxu1 %v4751_v31  ;;  %v5405_v31 = vld [vmem:[#allocation5 + $0xc34] sm:$0xf0]  ;;  %v4855_v50 = vor.u32 %v5383_v29, %v4854_v23  ;;  %v3424_v23 = vld [vmem:[#allocation5 + $0x58] sm:$0xf0]  ;;  %v5040_v29 = vld [vmem:[#allocation5 + $0xd4] sm:$0xf]  ;;  %v4927_v36 = vor.u32 %v5401_v16, %v4926_v14 }
  0xd3   :  { %2817 = vmatpush.bf16.msrb.mxu2 %v4815_v35  ;;  %v5028_v35 = vld [vmem:[#allocation5 + $0x74] sm:$0xf]  ;;  %v4943_v51 = vor.u32 %v5405_v31, %v4942_v30  ;;  %v3488_v30 = vld [vmem:[#allocation5 + $0xd8] sm:$0xf0]  ;;  %v3624_v14 = vld [vmem:[#allocation5 + $0x1e8] sm:$0xf0] }
  0xd4   :  { %2830 = vmatpush.bf16.msrb.mxu3 %v4879_v44  ;;  %v3504_v44 = vld [vmem:[#allocation5 + $0xf8] sm:$0xf0]  ;;  %v3443_v56 = vor.u32 %v5028_v35, %v3440_v42  ;;  %v5056_v31 = vld [vmem:[#allocation5 + $0x154] sm:$0xf] }
  0xd5   :  { %2792 = vmatpush.bf16.msrb.mxu0 %v4679_v52  ;;  %v137_v52 = vld [vmem:[#allocation3 + $0xb0] sm:$0xff]  ;;  %v3507_v57 = vor.u32 %v5044_v43, %v3504_v44  ;;  %v3552_v35 = vld [vmem:[#allocation5 + $0x158] sm:$0xf0]  ;;  %v3491_v43 = vor.u32 %v5040_v29, %v3488_v30  ;;  %v5036_v2 = vld [vmem:[#allocation5 + $0xb4] sm:$0xf] }
  0xd6   :  { %2805 = vmatpush.bf16.msrb.mxu1 %v4743_v54  ;;  %v138_v54 = vld [vmem:[#allocation3 + $0xb8] sm:$0xff]  ;;  %v5727_v4 = vpack.c.bf16 %v137_v52, %v137_v52  ;;  %v5399_v44 = vld [vmem:[#allocation5 + $0xc04] sm:$0xf0]  ;;  %v3555_v47 = vor.u32 %v5056_v31, %v3552_v35  ;;  %v3472_v8 = vld [vmem:[#allocation5 + $0xb8] sm:$0xf0] }
  0xd7   :  { %2818 = vmatpush.bf16.msrb.mxu2 %v4807_v55  ;;  %v2577_v55 = vpop.f32.mrf.mxu3  ;;  %v5076_v52 = vld [vmem:[#allocation5 + $0x1f4] sm:$0xf]  ;;  %v139_v16 = vld [vmem:[#allocation3 + $0xc0] sm:$0xff]  ;;  %v3400_v29 = vld [vmem:[#allocation5 + $0x28] sm:$0xf0] }
  0xd8   :  { %2831 = vmatpush.bf16.msrb.mxu3 %v4871_v59  ;;  %v5403_v59 = vld [vmem:[#allocation5 + $0xc24] sm:$0xf0]  ;;  %v5052_v9 = vld [vmem:[#allocation5 + $0x134] sm:$0xf] }
  0xd9   :  { %2793 = vmatpush.bf16.msrb.mxu0 %v4671_v7  ;;  %v5729_v7 = vpack.c.bf16 %v136_v53, %v136_v53  ;;  %v3632_v53 = vld [vmem:[#allocation5 + $0x1f8] sm:$0xf0] }
  0xda   :  { %2806 = vmatpush.bf16.msrb.mxu1 %v4735_v10  ;;  %v5731_v10 = vpack.c.bf16 %v138_v54, %v138_v54  ;;  %v3635_v1 = vor.u32 %v5076_v52, %v3632_v53  ;;  %v5016_v52 = vld [vmem:[#allocation5 + $0x14] sm:$0xf]  ;;  %v3392_v53 = vld [vmem:[#allocation5 + $0x18] sm:$0xf0] }
  0xdb   :  { %2819 = vmatpush.bf16.msrb.mxu2 %v4799_v11  ;;  %v4935_v11 = vor.u32 %v5403_v59, %v4934_v58  ;;  %v5020_v59 = vld [vmem:[#allocation5 + $0x34] sm:$0xf] }
  0xdc   :  { %2832 = vmatpush.bf16.msrb.mxu3 %v4863_v17  ;;  %v5024_v17 = vld [vmem:[#allocation5 + $0x54] sm:$0xf] }
  0xdd   :  { %2794 = vmatpush.bf16.msrb.mxu0 %v4663_v40  ;;  %v4918_v40 = vld [vmem:[#allocation5 + $0xc00] sm:$0xf]  ;;  %v3427_v42 = vor.u32 %v5024_v17, %v3424_v23  ;;  %v2588_v55 = vpop.f32.mrf.mxu0  ;;  %v3411_v17 = vor.u32 %v5020_v59, %v3408_v60  ;;  %v5018_v23 = vld [vmem:[#allocation5 + $0x24] sm:$0xf]  ;;  %v5048_v59 = vld [vmem:[#allocation5 + $0x114] sm:$0xf] }
  0xde   :  { %2807 = vmatpush.bf16.msrb.mxu1 %v4727_v45  ;;  %v5022_v45 = vld [vmem:[#allocation5 + $0x44] sm:$0xf]  ;;  %v4919_v54 = vor.u32 %v5399_v44, %v4918_v40  ;;  %v2589_v58 = vadd.f32 %v2588_v55, %v5723_v3  ;;  %v3464_v40 = vld [vmem:[#allocation5 + $0xa8] sm:$0xf0]  ;;  %v5738_v44 = vpack.c.bf16 %v139_v16, %v139_v16  ;;  %v3520_v60 = vld [vmem:[#allocation5 + $0x118] sm:$0xf0] }
  0xdf   :  { %2820 = vmatpush.bf16.msrb.mxu2 %v4791_v46  ;;  %v3416_v46 = vld [vmem:[#allocation5 + $0x48] sm:$0xf0] }
  0xe0   :  { %2833 = vmatpush.bf16.msrb.mxu3 %v4855_v50  ;;  %2795 = vmatmul.bf16.vlgmr.msrb.gmra.mxu0 %v5725_v62  ;;  %v5054_v50 = vld [vmem:[#allocation5 + $0x144] sm:$0xf]  ;;  %v3448_v16 = vld [vmem:[#allocation5 + $0x88] sm:$0xf0] }
  0xe1   :  { %2843 = vmatpush.bf16.msra.mxu0 %v4943_v51  ;;  %2808 = vmatmul.bf16.vlgmr.msrb.gmra.mxu1 %v5729_v7  ;;  %v3544_v51 = vld [vmem:[#allocation5 + $0x148] sm:$0xf0] }
  0xe2   :  { %2852 = vmatpush.bf16.msra.mxu1 %v3443_v56  ;;  %2821 = vmatmul.bf16.vlgmr.msrb.gmra.mxu2 %v5727_v4  ;;  %v3419_v56 = vor.u32 %v5022_v45, %v3416_v46  ;;  %v3547_v63 = vor.u32 %v5054_v50, %v3544_v51  ;;  %v3528_v45 = vld [vmem:[#allocation5 + $0x128] sm:$0xf0]  ;;  %v5072_v46 = vld [vmem:[#allocation5 + $0x1d4] sm:$0xf]  ;;  %v3403_v50 = vor.u32 %v5018_v23, %v3400_v29  ;;  %v3600_v29 = vld [vmem:[#allocation5 + $0x1b8] sm:$0xf0] }
  0xe3   :  { %2865 = vmatpush.bf16.msra.mxu2 %v3507_v57  ;;  %2834 = vmatmul.bf16.vlgmr.msrb.gmra.mxu3 %v5731_v10  ;;  %v3483_v57 = vor.u32 %v5038_v48, %v3480_v49  ;;  %v5068_v23 = vld [vmem:[#allocation5 + $0x1b4] sm:$0xf] }
  0xe4   :  { %2878 = vmatpush.bf16.msra.mxu3 %v3571_v61  ;;  %v2601_v61 = vpop.f32.mrf.mxu1 }
  0xe5   :  { %2844 = vmatpush.bf16.msra.mxu0 %v4935_v11  ;;  %v3536_v11 = vld [vmem:[#allocation5 + $0x138] sm:$0xf0]  ;;  %v2614_v3 = vpop.f32.mrf.mxu2  ;;  %v2590_v49 = vpop.f32.mrf.mxu0 }
  0xe6   :  { %2853 = vmatpush.bf16.msra.mxu1 %v3435_v12  ;;  %v2602_v12 = vadd.f32 %v2601_v61, %v2589_v58  ;;  %v3539_v30 = vor.u32 %v5052_v9, %v3536_v11  ;;  %v3456_v58 = vld [vmem:[#allocation5 + $0x98] sm:$0xf0]  ;;  %v5070_v61 = vld [vmem:[#allocation5 + $0x1c4] sm:$0xf]  ;;  %v3384_v9 = vld [vmem:[#allocation5 + $0x8] sm:$0xf0] }
  0xe7   :  { %2866 = vmatpush.bf16.msra.mxu2 %v3499_v13  ;;  %v5074_v13 = vld [vmem:[#allocation5 + $0x1e4] sm:$0xf] }
  0xe8   :  { %2879 = vmatpush.bf16.msra.mxu3 %v3563_v19  ;;  %v3475_v19 = vor.u32 %v5036_v2, %v3472_v8  ;;  %v3627_v31 = vor.u32 %v5074_v13, %v3624_v14  ;;  %v2615_v35 = vadd.f32 %v2614_v3, %v2602_v12  ;;  %v5014_v8 = vld [vmem:[#allocation5 + $0x4] sm:$0xf]  ;;  %v3523_v13 = vor.u32 %v5048_v59, %v3520_v60  ;;  %v3816_v59 = vld [vmem:[#allocation5 + $0x368] sm:$0xf0] }
  0xe9   :  { %2845 = vmatpush.bf16.msra.mxu0 %v4927_v36  ;;  %v5034_v36 = vld [vmem:[#allocation5 + $0xa4] sm:$0xf] }
  0xea   :  { %2854 = vmatpush.bf16.msra.mxu1 %v3427_v42  ;;  %v5050_v42 = vld [vmem:[#allocation5 + $0x124] sm:$0xf]  ;;  %v3467_v51 = vor.u32 %v5034_v36, %v3464_v40  ;;  %v3760_v36 = vld [vmem:[#allocation5 + $0x2f8] sm:$0xf0]  ;;  %v3387_v40 = vor.u32 %v5014_v8, %v3384_v9  ;;  %v5088_v8 = vld [vmem:[#allocation5 + $0x254] sm:$0xf] }
  0xeb   :  { %2867 = vmatpush.bf16.msra.mxu2 %v3491_v43  ;;  %v2627_v43 = vpop.f32.mrf.mxu3  ;;  %v3531_v55 = vor.u32 %v5050_v42, %v3528_v45  ;;  %v5030_v11 = vld [vmem:[#allocation5 + $0x84] sm:$0xf]  ;;  %v3824_v45 = vld [vmem:[#allocation5 + $0x378] sm:$0xf0] }
  0xec   :  { %2880 = vmatpush.bf16.msra.mxu3 %v3555_v47  ;;  %v3616_v47 = vld [vmem:[#allocation5 + $0x1d8] sm:$0xf0]  ;;  %v5740_v48 = vadd.f32 %v2627_v43, %v2615_v35  ;;  %v5108_v35 = vld [vmem:[#allocation5 + $0x2f4] sm:$0xf]  ;;  %v3451_v42 = vor.u32 %v5030_v11, %v3448_v16 }
  0xed   :  { %2846 = vmatpush.bf16.msra.mxu0 %v4919_v54  ;;  %v2603_v54 = vpop.f32.mrf.mxu1  ;;  %v2616_v12 = vpop.f32.mrf.mxu2  ;;  %v5124_v43 = vld [vmem:[#allocation5 + $0x374] sm:$0xf]  ;;  %v3680_v11 = vld [vmem:[#allocation5 + $0x258] sm:$0xf0] }
  0xee   :  { %2855 = vmatpush.bf16.msra.mxu1 %v3419_v56  ;;  %v3619_v56 = vor.u32 %v5072_v46, %v3616_v47  ;;  %v3603_v47 = vor.u32 %v5068_v23, %v3600_v29  ;;  %v3827_v54 = vor.u32 %v5124_v43, %v3824_v45  ;;  %v5104_v12 = vld [vmem:[#allocation5 + $0x2d4] sm:$0xf]  ;;  %v3808_v16 = vld [vmem:[#allocation5 + $0x358] sm:$0xf0]  ;;  %v3576_v29 = vld [vmem:[#allocation5 + $0x188] sm:$0xf0] }
  0xef   :  { %2868 = vmatpush.bf16.msra.mxu2 %v3483_v57  ;;  %v5032_v57 = vld [vmem:[#allocation5 + $0x94] sm:$0xf]  ;;  %v3800_v43 = vld [vmem:[#allocation5 + $0x348] sm:$0xf0]  ;;  %v3888_v45 = vld [vmem:[#allocation5 + $0x3f8] sm:$0xf0] }
  0xf0   :  { %2881 = vmatpush.bf16.msra.mxu3 %v3547_v63  ;;  %4948 = vmatmul.msk.bf16.vlgmr.msra.gmra.mxu0 %vm2523_vm0, %v5738_v44  ;;  %v3608_v63 = vld [vmem:[#allocation5 + $0x1c8] sm:$0xf0]  ;;  %v3459_v2 = vor.u32 %v5032_v57, %v3456_v58  ;;  %v5122_v58 = vld [vmem:[#allocation5 + $0x364] sm:$0xf] }
  0xf1   :  { %2891 = vmatpush.bf16.msrb.mxu0 %v3635_v1  ;;  %v3395_v1 = vor.u32 %v5016_v52, %v3392_v53  ;;  %v3611_v14 = vor.u32 %v5070_v61, %v3608_v63  ;;  %v3592_v52 = vld [vmem:[#allocation5 + $0x1a8] sm:$0xf0]  ;;  %v5090_v53 = vld [vmem:[#allocation5 + $0x264] sm:$0xf]  ;;  %v3819_v9 = vor.u32 %v5122_v58, %v3816_v59  ;;  %v5116_v58 = vld [vmem:[#allocation5 + $0x334] sm:$0xf] }
  0xf2   :  { %2856 = vmatpush.bf16.msra.mxu1 %v3411_v17  ;;  %v5046_v17 = vld [vmem:[#allocation5 + $0x104] sm:$0xf]  ;;  %v3752_v57 = vld [vmem:[#allocation5 + $0x2e8] sm:$0xf0]  ;;  %v3792_v59 = vld [vmem:[#allocation5 + $0x338] sm:$0xf0] }
  0xf3   :  { %2869 = vmatpush.bf16.msra.mxu2 %v3475_v19  ;;  %v3512_v19 = vld [vmem:[#allocation5 + $0x108] sm:$0xf0]  ;;  %v2629_v3 = vpop.f32.mrf.mxu3 }
  0xf4   :  { %2882 = vmatpush.bf16.msra.mxu3 %v3539_v30  ;;  %v5092_v30 = vld [vmem:[#allocation5 + $0x274] sm:$0xf]  ;;  %v3515_v46 = vor.u32 %v5046_v17, %v3512_v19  ;;  %v5062_v19 = vld [vmem:[#allocation5 + $0x184] sm:$0xf]  ;;  %v3683_v3 = vor.u32 %v5088_v8, %v3680_v11  ;;  %v3795_v8 = vor.u32 %v5116_v58, %v3792_v59  ;;  %v3768_v58 = vld [vmem:[#allocation5 + $0x308] sm:$0xf0] }
  0xf5   :  { %2892 = vmatpush.bf16.msrb.mxu0 %v3627_v31  ;;  %v3696_v31 = vld [vmem:[#allocation5 + $0x278] sm:$0xf0] }
  0xf6   :  { %2857 = vmatpush.bf16.msra.mxu1 %v3403_v50  ;;  %v3699_v49 = vor.u32 %v5092_v30, %v3696_v31  ;;  %v3763_v50 = vor.u32 %v5108_v35, %v3760_v36  ;;  %v5086_v30 = vld [vmem:[#allocation5 + $0x244] sm:$0xf]  ;;  %v3672_v31 = vld [vmem:[#allocation5 + $0x248] sm:$0xf0] }
  0xf7   :  { %2870 = vmatpush.bf16.msra.mxu2 %v3467_v51  ;;  %v5066_v51 = vld [vmem:[#allocation5 + $0x1a4] sm:$0xf] }
  0xf8   :  { %2883 = vmatpush.bf16.msra.mxu3 %v3531_v55  ;;  %v3688_v55 = vld [vmem:[#allocation5 + $0x268] sm:$0xf0]  ;;  %v3595_v60 = vor.u32 %v5066_v51, %v3592_v52  ;;  %v5102_v36 = vld [vmem:[#allocation5 + $0x2c4] sm:$0xf]  ;;  %v5084_v51 = vld [vmem:[#allocation5 + $0x234] sm:$0xf] }
  0xf9   :  { %2893 = vmatpush.bf16.msrb.mxu0 %v3619_v56  ;;  %v5106_v56 = vld [vmem:[#allocation5 + $0x2e4] sm:$0xf]  ;;  %v3691_v61 = vor.u32 %v5090_v53, %v3688_v55  ;;  %v3664_v52 = vld [vmem:[#allocation5 + $0x238] sm:$0xf0] }
  0xfa   :  { %2858 = vmatpush.bf16.msra.mxu1 %v3395_v1  ;;  %v3755_v63 = vor.u32 %v5106_v56, %v3752_v57  ;;  %v5064_v1 = vld [vmem:[#allocation5 + $0x194] sm:$0xf]  ;;  %v3728_v57 = vld [vmem:[#allocation5 + $0x2b8] sm:$0xf0] }
  0xfb   :  { %2871 = vmatpush.bf16.msra.mxu2 %v3459_v2  ;;  %v3584_v2 = vld [vmem:[#allocation5 + $0x198] sm:$0xf0]  ;;  %v5100_v56 = vld [vmem:[#allocation5 + $0x2b4] sm:$0xf] }
  0xfc   :  { %2884 = vmatpush.bf16.msra.mxu3 %v3523_v13  ;;  %v3744_v13 = vld [vmem:[#allocation5 + $0x2d8] sm:$0xf0]  ;;  %v3587_v17 = vor.u32 %v5064_v1, %v3584_v2  ;;  %v5082_v1 = vld [vmem:[#allocation5 + $0x224] sm:$0xf]  ;;  %v3656_v2 = vld [vmem:[#allocation5 + $0x228] sm:$0xf0] }
  0xfd   :  { %2894 = vmatpush.bf16.msrb.mxu0 %v3611_v14  ;;  %v5120_v14 = vld [vmem:[#allocation5 + $0x354] sm:$0xf]  ;;  %v3747_v23 = vor.u32 %v5104_v12, %v3744_v13  ;;  %v5098_v12 = vld [vmem:[#allocation5 + $0x2a4] sm:$0xf]  ;;  %v3720_v13 = vld [vmem:[#allocation5 + $0x2a8] sm:$0xf0] }
  0xfe   :  { %2859 = vmatpush.bf16.msra.mxu1 %v3387_v40  ;;  %v3811_v35 = vor.u32 %v5120_v14, %v3808_v16  ;;  %v5118_v40 = vld [vmem:[#allocation5 + $0x344] sm:$0xf] }
  0xff   :  { %2872 = vmatpush.bf16.msra.mxu2 %v3451_v42  ;;  %v2640_v42 = vpop.f32.mrf.mxu0  ;;  %v3803_v53 = vor.u32 %v5118_v40, %v3800_v43  ;;  %v5114_v14 = vld [vmem:[#allocation5 + $0x324] sm:$0xf]  ;;  %v3648_v40 = vld [vmem:[#allocation5 + $0x218] sm:$0xf0] }
 0x100   :  { %2885 = vmatpush.bf16.msra.mxu3 %v3515_v46  ;;  %v3579_v46 = vor.u32 %v5062_v19, %v3576_v29  ;;  %v3784_v19 = vld [vmem:[#allocation5 + $0x328] sm:$0xf0] }
 0x101   :  { %2895 = vmatpush.bf16.msrb.mxu0 %v3603_v47  ;;  %2860 = vmatmul.bf16.vlgmr.msra.gmra.mxu1 %v5665_v5  ;;  %v2641_v5 = vadd.f32 %v2640_v42, %v5740_v48  ;;  %v2653_v47 = vpop.f32.mrf.mxu1  ;;  %v3667_v48 = vor.u32 %v5084_v51, %v3664_v52  ;;  %v3787_v42 = vor.u32 %v5114_v14, %v3784_v19  ;;  %v5078_v51 = vld [vmem:[#allocation5 + $0x204] sm:$0xf]  ;;  %v3640_v52 = vld [vmem:[#allocation5 + $0x208] sm:$0xf0] }
 0x102   :  { %2904 = vmatpush.bf16.msrb.mxu1 %v3699_v49  ;;  %2873 = vmatmul.bf16.vlgmr.msra.gmra.mxu2 %v5671_v18  ;;  %v3736_v18 = vld [vmem:[#allocation5 + $0x2c8] sm:$0xf0]  ;;  %v3675_v49 = vor.u32 %v5086_v30, %v3672_v31 }
 0x103   :  { %2917 = vmatpush.bf16.msrb.mxu2 %v3763_v50  ;;  %2886 = vmatmul.bf16.vlgmr.msra.gmra.mxu3 %v5663_v0  ;;  %v5140_v0 = vld [vmem:[#allocation5 + $0x3f4] sm:$0xf]  ;;  %v3739_v50 = vor.u32 %v5102_v36, %v3736_v18  ;;  %v3723_v36 = vor.u32 %v5098_v12, %v3720_v13  ;;  %v4080_v13 = vld [vmem:[#allocation5 + $0x578] sm:$0xf0] }
 0x104   :  { %2930 = vmatpush.bf16.msrb.mxu3 %v3827_v54  ;;  %v2654_v54 = vadd.f32 %v2653_v47, %v2641_v5  ;;  %v3891_v55 = vor.u32 %v5140_v0, %v3888_v45  ;;  %v5080_v18 = vld [vmem:[#allocation5 + $0x214] sm:$0xf]  ;;  %v3712_v45 = vld [vmem:[#allocation5 + $0x298] sm:$0xf0]  ;;  %v5134_v47 = vld [vmem:[#allocation5 + $0x3c4] sm:$0xf] }
 0x105   :  { %2896 = vmatpush.bf16.msrb.mxu0 %v3595_v60  ;;  %v5138_v60 = vld [vmem:[#allocation5 + $0x3e4] sm:$0xf]  ;;  %v5096_v0 = vld [vmem:[#allocation5 + $0x294] sm:$0xf] }
 0x106   :  { %2905 = vmatpush.bf16.msrb.mxu1 %v3691_v61  ;;  %v3880_v61 = vld [vmem:[#allocation5 + $0x3e8] sm:$0xf0]  ;;  %v5112_v5 = vld [vmem:[#allocation5 + $0x314] sm:$0xf] }
 0x107   :  { %2918 = vmatpush.bf16.msrb.mxu2 %v3755_v63  ;;  %v3731_v63 = vor.u32 %v5100_v56, %v3728_v57  ;;  %v3883_v11 = vor.u32 %v5138_v60, %v3880_v61  ;;  %v2642_v29 = vpop.f32.mrf.mxu0  ;;  %v3704_v56 = vld [vmem:[#allocation5 + $0x288] sm:$0xf0]  ;;  %v5110_v57 = vld [vmem:[#allocation5 + $0x304] sm:$0xf]  ;;  %v5132_v60 = vld [vmem:[#allocation5 + $0x3b4] sm:$0xf] }
 0x108   :  { %2931 = vmatpush.bf16.msrb.mxu3 %v3819_v9  ;;  %v2666_v9 = vpop.f32.mrf.mxu2  ;;  %v3856_v61 = vld [vmem:[#allocation5 + $0x3b8] sm:$0xf0]  ;;  %v5188_v12 = vld [vmem:[#allocation5 + $0x574] sm:$0xf]  ;;  %v3771_v14 = vor.u32 %v5110_v57, %v3768_v58  ;;  %v5154_v29 = vld [vmem:[#allocation5 + $0x464] sm:$0xf] }
 0x109   :  { %2897 = vmatpush.bf16.msrb.mxu0 %v3587_v17  ;;  %v2667_v16 = vadd.f32 %v2666_v9, %v2654_v54  ;;  %v2679_v17 = vpop.f32.mrf.mxu3  ;;  %v2655_v30 = vpop.f32.mrf.mxu1  ;;  %v3643_v9 = vor.u32 %v5078_v51, %v3640_v52  ;;  %v4000_v51 = vld [vmem:[#allocation5 + $0x4d8] sm:$0xf0]  ;;  %v5184_v52 = vld [vmem:[#allocation5 + $0x554] sm:$0xf]  ;;  %v3832_v58 = vld [vmem:[#allocation5 + $0x388] sm:$0xf0] }
 0x10a   :  { %2906 = vmatpush.bf16.msrb.mxu1 %v3683_v3  ;;  %v5136_v3 = vld [vmem:[#allocation5 + $0x3d4] sm:$0xf]  ;;  %v4083_v30 = vor.u32 %v5188_v12, %v4080_v13 }
 0x10b   :  { %2919 = vmatpush.bf16.msrb.mxu2 %v3747_v23  ;;  %v3872_v23 = vld [vmem:[#allocation5 + $0x3d8] sm:$0xf0]  ;;  %v5749_v31 = vadd.f32 %v2679_v17, %v2667_v16  ;;  %v3859_v16 = vor.u32 %v5132_v60, %v3856_v61  ;;  %v5166_v61 = vld [vmem:[#allocation5 + $0x4c4] sm:$0xf] }
 0x10c   :  { %2932 = vmatpush.bf16.msrb.mxu3 %v3811_v35  ;;  %v3659_v35 = vor.u32 %v5082_v1, %v3656_v2  ;;  %v3875_v43 = vor.u32 %v5136_v3, %v3872_v23  ;;  %v3952_v1 = vld [vmem:[#allocation5 + $0x478] sm:$0xf0]  ;;  %v5172_v2 = vld [vmem:[#allocation5 + $0x4f4] sm:$0xf]  ;;  %v5130_v3 = vld [vmem:[#allocation5 + $0x3a4] sm:$0xf] }
 0x10d   :  { %2898 = vmatpush.bf16.msrb.mxu0 %v3579_v46  ;;  %v3776_v46 = vld [vmem:[#allocation5 + $0x318] sm:$0xf0]  ;;  %v3848_v23 = vld [vmem:[#allocation5 + $0x3a8] sm:$0xf0] }
 0x10e   :  { %2907 = vmatpush.bf16.msrb.mxu1 %v3675_v49  ;;  %v3651_v49 = vor.u32 %v5080_v18, %v3648_v40  ;;  %v3779_v54 = vor.u32 %v5112_v5, %v3776_v46  ;;  %v4008_v18 = vld [vmem:[#allocation5 + $0x4e8] sm:$0xf0]  ;;  %v5186_v40 = vld [vmem:[#allocation5 + $0x564] sm:$0xf]  ;;  %v5128_v5 = vld [vmem:[#allocation5 + $0x394] sm:$0xf] }
 0x10f   :  { %2920 = vmatpush.bf16.msrb.mxu2 %v3739_v50  ;;  %v3715_v50 = vor.u32 %v5096_v0, %v3712_v45  ;;  %v3840_v46 = vld [vmem:[#allocation5 + $0x398] sm:$0xf0] }
 0x110   :  { %2933 = vmatpush.bf16.msrb.mxu3 %v3803_v53  ;;  %2899 = vmatmul.bf16.vlgmr.msrb.gmra.mxu0 %v5667_v6  ;;  %v3864_v6 = vld [vmem:[#allocation5 + $0x3c8] sm:$0xf0]  ;;  %v5094_v53 = vld [vmem:[#allocation5 + $0x284] sm:$0xf]  ;;  %v2668_v59 = vpop.f32.mrf.mxu2 }
 0x111   :  { %2943 = vmatpush.bf16.msra.mxu0 %v3891_v55  ;;  %v3867_v55 = vor.u32 %v5134_v47, %v3864_v6  ;;  %v5152_v47 = vld [vmem:[#allocation5 + $0x454] sm:$0xf]  ;;  %v5150_v59 = vld [vmem:[#allocation5 + $0x444] sm:$0xf] }
 0x112   :  { %2908 = vmatpush.bf16.msrb.mxu1 %v3667_v48  ;;  %v5156_v48 = vld [vmem:[#allocation5 + $0x474] sm:$0xf] }
 0x113   :  { %2921 = vmatpush.bf16.msrb.mxu2 %v3731_v63  ;;  %v2681_v63 = vpop.f32.mrf.mxu3  ;;  %v3955_v17 = vor.u32 %v5156_v48, %v3952_v1  ;;  %v3992_v48 = vld [vmem:[#allocation5 + $0x4c8] sm:$0xf0] }
 0x114   :  { %2934 = vmatpush.bf16.msrb.mxu3 %v3795_v8  ;;  %v4016_v8 = vld [vmem:[#allocation5 + $0x4f8] sm:$0xf0]  ;;  %v5182_v63 = vld [vmem:[#allocation5 + $0x544] sm:$0xf]  ;;  %v4056_v1 = vld [vmem:[#allocation5 + $0x548] sm:$0xf0]  ;;  %v3995_v13 = vor.u32 %v5166_v61, %v3992_v48 }
 0x115   :  { %2944 = vmatpush.bf16.msra.mxu0 %v3883_v11  ;;  %v3707_v11 = vor.u32 %v5094_v53, %v3704_v56  ;;  %v4019_v19 = vor.u32 %v5172_v2, %v4016_v8  ;;  %v4064_v53 = vld [vmem:[#allocation5 + $0x558] sm:$0xf0] }
 0x116   :  { %2909 = vmatpush.bf16.msrb.mxu1 %v3659_v35  ;;  %v3944_v35 = vld [vmem:[#allocation5 + $0x468] sm:$0xf0]  ;;  %v4067_v60 = vor.u32 %v5184_v52, %v4064_v53  ;;  %v4144_v2 = vld [vmem:[#allocation5 + $0x5f8] sm:$0xf0]  ;;  %v5200_v52 = vld [vmem:[#allocation5 + $0x5d4] sm:$0xf] }
 0x117   :  { %2922 = vmatpush.bf16.msrb.mxu2 %v3723_v36  ;;  %v5170_v36 = vld [vmem:[#allocation5 + $0x4e4] sm:$0xf]  ;;  %v3947_v0 = vor.u32 %v5154_v29, %v3944_v35  ;;  %v3984_v29 = vld [vmem:[#allocation5 + $0x4b8] sm:$0xf0] }
 0x118   :  { %2935 = vmatpush.bf16.msrb.mxu3 %v3787_v42  ;;  %v4072_v42 = vld [vmem:[#allocation5 + $0x568] sm:$0xf0]  ;;  %v4011_v45 = vor.u32 %v5170_v36, %v4008_v18  ;;  %v4048_v35 = vld [vmem:[#allocation5 + $0x538] sm:$0xf0]  ;;  %v5202_v36 = vld [vmem:[#allocation5 + $0x5e4] sm:$0xf] }
 0x119   :  { %2945 = vmatpush.bf16.msra.mxu0 %v3875_v43  ;;  %v3851_v43 = vor.u32 %v5130_v3, %v3848_v23  ;;  %v4075_v6 = vor.u32 %v5186_v40, %v4072_v42  ;;  %v5164_v23 = vld [vmem:[#allocation5 + $0x4b4] sm:$0xf]  ;;  %v4136_v18 = vld [vmem:[#allocation5 + $0x5e8] sm:$0xf0]  ;;  %v5146_v42 = vld [vmem:[#allocation5 + $0x424] sm:$0xf] }
 0x11a   :  { %2910 = vmatpush.bf16.msrb.mxu1 %v3651_v49  ;;  %v3936_v49 = vld [vmem:[#allocation5 + $0x458] sm:$0xf0]  ;;  %v3987_v40 = vor.u32 %v5164_v23, %v3984_v29  ;;  %v5196_v23 = vld [vmem:[#allocation5 + $0x5b4] sm:$0xf] }
 0x11b   :  { %2923 = vmatpush.bf16.msrb.mxu2 %v3715_v50  ;;  %v5168_v50 = vld [vmem:[#allocation5 + $0x4d4] sm:$0xf]  ;;  %v3939_v56 = vor.u32 %v5152_v47, %v3936_v49  ;;  %v3976_v47 = vld [vmem:[#allocation5 + $0x4a8] sm:$0xf0]  ;;  %v4128_v53 = vld [vmem:[#allocation5 + $0x5d8] sm:$0xf0] }
 0x11c   :  { %2936 = vmatpush.bf16.msrb.mxu3 %v3779_v54  ;;  %v3843_v54 = vor.u32 %v5128_v5, %v3840_v46  ;;  %v4003_v57 = vor.u32 %v5168_v50, %v4000_v51  ;;  %v4139_v5 = vor.u32 %v5202_v36, %v4136_v18  ;;  %v5162_v46 = vld [vmem:[#allocation5 + $0x4a4] sm:$0xf]  ;;  %v4040_v51 = vld [vmem:[#allocation5 + $0x528] sm:$0xf0]  ;;  %v4131_v61 = vor.u32 %v5200_v52, %v4128_v53  ;;  %v3968_v48 = vld [vmem:[#allocation5 + $0x498] sm:$0xf0] }
 0x11d   :  { %2946 = vmatpush.bf16.msra.mxu0 %v3867_v55  ;;  %v5126_v55 = vld [vmem:[#allocation5 + $0x384] sm:$0xf]  ;;  %v4112_v29 = vld [vmem:[#allocation5 + $0x5b8] sm:$0xf0]  ;;  %v5236_v18 = vld [vmem:[#allocation5 + $0x6f4] sm:$0xf] }
 0x11e   :  { %2911 = vmatpush.bf16.msrb.mxu1 %v3643_v9  ;;  %v3835_v9 = vor.u32 %v5126_v55, %v3832_v58  ;;  %v3979_v58 = vor.u32 %v5162_v46, %v3976_v47  ;;  %v4208_v36 = vld [vmem:[#allocation5 + $0x678] sm:$0xf0]  ;;  %v4200_v52 = vld [vmem:[#allocation5 + $0x668] sm:$0xf0]  ;;  %v5234_v53 = vld [vmem:[#allocation5 + $0x6e4] sm:$0xf] }
 0x11f   :  { %2924 = vmatpush.bf16.msrb.mxu2 %v3707_v11  ;;  %v2705_v11 = vpop.f32.mrf.mxu1 }
 0x120   :  { %2937 = vmatpush.bf16.msrb.mxu3 %v3771_v14  ;;  %v5148_v14 = vld [vmem:[#allocation5 + $0x434] sm:$0xf] }
 0x121   :  { %2947 = vmatpush.bf16.msra.mxu0 %v3859_v16  ;;  %2912 = vmatmul.bf16.vlgmr.msrb.gmra.mxu1 %v5677_v38  ;;  %v5204_v38 = vld [vmem:[#allocation5 + $0x5f4] sm:$0xf]  ;;  %v3920_v16 = vld [vmem:[#allocation5 + $0x438] sm:$0xf0] }
 0x122   :  { %2956 = vmatpush.bf16.msra.mxu1 %v3955_v17  ;;  %2925 = vmatmul.bf16.vlgmr.msrb.gmra.mxu2 %v5681_v41  ;;  %v3928_v41 = vld [vmem:[#allocation5 + $0x448] sm:$0xf0]  ;;  %v4059_v17 = vor.u32 %v5182_v63, %v4056_v1  ;;  %v4147_v3 = vor.u32 %v5204_v38, %v4144_v2  ;;  %v5176_v63 = vld [vmem:[#allocation5 + $0x514] sm:$0xf]  ;;  %v5198_v1 = vld [vmem:[#allocation5 + $0x5c4] sm:$0xf] }
 0x123   :  { %2969 = vmatpush.bf16.msra.mxu2 %v4019_v19  ;;  %2938 = vmatmul.bf16.vlgmr.msrb.gmra.mxu3 %v5675_v32  ;;  %v2692_v32 = vpop.f32.mrf.mxu0  ;;  %v3931_v12 = vor.u32 %v5150_v59, %v3928_v41  ;;  %v5144_v59 = vld [vmem:[#allocation5 + $0x414] sm:$0xf]  ;;  %v3904_v41 = vld [vmem:[#allocation5 + $0x418] sm:$0xf0]  ;;  %v4120_v38 = vld [vmem:[#allocation5 + $0x5c8] sm:$0xf0] }
 0x124   :  { %2982 = vmatpush.bf16.msra.mxu3 %v4083_v30  ;;  %v2693_v8 = vadd.f32 %v2692_v32, %v5749_v31  ;;  %v5180_v30 = vld [vmem:[#allocation5 + $0x534] sm:$0xf]  ;;  %v3923_v31 = vor.u32 %v5148_v14, %v3920_v16  ;;  %v4032_v32 = vld [vmem:[#allocation5 + $0x518] sm:$0xf0]  ;;  %v3907_v2 = vor.u32 %v5144_v59, %v3904_v41  ;;  %v4123_v14 = vor.u32 %v5198_v1, %v4120_v38  ;;  %v3960_v16 = vld [vmem:[#allocation5 + $0x488] sm:$0xf0] }
 0x125   :  { %2948 = vmatpush.bf16.msra.mxu0 %v3851_v43  ;;  %v3912_v43 = vld [vmem:[#allocation5 + $0x428] sm:$0xf0]  ;;  %v4256_v1 = vld [vmem:[#allocation5 + $0x6d8] sm:$0xf0]  ;;  %v5248_v38 = vld [vmem:[#allocation5 + $0x754] sm:$0xf] }
 0x126   :  { %2957 = vmatpush.bf16.msra.mxu1 %v3947_v0  ;;  %v2706_v19 = vadd.f32 %v2705_v11, %v2693_v8  ;;  %v4051_v0 = vor.u32 %v5180_v30, %v4048_v35  ;;  %v2731_v50 = vpop.f32.mrf.mxu3  ;;  %v3896_v11 = vld [vmem:[#allocation5 + $0x408] sm:$0xf0]  ;;  %v5220_v30 = vld [vmem:[#allocation5 + $0x674] sm:$0xf] }
 0x127   :  { %2970 = vmatpush.bf16.msra.mxu2 %v4011_v45  ;;  %v2718_v45 = vpop.f32.mrf.mxu2  ;;  %v2707_v55 = vpop.f32.mrf.mxu1  ;;  %v4211_v46 = vor.u32 %v5220_v30, %v4208_v36 }
 0x128   :  { %2983 = vmatpush.bf16.msra.mxu3 %v4075_v6  ;;  %v5178_v6 = vld [vmem:[#allocation5 + $0x524] sm:$0xf]  ;;  %v2719_v49 = vadd.f32 %v2718_v45, %v2706_v19  ;;  %v4024_v19 = vld [vmem:[#allocation5 + $0x508] sm:$0xf0] }
 0x129   :  { %2949 = vmatpush.bf16.msra.mxu0 %v3843_v54  ;;  %v5250_v55 = vld [vmem:[#allocation5 + $0x764] sm:$0xf] }
 0x12a   :  { %2958 = vmatpush.bf16.msra.mxu1 %v3939_v56  ;;  %v5756_v56 = vadd.f32 %v2731_v50, %v2719_v49  ;;  %v4104_v49 = vld [vmem:[#allocation5 + $0x5a8] sm:$0xf0]  ;;  %v5218_v50 = vld [vmem:[#allocation5 + $0x664] sm:$0xf] }
 0x12b   :  { %2971 = vmatpush.bf16.msra.mxu2 %v4003_v57  ;;  %v2694_v54 = vpop.f32.mrf.mxu0  ;;  %v3915_v57 = vor.u32 %v5146_v42, %v3912_v43  ;;  %v5252_v43 = vld [vmem:[#allocation5 + $0x774] sm:$0xf]  ;;  %v4203_v59 = vor.u32 %v5218_v50, %v4200_v52  ;;  %v4392_v50 = vld [vmem:[#allocation5 + $0x7e8] sm:$0xf0]  ;;  %v5210_v52 = vld [vmem:[#allocation5 + $0x624] sm:$0xf] }
 0x12c   :  { %2984 = vmatpush.bf16.msra.mxu3 %v4067_v60  ;;  %v4043_v60 = vor.u32 %v5178_v6, %v4040_v51  ;;  %v5194_v6 = vld [vmem:[#allocation5 + $0x5a4] sm:$0xf]  ;;  %v4264_v54 = vld [vmem:[#allocation5 + $0x6e8] sm:$0xf0] }
 0x12d   :  { %2950 = vmatpush.bf16.msra.mxu0 %v3835_v9  ;;  %v5142_v9 = vld [vmem:[#allocation5 + $0x404] sm:$0xf]  ;;  %v4267_v41 = vor.u32 %v5234_v53, %v4264_v54  ;;  %v4168_v53 = vld [vmem:[#allocation5 + $0x628] sm:$0xf0] }
 0x12e   :  { %2959 = vmatpush.bf16.msra.mxu1 %v3931_v12  ;;  %v5158_v12 = vld [vmem:[#allocation5 + $0x484] sm:$0xf]  ;;  %v2733_v35 = vpop.f32.mrf.mxu3 }
 0x12f   :  { %2972 = vmatpush.bf16.msra.mxu2 %v3995_v13  ;;  %v4035_v13 = vor.u32 %v5176_v63, %v4032_v32  ;;  %v3963_v42 = vor.u32 %v5158_v12, %v3960_v16  ;;  %v4192_v63 = vld [vmem:[#allocation5 + $0x658] sm:$0xf0]  ;;  %v5232_v32 = vld [vmem:[#allocation5 + $0x6d4] sm:$0xf] }
 0x130   :  { %2985 = vmatpush.bf16.msra.mxu3 %v4059_v17  ;;  %2951 = vmatmul.bf16.vlgmr.msra.gmra.mxu0 %v5679_v39  ;;  %v5160_v39 = vld [vmem:[#allocation5 + $0x494] sm:$0xf]  ;;  %v5174_v17 = vld [vmem:[#allocation5 + $0x504] sm:$0xf]  ;;  %v4259_v12 = vor.u32 %v5232_v32, %v4256_v1 }
 0x131   :  { %2995 = vmatpush.bf16.msrb.mxu0 %v4147_v3  ;;  %v3971_v8 = vor.u32 %v5160_v39, %v3968_v48  ;;  %v2720_v3 = vpop.f32.mrf.mxu2  ;;  %v4027_v45 = vor.u32 %v5174_v17, %v4024_v19  ;;  %v5216_v39 = vld [vmem:[#allocation5 + $0x654] sm:$0xf]  ;;  %v5230_v17 = vld [vmem:[#allocation5 + $0x6c4] sm:$0xf]  ;;  %v4248_v19 = vld [vmem:[#allocation5 + $0x6c8] sm:$0xf0] }
 0x132   :  { %2960 = vmatpush.bf16.msra.mxu1 %v3923_v31  ;;  %v4272_v31 = vld [vmem:[#allocation5 + $0x6f8] sm:$0xf0]  ;;  %v5246_v3 = vld [vmem:[#allocation5 + $0x744] sm:$0xf] }
 0x133   :  { %2973 = vmatpush.bf16.msra.mxu2 %v3987_v40  ;;  %v3899_v40 = vor.u32 %v5142_v9, %v3896_v11  ;;  %v4275_v47 = vor.u32 %v5236_v18, %v4272_v31  ;;  %v5190_v9 = vld [vmem:[#allocation5 + $0x584] sm:$0xf]  ;;  %v4195_v11 = vor.u32 %v5216_v39, %v4192_v63  ;;  %v4251_v31 = vor.u32 %v5230_v17, %v4248_v19  ;;  %v4296_v39 = vld [vmem:[#allocation5 + $0x728] sm:$0xf0]  ;;  %v4384_v63 = vld [vmem:[#allocation5 + $0x7d8] sm:$0xf0] }
 0x134   :  { %2986 = vmatpush.bf16.msra.mxu3 %v4051_v0  ;;  %v4336_v0 = vld [vmem:[#allocation5 + $0x778] sm:$0xf0]  ;;  %v5262_v17 = vld [vmem:[#allocation5 + $0x7c4] sm:$0xf]  ;;  %v4376_v19 = vld [vmem:[#allocation5 + $0x7c8] sm:$0xf0] }
 0x135   :  { %2996 = vmatpush.bf16.msrb.mxu0 %v4139_v5  ;;  %v4115_v5 = vor.u32 %v5196_v23, %v4112_v29  ;;  %v4339_v51 = vor.u32 %v5252_v43, %v4336_v0  ;;  %v4312_v23 = vld [vmem:[#allocation5 + $0x748] sm:$0xf0]  ;;  %v4400_v29 = vld [vmem:[#allocation5 + $0x7f8] sm:$0xf0] }
 0x136   :  { %2961 = vmatpush.bf16.msra.mxu1 %v3915_v57  ;;  %v4328_v57 = vld [vmem:[#allocation5 + $0x768] sm:$0xf0]  ;;  %v4315_v43 = vor.u32 %v5246_v3, %v4312_v23  ;;  %v5206_v23 = vld [vmem:[#allocation5 + $0x604] sm:$0xf] }
 0x137   :  { %2974 = vmatpush.bf16.msra.mxu2 %v3979_v58  ;;  %v4107_v58 = vor.u32 %v5194_v6, %v4104_v49  ;;  %v4331_v48 = vor.u32 %v5250_v55, %v4328_v57  ;;  %v4304_v6 = vld [vmem:[#allocation5 + $0x738] sm:$0xf0]  ;;  %v5266_v49 = vld [vmem:[#allocation5 + $0x7e4] sm:$0xf] }
 0x138   :  { %2987 = vmatpush.bf16.msra.mxu3 %v4043_v60  ;;  %v5192_v60 = vld [vmem:[#allocation5 + $0x594] sm:$0xf]  ;;  %v4395_v57 = vor.u32 %v5266_v49, %v4392_v50 }
 0x139   :  { %2997 = vmatpush.bf16.msrb.mxu0 %v4131_v61  ;;  %v4096_v61 = vld [vmem:[#allocation5 + $0x598] sm:$0xf0]  ;;  %v5316_v50 = vld [vmem:[#allocation5 + $0x974] sm:$0xf] }
 0x13a   :  { %2962 = vmatpush.bf16.msra.mxu1 %v3907_v2  ;;  %v4320_v2 = vld [vmem:[#allocation5 + $0x758] sm:$0xf0] }
 0x13b   :  { %2975 = vmatpush.bf16.msra.mxu2 %v3971_v8  ;;  %v4099_v8 = vor.u32 %v5192_v60, %v4096_v61  ;;  %v4323_v16 = vor.u32 %v5248_v38, %v4320_v2  ;;  %v4171_v2 = vor.u32 %v5210_v52, %v4168_v53 }
 0x13c   :  { %2988 = vmatpush.bf16.msra.mxu3 %v4035_v13  ;;  %v4088_v13 = vld [vmem:[#allocation5 + $0x588] sm:$0xf0] }
 0x13d   :  { %2998 = vmatpush.bf16.msrb.mxu0 %v4123_v14  ;;  %v5214_v14 = vld [vmem:[#allocation5 + $0x644] sm:$0xf]  ;;  %v4091_v35 = vor.u32 %v5190_v9, %v4088_v13  ;;  %v5208_v9 = vld [vmem:[#allocation5 + $0x614] sm:$0xf] }
 0x13e   :  { %2963 = vmatpush.bf16.msra.mxu1 %v3899_v40  ;;  %v2757_v36 = vpop.f32.mrf.mxu1  ;;  %v5212_v40 = vld [vmem:[#allocation5 + $0x634] sm:$0xf] }
 0x13f   :  { %2976 = vmatpush.bf16.msra.mxu2 %v3963_v42  ;;  %v4176_v42 = vld [vmem:[#allocation5 + $0x638] sm:$0xf0] }
 0x140   :  { %2989 = vmatpush.bf16.msra.mxu3 %v4027_v45 }
 0x141   :  { %2999 = vmatpush.bf16.msrb.mxu0 %v4115_v5  ;;  %2964 = vmatmul.bf16.vlgmr.msra.gmra.mxu1 %v5687_v20  ;;  %v4184_v20 = vld [vmem:[#allocation5 + $0x648] sm:$0xf0]  ;;  %v5228_v5 = vld [vmem:[#allocation5 + $0x6b4] sm:$0xf] }
 0x142   :  { %3008 = vmatpush.bf16.msrb.mxu1 %v4211_v46  ;;  %2977 = vmatmul.bf16.vlgmr.msra.gmra.mxu2 %v5691_v25  ;;  %v2744_v25 = vpop.f32.mrf.mxu0  ;;  %v4187_v18 = vor.u32 %v5214_v14, %v4184_v20  ;;  %v4240_v46 = vld [vmem:[#allocation5 + $0x6b8] sm:$0xf0]  ;;  %v5240_v20 = vld [vmem:[#allocation5 + $0x714] sm:$0xf] }
 0x143   :  { %3021 = vmatpush.bf16.msrb.mxu2 %v4275_v47  ;;  %2990 = vmatmul.bf16.vlgmr.msra.gmra.mxu3 %v5689_v24  ;;  %v5268_v24 = vld [vmem:[#allocation5 + $0x7f4] sm:$0xf]  ;;  %v2745_v30 = vadd.f32 %v2744_v25, %v5756_v56  ;;  %v4179_v56 = vor.u32 %v5212_v40, %v4176_v42  ;;  %v4224_v14 = vld [vmem:[#allocation5 + $0x698] sm:$0xf0] }
 0x144   :  { %3034 = vmatpush.bf16.msrb.mxu3 %v4339_v51  ;;  %v4403_v45 = vor.u32 %v5268_v24, %v4400_v29  ;;  %v5244_v47 = vld [vmem:[#allocation5 + $0x734] sm:$0xf]  ;;  %v4243_v51 = vor.u32 %v5228_v5, %v4240_v46  ;;  %v4152_v24 = vld [vmem:[#allocation5 + $0x608] sm:$0xf0]  ;;  %v5222_v29 = vld [vmem:[#allocation5 + $0x684] sm:$0xf] }
 0x145   :  { %3000 = vmatpush.bf16.msrb.mxu0 %v4107_v58  ;;  %v2758_v0 = vadd.f32 %v2757_v36, %v2745_v30  ;;  %v4307_v54 = vor.u32 %v5244_v47, %v4304_v6  ;;  %v2770_v55 = vpop.f32.mrf.mxu2  ;;  %v5226_v58 = vld [vmem:[#allocation5 + $0x6a4] sm:$0xf]  ;;  %v4216_v36 = vld [vmem:[#allocation5 + $0x688] sm:$0xf0]  ;;  %v5260_v42 = vld [vmem:[#allocation5 + $0x7b4] sm:$0xf]  ;;  %v4155_v6 = vor.u32 %v5206_v23, %v4152_v24 }
 0x146   :  { %3009 = vmatpush.bf16.msrb.mxu1 %v4203_v59  ;;  %v4232_v59 = vld [vmem:[#allocation5 + $0x6a8] sm:$0xf0]  ;;  %v2783_v61 = vpop.f32.mrf.mxu3  ;;  %v2759_v1 = vpop.f32.mrf.mxu1  ;;  %v4464_v5 = vld [vmem:[#allocation5 + $0x878] sm:$0xf0]  ;;  %v5300_v46 = vld [vmem:[#allocation5 + $0x8f4] sm:$0xf]  ;;  %v4219_v49 = vor.u32 %v5222_v29, %v4216_v36 }
 0x147   :  { %3022 = vmatpush.bf16.msrb.mxu2 %v4267_v41  ;;  %v5242_v41 = vld [vmem:[#allocation5 + $0x724] sm:$0xf]  ;;  %v2771_v60 = vadd.f32 %v2770_v55, %v2758_v0  ;;  %v5284_v0 = vld [vmem:[#allocation5 + $0x874] sm:$0xf]  ;;  %v4528_v47 = vld [vmem:[#allocation5 + $0x8f8] sm:$0xf0] }
 0x148   :  { %3035 = vmatpush.bf16.msrb.mxu3 %v4331_v48  ;;  %v5264_v48 = vld [vmem:[#allocation5 + $0x7d4] sm:$0xf]  ;;  %v4467_v53 = vor.u32 %v5284_v0, %v4464_v5  ;;  %v5258_v55 = vld [vmem:[#allocation5 + $0x7a4] sm:$0xf]  ;;  %v4568_v36 = vld [vmem:[#allocation5 + $0x948] sm:$0xf0] }
 0x149   :  { %3001 = vmatpush.bf16.msrb.mxu0 %v4099_v8  ;;  %v5763_v38 = vadd.f32 %v2783_v61, %v2771_v60  ;;  %v4235_v8 = vor.u32 %v5226_v58, %v4232_v59  ;;  %v4387_v13 = vor.u32 %v5264_v48, %v4384_v63  ;;  %v5282_v58 = vld [vmem:[#allocation5 + $0x864] sm:$0xf]  ;;  %v4520_v61 = vld [vmem:[#allocation5 + $0x8e8] sm:$0xf0]  ;;  %v4432_v5 = vld [vmem:[#allocation5 + $0x838] sm:$0xf0] }
 0x14a   :  { %3010 = vmatpush.bf16.msrb.mxu1 %v4195_v11  ;;  %v2746_v32 = vpop.f32.mrf.mxu0  ;;  %v4160_v11 = vld [vmem:[#allocation5 + $0x618] sm:$0xf0]  ;;  %v5298_v60 = vld [vmem:[#allocation5 + $0x8e4] sm:$0xf]  ;;  %v4584_v48 = vld [vmem:[#allocation5 + $0x968] sm:$0xf0] }
 0x14b   :  { %3023 = vmatpush.bf16.msrb.mxu2 %v4259_v12  ;;  %v4299_v12 = vor.u32 %v5242_v41, %v4296_v39  ;;  %v4163_v3 = vor.u32 %v5208_v9, %v4160_v11  ;;  %v4456_v41 = vld [vmem:[#allocation5 + $0x868] sm:$0xf0]  ;;  %v5314_v39 = vld [vmem:[#allocation5 + $0x964] sm:$0xf]  ;;  %v4523_v1 = vor.u32 %v5298_v60, %v4520_v61  ;;  %v5280_v9 = vld [vmem:[#allocation5 + $0x854] sm:$0xf] }
 0x14c   :  { %3036 = vmatpush.bf16.msrb.mxu3 %v4323_v16  ;;  %v4288_v16 = vld [vmem:[#allocation5 + $0x718] sm:$0xf0]  ;;  %v4459_v32 = vor.u32 %v5282_v58, %v4456_v41  ;;  %v4587_v11 = vor.u32 %v5314_v39, %v4584_v48  ;;  %v5278_v23 = vld [vmem:[#allocation5 + $0x844] sm:$0xf]  ;;  %v4488_v61 = vld [vmem:[#allocation5 + $0x8a8] sm:$0xf0] }
 0x14d   :  { %3002 = vmatpush.bf16.msrb.mxu0 %v4091_v35  ;;  %v4291_v30 = vor.u32 %v5240_v20, %v4288_v16  ;;  %v4379_v35 = vor.u32 %v5262_v17, %v4376_v19  ;;  %v2772_v40 = vpop.f32.mrf.mxu2  ;;  %v4576_v20 = vld [vmem:[#allocation5 + $0x958] sm:$0xf0]  ;;  %v5254_v17 = vld [vmem:[#allocation5 + $0x784] sm:$0xf] }
 0x14e   :  { %3011 = vmatpush.bf16.msrb.mxu1 %v4187_v18  ;;  %v5238_v18 = vld [vmem:[#allocation5 + $0x704] sm:$0xf] }
 0x14f   :  { %3024 = vmatpush.bf16.msrb.mxu2 %v4251_v31  ;;  %v4280_v31 = vld [vmem:[#allocation5 + $0x708] sm:$0xf0]  ;;  %v5294_v29 = vld [vmem:[#allocation5 + $0x8c4] sm:$0xf] }
 0x150   :  { %3037 = vmatpush.bf16.msrb.mxu3 %v4315_v43  ;;  %3003 = vmatmul.bf16.vlgmr.msrb.gmra.mxu0 %v5693_v28  ;;  %v5224_v28 = vld [vmem:[#allocation5 + $0x694] sm:$0xf]  ;;  %v4368_v43 = vld [vmem:[#allocation5 + $0x7b8] sm:$0xf0]  ;;  %v5290_v60 = vld [vmem:[#allocation5 + $0x8a4] sm:$0xf] }
 0x151   :  { %3047 = vmatpush.bf16.msra.mxu0 %v4403_v45  ;;  %v4227_v25 = vor.u32 %v5224_v28, %v4224_v14  ;;  %v2785_v45 = vpop.f32.mrf.mxu3  ;;  %v4371_v52 = vor.u32 %v5260_v42, %v4368_v43  ;;  %v4512_v28 = vld [vmem:[#allocation5 + $0x8d8] sm:$0xf0]  ;;  %v5312_v14 = vld [vmem:[#allocation5 + $0x954] sm:$0xf]  ;;  %v5306_v39 = vld [vmem:[#allocation5 + $0x924] sm:$0xf] }
 0x152   :  { %3012 = vmatpush.bf16.msrb.mxu1 %v4179_v56  ;;  %v4592_v56 = vld [vmem:[#allocation5 + $0x978] sm:$0xf0]  ;;  %v4579_v24 = vor.u32 %v5312_v14, %v4576_v20  ;;  %v5276_v45 = vld [vmem:[#allocation5 + $0x834] sm:$0xf] }
 0x153   :  { %3025 = vmatpush.bf16.msrb.mxu2 %v4243_v51  ;;  %v4283_v51 = vor.u32 %v5238_v18, %v4280_v31  ;;  %v4595_v59 = vor.u32 %v5316_v50, %v4592_v56  ;;  %v4656_v18 = vld [vmem:[#allocation5 + $0x9f8] sm:$0xf0]  ;;  %v5308_v56 = vld [vmem:[#allocation5 + $0x934] sm:$0xf] }
 0x154   :  { %3038 = vmatpush.bf16.msrb.mxu3 %v4307_v54  ;;  %v4531_v54 = vor.u32 %v5300_v46, %v4528_v47  ;;  %v4496_v50 = vld [vmem:[#allocation5 + $0x8b8] sm:$0xf0] }
 0x155   :  { %3048 = vmatpush.bf16.msra.mxu0 %v4395_v57  ;;  %v4360_v57 = vld [vmem:[#allocation5 + $0x7a8] sm:$0xf0]  ;;  %v4416_v14 = vld [vmem:[#allocation5 + $0x818] sm:$0xf0] }
 0x156   :  { %3013 = vmatpush.bf16.msrb.mxu1 %v4171_v2  ;;  %v4363_v63 = vor.u32 %v5258_v55, %v4360_v57  ;;  %v5256_v2 = vld [vmem:[#allocation5 + $0x794] sm:$0xf]  ;;  %v5274_v55 = vld [vmem:[#allocation5 + $0x824] sm:$0xf]  ;;  %v4424_v57 = vld [vmem:[#allocation5 + $0x828] sm:$0xf0] }
 0x157   :  { %3026 = vmatpush.bf16.msrb.mxu2 %v4235_v8  ;;  %v4352_v8 = vld [vmem:[#allocation5 + $0x798] sm:$0xf0] }
 0x158   :  { %3039 = vmatpush.bf16.msrb.mxu3 %v4299_v12  ;;  %v4448_v12 = vld [vmem:[#allocation5 + $0x858] sm:$0xf0]  ;;  %v4355_v16 = vor.u32 %v5256_v2, %v4352_v8  ;;  %v5328_v2 = vld [vmem:[#allocation5 + $0x9d4] sm:$0xf] }
 0x159   :  { %3049 = vmatpush.bf16.msra.mxu0 %v4387_v13  ;;  %v5296_v13 = vld [vmem:[#allocation5 + $0x8d4] sm:$0xf]  ;;  %v4451_v19 = vor.u32 %v5280_v9, %v4448_v12  ;;  %v4640_v8 = vld [vmem:[#allocation5 + $0x9d8] sm:$0xf0]  ;;  %v4427_v12 = vor.u32 %v5274_v55, %v4424_v57  ;;  %v5322_v55 = vld [vmem:[#allocation5 + $0x9a4] sm:$0xf] }
 0x15a   :  { %3014 = vmatpush.bf16.msrb.mxu1 %v4163_v3  ;;  %v4515_v3 = vor.u32 %v5296_v13, %v4512_v28  ;;  %v4491_v13 = vor.u32 %v5290_v60, %v4488_v61  ;;  %v5272_v28 = vld [vmem:[#allocation5 + $0x814] sm:$0xf]  ;;  %v4616_v57 = vld [vmem:[#allocation5 + $0x9a8] sm:$0xf0]  ;;  %v5362_v60 = vld [vmem:[#allocation5 + $0xae4] sm:$0xf] }
 0x15b   :  { %3027 = vmatpush.bf16.msrb.mxu2 %v4227_v25  ;;  %v4344_v25 = vld [vmem:[#allocation5 + $0x788] sm:$0xf0] }
 0x15c   :  { %3040 = vmatpush.bf16.msrb.mxu3 %v4291_v30  ;;  %v4504_v30 = vld [vmem:[#allocation5 + $0x8c8] sm:$0xf0]  ;;  %v4347_v40 = vor.u32 %v5254_v17, %v4344_v25  ;;  %v4480_v17 = vld [vmem:[#allocation5 + $0x898] sm:$0xf0]  ;;  %v5326_v25 = vld [vmem:[#allocation5 + $0x9c4] sm:$0xf] }
 0x15d   :  { %3050 = vmatpush.bf16.msra.mxu0 %v4379_v35  ;;  %v5310_v35 = vld [vmem:[#allocation5 + $0x944] sm:$0xf]  ;;  %v4507_v0 = vor.u32 %v5294_v29, %v4504_v30  ;;  %v4408_v30 = vld [vmem:[#allocation5 + $0x808] sm:$0xf0] }
 0x15e   :  { %3015 = vmatpush.bf16.msrb.mxu1 %v4155_v6  ;;  %v2809_v42 = vpop.f32.mrf.mxu1  ;;  %v4571_v46 = vor.u32 %v5310_v35, %v4568_v36  ;;  %v5270_v29 = vld [vmem:[#allocation5 + $0x804] sm:$0xf]  ;;  %v4776_v61 = vld [vmem:[#allocation5 + $0xae8] sm:$0xf0] }
 0x15f   :  { %3028 = vmatpush.bf16.msrb.mxu2 %v4219_v49  ;;  %v5292_v49 = vld [vmem:[#allocation5 + $0x8b4] sm:$0xf]  ;;  %v5286_v35 = vld [vmem:[#allocation5 + $0x884] sm:$0xf] }
 0x160   :  { %3041 = vmatpush.bf16.msrb.mxu3 %v4283_v51  ;;  %v4560_v51 = vld [vmem:[#allocation5 + $0x938] sm:$0xf0] }
 0x161   :  { %3051 = vmatpush.bf16.msra.mxu0 %v4371_v52  ;;  %3016 = vmatmul.bf16.vlgmr.msrb.gmra.mxu1 %v5699_v15  ;;  %v4440_v15 = vld [vmem:[#allocation5 + $0x848] sm:$0xf0]  ;;  %v5330_v52 = vld [vmem:[#allocation5 + $0x9e4] sm:$0xf]  ;;  %v4563_v58 = vor.u32 %v5308_v56, %v4560_v51  ;;  %v5380_v56 = vld [vmem:[#allocation5 + $0xb74] sm:$0xf] }
 0x162   :  { %3060 = vmatpush.bf16.msra.mxu1 %v4467_v53  ;;  %3029 = vmatmul.bf16.vlgmr.msrb.gmra.mxu2 %v5703_v22  ;;  %v2796_v22 = vpop.f32.mrf.mxu0  ;;  %v4443_v43 = vor.u32 %v5278_v23, %v4440_v15  ;;  %v4648_v53 = vld [vmem:[#allocation5 + $0x9e8] sm:$0xf0]  ;;  %v4419_v15 = vor.u32 %v5272_v28, %v4416_v14  ;;  %v4848_v51 = vld [vmem:[#allocation5 + $0xb78] sm:$0xf0]  ;;  %v5360_v28 = vld [vmem:[#allocation5 + $0xad4] sm:$0xf] }
 0x163   :  { %3073 = vmatpush.bf16.msra.mxu2 %v4531_v54  ;;  %3042 = vmatmul.bf16.vlgmr.msrb.gmra.mxu3 %v5701_v21  ;;  %v5332_v21 = vld [vmem:[#allocation5 + $0x9f4] sm:$0xf]  ;;  %v2797_v31 = vadd.f32 %v2796_v22, %v5763_v38  ;;  %v4435_v38 = vor.u32 %v5276_v45, %v4432_v5  ;;  %v4499_v54 = vor.u32 %v5292_v49, %v4496_v50  ;;  %v4632_v23 = vld [vmem:[#allocation5 + $0x9c8] sm:$0xf0]  ;;  %v4768_v14 = vld [vmem:[#allocation5 + $0xad8] sm:$0xf0] }
 0x164   :  { %3086 = vmatpush.bf16.msra.mxu3 %v4595_v59  ;;  %v4659_v6 = vor.u32 %v5332_v21, %v4656_v18  ;;  %v4651_v41 = vor.u32 %v5330_v52, %v4648_v53  ;;  %v4635_v36 = vor.u32 %v5326_v25, %v4632_v23  ;;  %v4472_v21 = vld [vmem:[#allocation5 + $0x888] sm:$0xf0]  ;;  %v5302_v18 = vld [vmem:[#allocation5 + $0x904] sm:$0xf]  ;;  %v4411_v49 = vor.u32 %v5270_v29, %v4408_v30 }
 0x165   :  { %3052 = vmatpush.bf16.msra.mxu0 %v4363_v63  ;;  %v2810_v47 = vadd.f32 %v2809_v42, %v2797_v31  ;;  %v2822_v59 = vpop.f32.mrf.mxu2  ;;  %v4536_v31 = vld [vmem:[#allocation5 + $0x908] sm:$0xf0]  ;;  %v5324_v42 = vld [vmem:[#allocation5 + $0x9b4] sm:$0xf]  ;;  %v4475_v50 = vor.u32 %v5286_v35, %v4472_v21  ;;  %v4771_v23 = vor.u32 %v5360_v28, %v4768_v14  ;;  %v5374_v35 = vld [vmem:[#allocation5 + $0xb44] sm:$0xf] }
 0x166   :  { %3061 = vmatpush.bf16.msra.mxu1 %v4459_v32  ;;  %v2835_v32 = vpop.f32.mrf.mxu3  ;;  %v2811_v9 = vpop.f32.mrf.mxu1  ;;  %v4539_v52 = vor.u32 %v5302_v18, %v4536_v31  ;;  %v4760_v30 = vld [vmem:[#allocation5 + $0xac8] sm:$0xf0]  ;;  %v4912_v21 = vld [vmem:[#allocation5 + $0xbf8] sm:$0xf0] }
 0x167   :  { %3074 = vmatpush.bf16.msra.mxu2 %v4523_v1  ;;  %v2823_v48 = vadd.f32 %v2822_v59, %v2810_v47  ;;  %v4552_v1 = vld [vmem:[#allocation5 + $0x928] sm:$0xf0]  ;;  %v5364_v47 = vld [vmem:[#allocation5 + $0xaf4] sm:$0xf]  ;;  %v4851_v59 = vor.u32 %v5380_v56, %v4848_v51  ;;  %v4816_v56 = vld [vmem:[#allocation5 + $0xb38] sm:$0xf0] }
 0x168   :  { %3087 = vmatpush.bf16.msra.mxu3 %v4587_v11  ;;  %v4555_v20 = vor.u32 %v5306_v39, %v4552_v1  ;;  %v5378_v39 = vld [vmem:[#allocation5 + $0xb64] sm:$0xf]  ;;  %v4779_v1 = vor.u32 %v5362_v60, %v4776_v61  ;;  %v5344_v9 = vld [vmem:[#allocation5 + $0xa54] sm:$0xf]  ;;  %v4744_v60 = vld [vmem:[#allocation5 + $0xaa8] sm:$0xf0] }
 0x169   :  { %3053 = vmatpush.bf16.msra.mxu0 %v4355_v16  ;;  %v5770_v11 = vadd.f32 %v2835_v32, %v2823_v48  ;;  %v4643_v16 = vor.u32 %v5328_v2, %v4640_v8  ;;  %v4840_v48 = vld [vmem:[#allocation5 + $0xb68] sm:$0xf0]  ;;  %v5320_v2 = vld [vmem:[#allocation5 + $0x994] sm:$0xf]  ;;  %v4608_v8 = vld [vmem:[#allocation5 + $0x998] sm:$0xf0] }
 0x16a   :  { %3062 = vmatpush.bf16.msra.mxu1 %v4451_v19  ;;  %v2798_v63 = vpop.f32.mrf.mxu0  ;;  %v5304_v19 = vld [vmem:[#allocation5 + $0x914] sm:$0xf]  ;;  %v5394_v51 = vld [vmem:[#allocation5 + $0xbe4] sm:$0xf]  ;;  %v4672_v28 = vld [vmem:[#allocation5 + $0xa18] sm:$0xf0] }
 0x16b   :  { %3075 = vmatpush.bf16.msra.mxu2 %v4515_v3  ;;  %v4544_v3 = vld [vmem:[#allocation5 + $0x918] sm:$0xf0]  ;;  %v4619_v63 = vor.u32 %v5322_v55, %v4616_v57  ;;  %v4680_v55 = vld [vmem:[#allocation5 + $0xa28] sm:$0xf0]  ;;  %v5370_v61 = vld [vmem:[#allocation5 + $0xb24] sm:$0xf] }
 0x16c   :  { %3088 = vmatpush.bf16.msra.mxu3 %v4579_v24  ;;  %v4547_v22 = vor.u32 %v5304_v19, %v4544_v3  ;;  %v5318_v19 = vld [vmem:[#allocation5 + $0x984] sm:$0xf]  ;;  %v4600_v3 = vld [vmem:[#allocation5 + $0x988] sm:$0xf0] }
 0x16d   :  { %3054 = vmatpush.bf16.msra.mxu0 %v4347_v40  ;;  %v2824_v40 = vpop.f32.mrf.mxu2  ;;  %v4603_v18 = vor.u32 %v5318_v19, %v4600_v3  ;;  %v4800_v19 = vld [vmem:[#allocation5 + $0xb18] sm:$0xf0]  ;;  %v4888_v3 = vld [vmem:[#allocation5 + $0xbc8] sm:$0xf0] }
 0x16e   :  { %3063 = vmatpush.bf16.msra.mxu1 %v4443_v43  ;;  %v4624_v43 = vld [vmem:[#allocation5 + $0x9b8] sm:$0xf0]  ;;  %v2837_v45 = vpop.f32.mrf.mxu3 }
 0x16f   :  { %3076 = vmatpush.bf16.msra.mxu2 %v4507_v0  ;;  %v5348_v0 = vld [vmem:[#allocation5 + $0xa74] sm:$0xf]  ;;  %v4627_v53 = vor.u32 %v5324_v42, %v4624_v43 }
 0x170   :  { %3089 = vmatpush.bf16.msra.mxu3 %v4571_v46  ;;  %3055 = vmatmul.bf16.vlgmr.msra.gmra.mxu0 %v5705_v27  ;;  %v5288_v27 = vld [vmem:[#allocation5 + $0x894] sm:$0xf]  ;;  %v4720_v46 = vld [vmem:[#allocation5 + $0xa78] sm:$0xf0] }
 0x171   :  { %3099 = vmatpush.bf16.msrb.mxu0 %v4659_v6  ;;  %v4483_v24 = vor.u32 %v5288_v27, %v4480_v17  ;;  %v4784_v6 = vld [vmem:[#allocation5 + $0xaf8] sm:$0xf0]  ;;  %v4611_v17 = vor.u32 %v5320_v2, %v4608_v8  ;;  %v5340_v43 = vld [vmem:[#allocation5 + $0xa34] sm:$0xf] }
 0x172   :  { %3064 = vmatpush.bf16.msra.mxu1 %v4435_v38  ;;  %v5772_v5 = vpop.f32.mrf.mxu0  ;;  %v4723_v38 = vor.u32 %v5348_v0, %v4720_v46  ;;  %v4832_v27 = vld [vmem:[#allocation5 + $0xb58] sm:$0xf0] }
 0x173   :  { %3077 = vmatpush.bf16.msra.mxu2 %v4499_v54  ;;  %v4787_v54 = vor.u32 %v5364_v47, %v4784_v6  ;;  %v4688_v0 = vld [vmem:[#allocation5 + $0xa38] sm:$0xf0]  ;;  %v5356_v47 = vld [vmem:[#allocation5 + $0xab4] sm:$0xf] }
 0x174   :  { %3090 = vmatpush.bf16.msra.mxu3 %v4563_v58  ;;  %v5346_v58 = vld [vmem:[#allocation5 + $0xa64] sm:$0xf]  ;;  %v4752_v6 = vld [vmem:[#allocation5 + $0xab8] sm:$0xf0] }
 0x175   :  { %3100 = vmatpush.bf16.msrb.mxu0 %v4651_v41  ;;  %v4712_v41 = vld [vmem:[#allocation5 + $0xa68] sm:$0xf0] }
 0x176   :  { %3065 = vmatpush.bf16.msra.mxu1 %v4427_v12  ;;  %v4715_v32 = vor.u32 %v5346_v58, %v4712_v41  ;;  %v4843_v12 = vor.u32 %v5378_v39, %v4840_v48  ;;  %v5354_v41 = vld [vmem:[#allocation5 + $0xaa4] sm:$0xf] }
 0x177   :  { %3078 = vmatpush.bf16.msra.mxu2 %v4491_v13  ;;  %v4704_v13 = vld [vmem:[#allocation5 + $0xa58] sm:$0xf0] }
 0x178   :  { %3091 = vmatpush.bf16.msra.mxu3 %v4555_v20  ;;  %v4707_v25 = vor.u32 %v5344_v9, %v4704_v13  ;;  %v5336_v13 = vld [vmem:[#allocation5 + $0xa14] sm:$0xf] }
 0x179   :  { %3101 = vmatpush.bf16.msrb.mxu0 %v4643_v16  ;;  %v5376_v16 = vld [vmem:[#allocation5 + $0xb54] sm:$0xf] }
 0x17a   :  { %3066 = vmatpush.bf16.msra.mxu1 %v4419_v15  ;;  %v2850_v20 = vpop.f32.mrf.mxu0  ;;  %v4696_v15 = vld [vmem:[#allocation5 + $0xa48] sm:$0xf0]  ;;  %v4835_v29 = vor.u32 %v5376_v16, %v4832_v27  ;;  %v5352_v16 = vld [vmem:[#allocation5 + $0xa94] sm:$0xf]  ;;  %v4736_v27 = vld [vmem:[#allocation5 + $0xa98] sm:$0xf0] }
 0x17b   :  { %3079 = vmatpush.bf16.msra.mxu2 %v4483_v24  ;;  %v5358_v24 = vld [vmem:[#allocation5 + $0xac4] sm:$0xf] }
 0x17c   :  { %3092 = vmatpush.bf16.msra.mxu3 %v4547_v22  ;;  %v4763_v42 = vor.u32 %v5358_v24, %v4760_v30  ;;  %v4664_v24 = vld [vmem:[#allocation5 + $0xa08] sm:$0xf0] }
 0x17d   :  { %3102 = vmatpush.bf16.msrb.mxu0 %v4635_v36  ;;  %v5396_v36 = vld [vmem:[#allocation5 + $0xbf4] sm:$0xf] }
 0x17e   :  { %3067 = vmatpush.bf16.msra.mxu1 %v4411_v49  ;;  %v2861_v31 = vpop.f32.mrf.mxu1  ;;  %v4915_v46 = vor.u32 %v5396_v36, %v4912_v21  ;;  %v5372_v49 = vld [vmem:[#allocation5 + $0xb34] sm:$0xf]  ;;  %v5366_v36 = vld [vmem:[#allocation5 + $0xb04] sm:$0xf] }
 0x17f   :  { %3080 = vmatpush.bf16.msra.mxu2 %v4475_v50  ;;  %v4819_v58 = vor.u32 %v5372_v49, %v4816_v56  ;;  %v4872_v56 = vld [vmem:[#allocation5 + $0xba8] sm:$0xf0] }
 0x180   :  { %3093 = vmatpush.bf16.msra.mxu3 %v4539_v52  ;;  %v4904_v52 = vld [vmem:[#allocation5 + $0xbe8] sm:$0xf0] }
 0x181   :  { %3103 = vmatpush.bf16.msrb.mxu0 %v4627_v53  ;;  %3068 = vmatmul.bf16.vlgmr.msra.gmra.mxu1 %v5711_v26  ;;  %v5342_v26 = vld [vmem:[#allocation5 + $0xa44] sm:$0xf]  ;;  %v4691_v53 = vor.u32 %v5340_v43, %v4688_v0  ;;  %v4944_v43 = vld [vmem:[#allocation5 + $0xc38] sm:$0xf0] }
 0x182   :  { %3112 = vmatpush.bf16.msrb.mxu1 %v4723_v38  ;;  %3081 = vmatmul.bf16.vlgmr.msra.gmra.mxu2 %v5715_v34  ;;  %v5439_v34 = vld [vmem:[#allocation7] sm:$0x3]  ;;  %v4699_v40 = vor.u32 %v5342_v26, %v4696_v15  ;;  %v4755_v38 = vor.u32 %v5356_v47, %v4752_v6  ;;  %v4739_v26 = vor.u32 %v5352_v16, %v4736_v27  ;;  %v5334_v15 = vld [vmem:[#allocation5 + $0xa04] sm:$0xf]  ;;  %v5408_v16 = vld [vmem:[#allocation8 + $0x10] sm:$0xff] }
 0x183   :  { %3125 = vmatpush.bf16.msrb.mxu2 %v4787_v54  ;;  %3094 = vmatmul.bf16.vlgmr.msra.gmra.mxu3 %v5713_v33  ;;  %v560_v22 = vperm.slane %v5439_v34, 1  ;;  %v4824_v33 = vld [vmem:[#allocation5 + $0xb48] sm:$0xf0]  ;;  %v5338_v54 = vld [vmem:[#allocation5 + $0xa24] sm:$0xf]  ;;  %v4667_v0 = vor.u32 %v5334_v15, %v4664_v24  ;;  %v5413_v6 = vld [vmem:[#allocation8 + $0x38] sm:$0xff] }
 0x184   :  { %3138 = vmatpush.bf16.msrb.mxu3 %v4851_v59  ;;  %v4827_v45 = vor.u32 %v5374_v35, %v4824_v33  ;;  %v4907_v59 = vor.u32 %v5394_v51, %v4904_v52  ;;  %v4683_v9 = vor.u32 %v5338_v54, %v4680_v55  ;;  %v4728_v33 = vld [vmem:[#allocation5 + $0xa88] sm:$0xf0]  ;;  %v5402_v51 = vld [vmem:[#allocation5 + $0xc24] sm:$0xf]  ;;  %v5412_v54 = vld [vmem:[#allocation8 + $0x30] sm:$0xff] }
 0x185   :  { %3104 = vmatpush.bf16.msrb.mxu0 %v4619_v63  ;;  %v2862_v50 = vadd.f32 %v2861_v31, %v560_v22  ;;  %v2874_v57 = vpop.f32.mrf.mxu2  ;;  %v4808_v63 = vld [vmem:[#allocation5 + $0xb28] sm:$0xf0]  ;;  %v5350_v22 = vld [vmem:[#allocation5 + $0xa84] sm:$0xf]  ;;  %v5388_v31 = vld [vmem:[#allocation5 + $0xbb4] sm:$0xf] }
 0x186   :  { %3113 = vmatpush.bf16.msrb.mxu1 %v4715_v32  ;;  %v2887_v48 = vpop.f32.mrf.mxu3  ;;  %v5392_v32 = vld [vmem:[#allocation5 + $0xbd4] sm:$0xf]  ;;  %v2863_v8 = vpop.f32.mrf.mxu1  ;;  %v4811_v14 = vor.u32 %v5370_v61, %v4808_v63  ;;  %v4936_v52 = vld [vmem:[#allocation5 + $0xc28] sm:$0xf0] }
 0x187   :  { %3126 = vmatpush.bf16.msrb.mxu2 %v4779_v1  ;;  %v2875_v39 = vadd.f32 %v2874_v57, %v2862_v50  ;;  %v4896_v1 = vld [vmem:[#allocation5 + $0xbd8] sm:$0xf0]  ;;  %v5386_v50 = vld [vmem:[#allocation5 + $0xba4] sm:$0xf]  ;;  %v4939_v55 = vor.u32 %v5402_v51, %v4936_v52  ;;  %v5384_v57 = vld [vmem:[#allocation5 + $0xb94] sm:$0xf] }
 0x188   :  { %3139 = vmatpush.bf16.msrb.mxu3 %v4843_v12  ;;  %v4747_v12 = vor.u32 %v5354_v41, %v4744_v60  ;;  %v4899_v20 = vor.u32 %v5392_v32, %v4896_v1  ;;  %v4928_v41 = vld [vmem:[#allocation5 + $0xc18] sm:$0xf0]  ;;  %v5411_v61 = vld [vmem:[#allocation8 + $0x28] sm:$0xff]  ;;  %v5398_v32 = vld [vmem:[#allocation5 + $0xc04] sm:$0xf] }
 0x189   :  { %3105 = vmatpush.bf16.msrb.mxu0 %v4611_v17  ;;  %v2888_v2 = vadd.f32 %v2887_v48, %v2875_v39  ;;  %v5368_v17 = vld [vmem:[#allocation5 + $0xb14] sm:$0xf]  ;;  %v5382_v48 = vld [vmem:[#allocation5 + $0xb84] sm:$0xf]  ;;  %v4856_v63 = vld [vmem:[#allocation5 + $0xb88] sm:$0xf0] }
 0x18a   :  { %3114 = vmatpush.bf16.msrb.mxu1 %v4707_v25  ;;  %v4803_v35 = vor.u32 %v5368_v17, %v4800_v19  ;;  %v4920_v1 = vld [vmem:[#allocation5 + $0xc08] sm:$0xf0]  ;;  %v5417_v51 = vld [vmem:[#allocation8 + $0x58] sm:$0xff] }
 0x18b   :  { %3127 = vmatpush.bf16.msrb.mxu2 %v4771_v23  ;;  %v4675_v23 = vor.u32 %v5336_v13, %v4672_v28  ;;  %v5407_v19 = vld [vmem:[#allocation8 + $0x8] sm:$0xff] }
 0x18c   :  { %3140 = vmatpush.bf16.msrb.mxu3 %v4835_v29 }
 0x18d   :  { %3106 = vmatpush.bf16.msrb.mxu0 %v4603_v18  ;;  %v2900_v25 = vpop.f32.mrf.mxu0  ;;  %v2876_v30 = vpop.f32.mrf.mxu2  ;;  %v4792_v18 = vld [vmem:[#allocation5 + $0xb08] sm:$0xf0] }
 0x18e   :  { %3115 = vmatpush.bf16.msrb.mxu1 %v4699_v40  ;;  %v5778_v29 = vadd.f32 %v2900_v25, %v2888_v2  ;;  %v2889_v21 = vpop.f32.mrf.mxu3  ;;  %v4880_v40 = vld [vmem:[#allocation5 + $0xbb8] sm:$0xf0]  ;;  %v4859_v2 = vor.u32 %v5382_v48, %v4856_v63 }
 0x18f   :  { %3128 = vmatpush.bf16.msrb.mxu2 %v4763_v42  ;;  %v5404_v42 = vld [vmem:[#allocation5 + $0xc34] sm:$0xf]  ;;  %v4883_v47 = vor.u32 %v5388_v31, %v4880_v40 }
 0x190   :  { %3141 = vmatpush.bf16.msrb.mxu3 %v4827_v45  ;;  %3107 = vmatmul.bf16.vlgmr.msrb.gmra.mxu0 %v5717_v37  ;;  %v5390_v37 = vld [vmem:[#allocation5 + $0xbc4] sm:$0xf]  ;;  %v4731_v45 = vor.u32 %v5350_v22, %v4728_v33  ;;  %v4947_v49 = vor.u32 %v5404_v42, %v4944_v43  ;;  %v5421_v43 = vld [vmem:[#allocation8 + $0x78] sm:$0xff] }
 0x191   :  { %3151 = vmatpush.bf16.msra.mxu0 %v4915_v46  ;;  %v4891_v34 = vor.u32 %v5390_v37, %v4888_v3  ;;  %v4795_v46 = vor.u32 %v5366_v36, %v4792_v18  ;;  %v2849_v3 = vadd.f32 %v5772_v5, %v5770_v11 }
 0x192   :  { %3116 = vmatpush.bf16.msrb.mxu1 %v4691_v53 }
 0x193   :  { %3129 = vmatpush.bf16.msrb.mxu2 %v4755_v38  ;;  %v4875_v38 = vor.u32 %v5386_v50, %v4872_v56  ;;  %v5418_v50 = vld [vmem:[#allocation8 + $0x60] sm:$0xff] }
 0x194   :  { %3142 = vmatpush.bf16.msrb.mxu3 %v4819_v58  ;;  %v4864_v58 = vld [vmem:[#allocation5 + $0xb98] sm:$0xf0] }
 0x195   :  { %3152 = vmatpush.bf16.msra.mxu0 %v4907_v59  ;;  %v2902_v53 = vpop.f32.mrf.mxu0  ;;  %v5400_v59 = vld [vmem:[#allocation5 + $0xc14] sm:$0xf]  ;;  %v4867_v60 = vor.u32 %v5384_v57, %v4864_v58  ;;  %v5415_v57 = vld [vmem:[#allocation8 + $0x48] sm:$0xff] }
 0x196   :  { %3117 = vmatpush.bf16.msrb.mxu1 %v4683_v9  ;;  %v4931_v39 = vor.u32 %v5400_v59, %v4928_v41 }
 0x197   :  { %3130 = vmatpush.bf16.msrb.mxu2 %v4747_v12 }
 0x198   :  { %3143 = vmatpush.bf16.msrb.mxu3 %v4811_v14 }
 0x199   :  { %3153 = vmatpush.bf16.msra.mxu0 %v4899_v20 }
 0x19a   :  { %3118 = vmatpush.bf16.msrb.mxu1 %v4675_v23  ;;  %v5406_v23 = vld [vmem:[#allocation8] sm:$0xff] }
 0x19b   :  { %3131 = vmatpush.bf16.msrb.mxu2 %v4739_v26  ;;  %v3177_v26 = vmax.f32 %v2849_v3, 0.0 }
 0x19c   :  { %3144 = vmatpush.bf16.msrb.mxu3 %v4803_v35 }
 0x19d   :  { %3154 = vmatpush.bf16.msra.mxu0 %v4891_v34  ;;  %v3179_v15 = vpack.c.bf16 %v3177_v26, %v3177_v26 }
 0x19e   :  { %3119 = vmatpush.bf16.msrb.mxu1 %v4667_v0  ;;  %v2913_v8 = vpop.f32.mrf.mxu1 }
 0x19f   :  { %3132 = vmatpush.bf16.msrb.mxu2 %v4731_v45  ;;  %v2914_v9 = vadd.f32 %v2913_v8, %v5778_v29  ;;  %v5420_v45 = vld [vmem:[#allocation8 + $0x70] sm:$0xff] }
 0x1a0   :  { %3145 = vmatpush.bf16.msrb.mxu3 %v4795_v46 }
 0x1a1   :  { %3155 = vmatpush.bf16.msra.mxu0 %v4883_v47  ;;  %3120 = vmatmul.bf16.vlgmr.msrb.gmra.mxu1 %v5725_v62  ;;  %v5410_v62 = vld [vmem:[#allocation8 + $0x20] sm:$0xff] }
 0x1a2   :  { %3168 = vmatpush.bf16.msra.mxu1 %v4947_v49  ;;  %3133 = vmatmul.bf16.vlgmr.msrb.gmra.mxu2 %v5729_v7  ;;  %v4923_v7 = vor.u32 %v5398_v32, %v4920_v1  ;;  %v5419_v49 = vld [vmem:[#allocation8 + $0x68] sm:$0xff] }
 0x1a3   :  { %3313 = vmatpush.bf16.msra.mxu2 %v5413_v6  ;;  %3146 = vmatmul.bf16.vlgmr.msrb.gmra.mxu3 %v5727_v4  ;;  %v5409_v4 = vld [vmem:[#allocation8 + $0x18] sm:$0xff] }
 0x1a4   :  { %3326 = vmatpush.bf16.msra.mxu3 %v5421_v43 }
 0x1a5   :  { %3156 = vmatpush.bf16.msra.mxu0 %v4875_v38  ;;  %v2926_v12 = vpop.f32.mrf.mxu2  ;;  %v5416_v38 = vld [vmem:[#allocation8 + $0x50] sm:$0xff] }
 0x1a6   :  { %3169 = vmatpush.bf16.msra.mxu1 %v4939_v55  ;;  %v2927_v13 = vadd.f32 %v2926_v12, %v2914_v9  ;;  %v2939_v28 = vpop.f32.mrf.mxu3  ;;  %v2915_v20 = vpop.f32.mrf.mxu1 }
 0x1a7   :  { %3314 = vmatpush.bf16.msra.mxu2 %v5412_v54 }
 0x1a8   :  { %v2940_v14 = vadd.f32 %v2939_v28, %v2927_v13  ;;  %3327 = vmatpush.bf16.msra.mxu3 %v5420_v45 }
 0x1a9   :  { %3157 = vmatpush.bf16.msra.mxu0 %v4867_v60  ;;  %v5414_v60 = vld [vmem:[#allocation8 + $0x40] sm:$0xff] }
 0x1aa   :  { %3170 = vmatpush.bf16.msra.mxu1 %v4931_v39 }
 0x1ab   :  { %3315 = vmatpush.bf16.msra.mxu2 %v5411_v61 }
 0x1ac   :  { %3328 = vmatpush.bf16.msra.mxu3 %v5419_v49 }
 0x1ad   :  { %3158 = vmatpush.bf16.msra.mxu0 %v4859_v2  ;;  %v2952_v27 = vpop.f32.mrf.mxu0  ;;  %v2928_v37 = vpop.f32.mrf.mxu2 }
 0x1ae   :  { %3171 = vmatpush.bf16.msra.mxu1 %v4923_v7  ;;  %v2953_v17 = vadd.f32 %v2952_v27, %v2940_v14  ;;  %v2941_v25 = vpop.f32.mrf.mxu3 }
 0x1af   :  { %3316 = vmatpush.bf16.msra.mxu2 %v5410_v62 }
 0x1b0   :  { %3159 = vmatmul.bf16.vlgmr.msra.gmra.mxu0 %v5731_v10  ;;  %3329 = vmatpush.bf16.msra.mxu3 %v5418_v50 }
 0x1b1   :  { %4949 = vmatmul.msk.bf16.vlgmr.msra.gmra.mxu1 %vm2523_vm0, %v5738_v44 }
 0x1b3   :  { %3317 = vmatpush.bf16.msra.mxu2 %v5409_v4 }
 0x1b4   :  { %3330 = vmatpush.bf16.msra.mxu3 %v5417_v51 }
 0x1b5   :  { %v2954_v10 = vpop.f32.mrf.mxu0 }
 0x1b7   :  { %3318 = vmatpush.bf16.msra.mxu2 %v5408_v16 }
 0x1b8   :  { %3331 = vmatpush.bf16.msra.mxu3 %v5416_v38 }
 0x1bb   :  { %3319 = vmatpush.bf16.msra.mxu2 %v5407_v19 }
 0x1bc   :  { %3332 = vmatpush.bf16.msra.mxu3 %v5415_v57 }
 0x1be   :  { %v2965_v24 = vpop.f32.mrf.mxu1 }
 0x1bf   :  { %3320 = vmatpush.bf16.msra.mxu2 %v5406_v23  ;;  %v2966_v29 = vadd.f32 %v2965_v24, %v2953_v17 }
 0x1c0   :  { %3333 = vmatpush.bf16.msra.mxu3 %v5414_v60 }
 0x1c2   :  { %3321 = vmatmul.bf16.vlgmr.msra.gmra.mxu2 %v3179_v15  ;;  %v5432_v15 = vld [vmem:[#allocation10] ss:$0 sm:$0xff] }
 0x1c5   :  { %v2978_v30 = vpop.f32.mrf.mxu2 }
 0x1c6   :  { %v2991_v44 = vpop.f32.mrf.mxu3  ;;  %v2979_v35 = vadd.f32 %v2978_v30, %v2966_v29  ;;  %v2967_v34 = vpop.f32.mrf.mxu1 }
 0x1c8   :  { %v2992_v22 = vadd.f32 %v2991_v44, %v2979_v35  ;;  %v5433_v44 = vld [vmem:[#allocation11] ss:$0 sm:$0xff] }
 0x1cd   :  { %v3004_v33 = vpop.f32.mrf.mxu0  ;;  %v2980_v21 = vpop.f32.mrf.mxu2 }
 0x1ce   :  { %v3005_v36 = vadd.f32 %v3004_v33, %v2992_v22  ;;  %v2993_v18 = vpop.f32.mrf.mxu3  ;;  %v5434_v33 = vld [vmem:[#allocation2] ss:$0 sm:$0xff] }
 0x1d5   :  { %v3006_v11 = vpop.f32.mrf.mxu0 }
 0x1de   :  { %v3017_v5 = vpop.f32.mrf.mxu1 }
 0x1df   :  { %v3018_v41 = vadd.f32 %v3017_v5, %v3005_v36 }
 0x1e5   :  { %v3030_v31 = vpop.f32.mrf.mxu2 }
 0x1e6   :  { %v3043_v40 = vpop.f32.mrf.mxu3  ;;  %v3019_v42 = vpop.f32.mrf.mxu1  ;;  %v3031_v61 = vadd.f32 %v3030_v31, %v3018_v41 }
 0x1e8   :  { %v3044_v48 = vadd.f32 %v3043_v40, %v3031_v61 }
 0x1ed   :  { %v3056_v0 = vpop.f32.mrf.mxu0  ;;  %v3032_v46 = vpop.f32.mrf.mxu2 }
 0x1ee   :  { %v3045_v47 = vpop.f32.mrf.mxu3  ;;  %v3057_v63 = vadd.f32 %v3056_v0, %v3044_v48 }
 0x1f5   :  { %v3058_v6 = vpop.f32.mrf.mxu0 }
 0x1fe   :  { %v3069_v56 = vpop.f32.mrf.mxu1 }
 0x1ff   :  { %v3070_v32 = vadd.f32 %v3069_v56, %v3057_v63 }
 0x205   :  { %v3082_v52 = vpop.f32.mrf.mxu2 }
 0x206   :  { %v3095_v53 = vpop.f32.mrf.mxu3  ;;  %v3071_v54 = vpop.f32.mrf.mxu1  ;;  %v3083_v1 = vadd.f32 %v3082_v52, %v3070_v32 }
 0x208   :  { %v3096_v8 = vadd.f32 %v3095_v53, %v3083_v1 }
 0x20d   :  { %v3108_v55 = vpop.f32.mrf.mxu0  ;;  %v3084_v58 = vpop.f32.mrf.mxu2 }
 0x20e   :  { %v3097_v59 = vpop.f32.mrf.mxu3  ;;  %v3109_v62 = vadd.f32 %v3108_v55, %v3096_v8 }
 0x215   :  { %v3110_v39 = vpop.f32.mrf.mxu0 }
 0x21e   :  { %v3121_v2 = vpop.f32.mrf.mxu1 }
 0x21f   :  { %v3122_v7 = vadd.f32 %v3121_v2, %v3109_v62 }
 0x225   :  { %v3134_v9 = vpop.f32.mrf.mxu2 }
 0x226   :  { %v3147_v4 = vpop.f32.mrf.mxu3  ;;  %v3135_v12 = vadd.f32 %v3134_v9, %v3122_v7  ;;  %v3123_v13 = vpop.f32.mrf.mxu1 }
 0x228   :  { %v3148_v28 = vadd.f32 %v3147_v4, %v3135_v12 }
 0x22d   :  { %v3160_v14 = vpop.f32.mrf.mxu0  ;;  %v3136_v16 = vpop.f32.mrf.mxu2 }
 0x22e   :  { %v3161_v20 = vadd.f32 %v3160_v14, %v3148_v28  ;;  %v3149_v27 = vpop.f32.mrf.mxu3  ;;  %v3173_v17 = vpop.f32.mrf.mxu1 }
 0x230   :  { %v3174_v19 = vadd.f32 %v3173_v17, %v3161_v20 }
 0x232   :  { %v3178_v37 = vmax.f32 %v3174_v19, 0.0 }
 0x234   :  { %v3180_v3 = vpack.c.bf16 %v3178_v37, %v3178_v37 }
 0x235   :  { %v3162_v25 = vpop.f32.mrf.mxu0 }
 0x236   :  { %3334 = vmatmul.bf16.vlgmr.msra.gmra.mxu3 %v3180_v3  ;;  %v3175_v23 = vpop.f32.mrf.mxu1 }
 0x245   :  { %v3322_v26 = vpop.f32.mrf.mxu2 }
 0x246   :  { %v3323_v24 = vadd.f32 %v5432_v15, %v3322_v26 }
 0x24d   :  { %v3324_v10 = vpop.f32.mrf.mxu2 }
 0x2b9   :  { %v3335_v29 = vpop.f32.mrf.mxu3 }
 0x2ba   :  { %v3336_v30 = vadd.f32 %v3335_v29, %v3323_v24 }
 0x2bc   :  { %v3339_v35 = vmax.f32 %v3336_v30, 0.0 }
 0x2be   :  { %v3344_v34 = vmul.f32 %v5433_v44, %v3339_v35 }
 0x2c0   :  { %3345 = vadd.xlane.f32.xlu0 %v3344_v34 }
 0x2c1   :  { %v3337_v22 = vpop.f32.mrf.mxu3 }
 0x333   :  { %v3346_v36 = vpop.xlane.xlu0 %3345 }
 0x334   :  { %v3351_v21 = vadd.f32 %v5434_v33, %v3346_v36 }
 0x336   :  { %v3352_v18 = vsub.f32 0.0, %v3351_v21 }
 0x338   :  { %v3353_v11 = vmul.f32 1.442695, %v3352_v18 }
 0x33a   :  { %5435 = vpow2.f32 %v3353_v11 }
 0x340   :  { %v5436_v5 = vpop.eup %5435 }
 0x341   :  { %v3355_v31 = vadd.f32 1.0, %v5436_v5 }
 0x343   :  { %5437 = vrcp.f32 %v3355_v31  ;;  %v3367_v0 = vand.u32 2147483648, %v3355_v31  ;;  %v3365_v46 = vand.u32 2147483647, %v3355_v31  ;;  %vm3361_vm2 = vweird.f32 %v3355_v31 }
 0x345   :  { %v3368_v6 = vor.u32 1.1754944e-38, %v3367_v0  ;;  %vm3366_vm5 = vcmp.eq.f32.partialorder %v3365_v46, 8.507059e+37 }
 0x349   :  { %v5438_v40 = vpop.eup %5437 }
 0x34a   :  { %v3357_v42 = vmul.f32 %v5438_v40, %v3355_v31  ;;  %vm3362_vm1 = vweird.f32 %v5438_v40 }
 0x34b   :  { %vm3363_vm3 = vmor %vm3361_vm2, %vm3362_vm1 }
 0x34c   :  { %v3358_v43 = vsub.f32 1.0, %v3357_v42 }
 0x34e   :  { %v3359_v45 = vmul.f32 %v5438_v40, %v3358_v43 }
 0x350   :  { %v3360_v47 = vadd.f32 %v5438_v40, %v3359_v45 }
 0x352   :  { %v3364_v49 = vsel %vm3363_vm3, %v5438_v40, %v3360_v47 }
 0x353   :  { %v3369_v50 = vsel %vm3366_vm5, %v3368_v6, %v3364_v49 }
 0x354   :  { %3371 = vst.msk [vmem:[%s5799_s7] sm:$0xff] %vm3370_vm4, %v3369_v50 }
 0x355   :  { %3376 = vsyncpa [#allocation4], 1 }
 0x356   :  { %3377 = vsyncpa [#allocation6], 1 }
 0x357   :  { %3378 = vsyncpa [#allocation9], 1 }
 0x358   :  { %3379 = vsyncpa [#allocation12], 1 }

// kernel: tpu_custom_call.1
= control target key start
LH: loop header
LB: loop body
LE: loop exit
PB: predicated region body
PF: predicated region fallthrough
CT: control target
= control target key end

     0   :  { %s5792_s0 = inlined_call_operand.hbm [shape: f32[8,3136], index: 0, kind: input, shape index: {}]   ;;  %s5793_s1 = inlined_call_operand.hbm [shape: bf16[3136,256], index: 1, kind: input, shape index: {}]   ;;  %s5794_s2 = inlined_call_operand.hbm [shape: f32[1,256], index: 2, kind: input, shape index: {}]   ;;  %s5795_s3 = inlined_call_operand.hbm [shape: bf16[256,128], index: 3, kind: input, shape index: {}]   ;;  %s5796_s4 = inlined_call_operand.hbm [shape: f32[1,128], index: 4, kind: input, shape index: {}]   ;;  %s5797_s5 = inlined_call_operand.hbm [shape: f32[1,128], index: 5, kind: input, shape index: {}]   ;;  %s5798_s6 = inlined_call_operand.<no memory space> [shape: f32[1,1], index: 6, kind: input, shape index: {}]   ;;  %s5799_s7 = inlined_call_operand.vmem [shape: f32[8,1], index: 7, kind: output, shape index: {}]  }
   0x1   :  { %v12_v0 = vstv %s5798_s6 }
   0x2   :  { %13 = vst [vmem:[#allocation2] sm:$0x1] %v12_v0 }
   0x3   :  { %14 = vsyncpa [#allocation4], 0 }
   0x4   :  { %15 = vsyncpa [#allocation6], 0 }
   0x5   :  { %16 = vsyncpa [#allocation9], 0  ;;  %s33_s28 = sshll.u32 %s5793_s1, 4  ;;  %s34_s28 = int_to_ptr.hbm [resolvable:$true] %s33_s28 }
   0x6   :  { %17 = vsyncpa [#allocation12], 0  ;;  %s5592_s29 = smov [#allocation5]   ;;  %s57_s10 = sshll.u32 %s5795_s3, 4  ;;  %s58_s10 = int_to_ptr.hbm [resolvable:$true] %s57_s10 }
   0x7   :  { %s35_s30 = sshll.u32 %s5592_s29, 4  ;;  %s5593_s11 = smov 128   ;;  %s36_s30 = int_to_ptr.vmem [resolvable:$true] %s35_s30 }
   0x8   :  { %s5594_s12 = smov 8   ;;  %s5595_s6 = smov [#allocation8]  }
   0x9   :  { %41 = dma.hbm_to_vmem [thread:$0]  %s34_s28, 50176, %s36_s30, [#allocation6], %s5593_s11, %s5593_s11, %s5594_s12  }
   0xa   :  { %s59_s13 = sshll.u32 %s5595_s6, 4  ;;  %s5596_s14 = smov 64   ;;  %s60_s13 = int_to_ptr.vmem [resolvable:$true] %s59_s13 }
   0xb   :  { %s5597_s15 = smov 4   ;;  %s23_s17 = sshll.u32 %s5792_s0, 4  ;;  %s24_s17 = int_to_ptr.hbm [resolvable:$true] %s23_s17 }
   0xc   :  { %65 = dma.hbm_to_vmem [thread:$0]  %s58_s10, 2048, %s60_s13, [#allocation9], %s5596_s14, %s5596_s14, %s5597_s15  }
   0xd   :  { %s5598_s18 = smov [#allocation3]   ;;  %s47_s21 = sshll.u32 %s5794_s2, 4  ;;  %s48_s21 = int_to_ptr.hbm [resolvable:$true] %s47_s21 }
   0xe   :  { %s25_s19 = sshll.u32 %s5598_s18, 4  ;;  %s5599_s22 = smov [#allocation7]   ;;  %s26_s19 = int_to_ptr.vmem [resolvable:$true] %s25_s19 }
   0xf   :  { %28 = dma.hbm_to_vmem [thread:$0]  %s24_s17, 3200, %s26_s19, [#allocation4]  }
  0x10   :  { %s49_s23 = sshll.u32 %s5599_s22, 4  ;;  %s71_s26 = sshll.u32 %s5796_s4, 4  ;;  %s50_s23 = int_to_ptr.vmem [resolvable:$true] %s49_s23  ;;  %s72_s26 = int_to_ptr.hbm [resolvable:$true] %s71_s26 }
  0x11   :  { %52 = dma.hbm_to_vmem [thread:$0]  %s48_s21, 32, %s50_s23, [#allocation6]  }
  0x12   :  { %s82_s28 = sshll.u32 %s5797_s5, 4  ;;  %s5600_s29 = smov [#allocation10]   ;;  %s83_s28 = int_to_ptr.hbm [resolvable:$true] %s82_s28 }
  0x13   :  { %s73_s30 = sshll.u32 %s5600_s29, 4  ;;  %s5601_s2 = smov [#allocation11]   ;;  %s74_s30 = int_to_ptr.vmem [resolvable:$true] %s73_s30 }
  0x14   :  { %76 = dma.hbm_to_vmem [thread:$0]  %s72_s26, 16, %s74_s30, [#allocation9]  }
  0x15   :  { %s84_s8 = sshll.u32 %s5601_s2, 4  ;;  %s85_s8 = int_to_ptr.vmem [resolvable:$true] %s84_s8 }
  0x16   :  { %87 = dma.hbm_to_vmem [thread:$0]  %s83_s28, 16, %s85_s8, [#allocation12]  }
  0x17   :  { %5584 = dma.done.wait [#allocation4], 3200  }
  0x18   :  { %5585 = vsyncadd [#allocation4], 4294964096 }
  0x19   :  { %5586 = dma.done.wait [#allocation6], 50208  }
  0x1a   :  { %5587 = vsyncadd [#allocation6], 4294917088 }
  0x1b   :  { %5588 = dma.done.wait [#allocation9], 2064  }
  0x1c   :  { %5589 = vsyncadd [#allocation9], 4294965232 }
  0x1d   :  { %5590 = dma.done.wait [#allocation12], 16  }
  0x1e   :  { %5591 = vsyncadd [#allocation12], 4294967280  ;;  %v3438_v1 = vld [vmem:[#allocation5 + $0x70] sm:$0xf]  ;;  %v5029_v2 = vld [vmem:[#allocation5 + $0x74] sm:$0xf0] }
  0x1f   :  { %v3502_v3 = vld [vmem:[#allocation5 + $0xf0] sm:$0xf]  ;;  %v3439_v4 = vor.u32 %v5029_v2, %v3438_v1  ;;  %v5045_v5 = vld [vmem:[#allocation5 + $0xf4] sm:$0xf0]  ;;  %v3430_v12 = vld [vmem:[#allocation5 + $0x60] sm:$0xf] }
  0x20   :  { %v3566_v6 = vld [vmem:[#allocation5 + $0x170] sm:$0xf]  ;;  %v5061_v7 = vld [vmem:[#allocation5 + $0x174] sm:$0xf0]  ;;  %v3503_v8 = vor.u32 %v5045_v5, %v3502_v3  ;;  %v5027_v14 = vld [vmem:[#allocation5 + $0x64] sm:$0xf0] }
  0x21   :  { %v3567_v9 = vor.u32 %v5061_v7, %v3566_v6  ;;  %v3630_v10 = vld [vmem:[#allocation5 + $0x1f0] sm:$0xf]  ;;  %v5077_v11 = vld [vmem:[#allocation5 + $0x1f4] sm:$0xf0]  ;;  %2527 = vmatpush.bf16.msra.mxu0 %v3439_v4  ;;  %v3494_v15 = vld [vmem:[#allocation5 + $0xe0] sm:$0xf]  ;;  %v3431_v17 = vor.u32 %v5027_v14, %v3430_v12 }
  0x22   :  { %v3631_v13 = vor.u32 %v5077_v11, %v3630_v10  ;;  %v5043_v16 = vld [vmem:[#allocation5 + $0xe4] sm:$0xf0]  ;;  %2540 = vmatpush.bf16.msra.mxu1 %v3503_v8  ;;  %v3558_v19 = vld [vmem:[#allocation5 + $0x160] sm:$0xf]  ;;  %v3422_v24 = vld [vmem:[#allocation5 + $0x50] sm:$0xf] }
  0x23   :  { %2553 = vmatpush.bf16.msra.mxu2 %v3567_v9  ;;  %v3495_v18 = vor.u32 %v5043_v16, %v3494_v15  ;;  %v5059_v20 = vld [vmem:[#allocation5 + $0x164] sm:$0xf0]  ;;  %v3622_v21 = vld [vmem:[#allocation5 + $0x1e0] sm:$0xf]  ;;  %v5025_v25 = vld [vmem:[#allocation5 + $0x54] sm:$0xf0] }
  0x24   :  { %2566 = vmatpush.bf16.msra.mxu3 %v3631_v13  ;;  %v3559_v22 = vor.u32 %v5059_v20, %v3558_v19  ;;  %v5075_v23 = vld [vmem:[#allocation5 + $0x1e4] sm:$0xf0]  ;;  %v3486_v27 = vld [vmem:[#allocation5 + $0xd0] sm:$0xf]  ;;  %v5041_v28 = vld [vmem:[#allocation5 + $0xd4] sm:$0xf0]  ;;  %v3423_v30 = vor.u32 %v5025_v25, %v3422_v24 }
  0x25   :  { %v3623_v26 = vor.u32 %v5075_v23, %v3622_v21  ;;  %v3550_v29 = vld [vmem:[#allocation5 + $0x150] sm:$0xf]  ;;  %2528 = vmatpush.bf16.msra.mxu0 %v3431_v17  ;;  %v5057_v31 = vld [vmem:[#allocation5 + $0x154] sm:$0xf0]  ;;  %v3487_v34 = vor.u32 %v5041_v28, %v3486_v27  ;;  %v3414_v36 = vld [vmem:[#allocation5 + $0x40] sm:$0xf] }
  0x26   :  { %v3614_v32 = vld [vmem:[#allocation5 + $0x1d0] sm:$0xf]  ;;  %v5073_v33 = vld [vmem:[#allocation5 + $0x1d4] sm:$0xf0]  ;;  %2541 = vmatpush.bf16.msra.mxu1 %v3495_v18  ;;  %v3551_v35 = vor.u32 %v5057_v31, %v3550_v29  ;;  %v5023_v37 = vld [vmem:[#allocation5 + $0x44] sm:$0xf0] }
  0x27   :  { %2554 = vmatpush.bf16.msra.mxu2 %v3559_v22  ;;  %v3478_v38 = vld [vmem:[#allocation5 + $0xc0] sm:$0xf]  ;;  %v3615_v39 = vor.u32 %v5073_v33, %v3614_v32  ;;  %v5039_v40 = vld [vmem:[#allocation5 + $0xc4] sm:$0xf0]  ;;  %v3415_v45 = vor.u32 %v5023_v37, %v3414_v36  ;;  %v3406_v48 = vld [vmem:[#allocation5 + $0x30] sm:$0xf] }
  0x28   :  { %2567 = vmatpush.bf16.msra.mxu3 %v3623_v26  ;;  %v3542_v41 = vld [vmem:[#allocation5 + $0x140] sm:$0xf]  ;;  %v5055_v42 = vld [vmem:[#allocation5 + $0x144] sm:$0xf0]  ;;  %v3479_v46 = vor.u32 %v5039_v40, %v3478_v38  ;;  %v5021_v49 = vld [vmem:[#allocation5 + $0x34] sm:$0xf0] }
  0x29   :  { %v3606_v43 = vld [vmem:[#allocation5 + $0x1c0] sm:$0xf]  ;;  %v5071_v44 = vld [vmem:[#allocation5 + $0x1c4] sm:$0xf0]  ;;  %2529 = vmatpush.bf16.msra.mxu0 %v3423_v30  ;;  %v3543_v47 = vor.u32 %v5055_v42, %v3542_v41  ;;  %v3470_v50 = vld [vmem:[#allocation5 + $0xb0] sm:$0xf]  ;;  %v3407_v57 = vor.u32 %v5021_v49, %v3406_v48 }
  0x2a   :  { %2542 = vmatpush.bf16.msra.mxu1 %v3487_v34  ;;  %v3607_v51 = vor.u32 %v5071_v44, %v3606_v43  ;;  %v5037_v52 = vld [vmem:[#allocation5 + $0xb4] sm:$0xf0]  ;;  %v3534_v53 = vld [vmem:[#allocation5 + $0x130] sm:$0xf]  ;;  %v3398_v60 = vld [vmem:[#allocation5 + $0x20] sm:$0xf] }
  0x2b   :  { %2555 = vmatpush.bf16.msra.mxu2 %v3551_v35  ;;  %v5053_v54 = vld [vmem:[#allocation5 + $0x134] sm:$0xf0]  ;;  %v3598_v55 = vld [vmem:[#allocation5 + $0x1b0] sm:$0xf]  ;;  %v3471_v58 = vor.u32 %v5037_v52, %v3470_v50  ;;  %v5019_v61 = vld [vmem:[#allocation5 + $0x24] sm:$0xf0] }
  0x2c   :  { %2568 = vmatpush.bf16.msra.mxu3 %v3615_v39  ;;  %v5069_v56 = vld [vmem:[#allocation5 + $0x1b4] sm:$0xf0]  ;;  %v3535_v59 = vor.u32 %v5053_v54, %v3534_v53  ;;  %v3462_v62 = vld [vmem:[#allocation5 + $0xa0] sm:$0xf]  ;;  %v5035_v0 = vld [vmem:[#allocation5 + $0xa4] sm:$0xf0]  ;;  %v3399_v5 = vor.u32 %v5019_v61, %v3398_v60 }
  0x2d   :  { %2530 = vmatpush.bf16.msra.mxu0 %v3415_v45  ;;  %v3599_v63 = vor.u32 %v5069_v56, %v3598_v55  ;;  %v3526_v1 = vld [vmem:[#allocation5 + $0x120] sm:$0xf]  ;;  %v5051_v2 = vld [vmem:[#allocation5 + $0x124] sm:$0xf0]  ;;  %v3463_v6 = vor.u32 %v5035_v0, %v3462_v62  ;;  %v3390_v8 = vld [vmem:[#allocation5 + $0x10] sm:$0xf] }
  0x2e   :  { %2543 = vmatpush.bf16.msra.mxu1 %v3479_v46  ;;  %v3590_v3 = vld [vmem:[#allocation5 + $0x1a0] sm:$0xf]  ;;  %v5067_v4 = vld [vmem:[#allocation5 + $0x1a4] sm:$0xf0]  ;;  %v3527_v7 = vor.u32 %v5051_v2, %v3526_v1  ;;  %v5017_v9 = vld [vmem:[#allocation5 + $0x14] sm:$0xf0] }
  0x2f   :  { %2556 = vmatpush.bf16.msra.mxu2 %v3543_v47  ;;  %v3454_v10 = vld [vmem:[#allocation5 + $0x90] sm:$0xf]  ;;  %v3591_v11 = vor.u32 %v5067_v4, %v3590_v3  ;;  %v5033_v12 = vld [vmem:[#allocation5 + $0x94] sm:$0xf0]  ;;  %v3391_v17 = vor.u32 %v5017_v9, %v3390_v8  ;;  %v3382_v18 = vld [vmem:[#allocation5] sm:$0xf] }
  0x30   :  { %2569 = vmatpush.bf16.msra.mxu3 %v3607_v51  ;;  %v3518_v13 = vld [vmem:[#allocation5 + $0x110] sm:$0xf]  ;;  %v5049_v14 = vld [vmem:[#allocation5 + $0x114] sm:$0xf0]  ;;  %v5015_v19 = vld [vmem:[#allocation5 + $0x4] sm:$0xf0]  ;;  %v3455_v20 = vor.u32 %v5033_v12, %v3454_v10 }
  0x31   :  { %2531 = vmatpush.bf16.msra.mxu0 %v3407_v57  ;;  %v3582_v15 = vld [vmem:[#allocation5 + $0x190] sm:$0xf]  ;;  %v5065_v16 = vld [vmem:[#allocation5 + $0x194] sm:$0xf0]  ;;  %v3519_v21 = vor.u32 %v5049_v14, %v3518_v13  ;;  %v3446_v22 = vld [vmem:[#allocation5 + $0x80] sm:$0xf]  ;;  %v3383_v32 = vor.u32 %v5015_v19, %v3382_v18 }
  0x32   :  { %2544 = vmatpush.bf16.msra.mxu1 %v3471_v58  ;;  %v5031_v23 = vld [vmem:[#allocation5 + $0x84] sm:$0xf0]  ;;  %v3510_v24 = vld [vmem:[#allocation5 + $0x100] sm:$0xf]  ;;  %v3583_v25 = vor.u32 %v5065_v16, %v3582_v15  ;;  %v3694_v29 = vld [vmem:[#allocation5 + $0x270] sm:$0xf] }
  0x33   :  { %2557 = vmatpush.bf16.msra.mxu2 %v3535_v59  ;;  %v5047_v26 = vld [vmem:[#allocation5 + $0x104] sm:$0xf0]  ;;  %v3574_v27 = vld [vmem:[#allocation5 + $0x180] sm:$0xf]  ;;  %v5093_v30 = vld [vmem:[#allocation5 + $0x274] sm:$0xf0]  ;;  %v3447_v36 = vor.u32 %v5031_v23, %v3446_v22 }
  0x34   :  { %2570 = vmatpush.bf16.msra.mxu3 %v3599_v63  ;;  %v5063_v28 = vld [vmem:[#allocation5 + $0x184] sm:$0xf0]  ;;  %v3758_v31 = vld [vmem:[#allocation5 + $0x2f0] sm:$0xf]  ;;  %v5109_v33 = vld [vmem:[#allocation5 + $0x2f4] sm:$0xf0]  ;;  %v3511_v37 = vor.u32 %v5047_v26, %v3510_v24  ;;  %v3695_v41 = vor.u32 %v5093_v30, %v3694_v29 }
  0x35   :  { %2532 = vmatpush.bf16.msra.mxu0 %v3399_v5  ;;  %v3822_v34 = vld [vmem:[#allocation5 + $0x370] sm:$0xf]  ;;  %v5125_v35 = vld [vmem:[#allocation5 + $0x374] sm:$0xf0]  ;;  %v3575_v40 = vor.u32 %v5063_v28, %v3574_v27  ;;  %v3759_v42 = vor.u32 %v5109_v33, %v3758_v31  ;;  %v3686_v44 = vld [vmem:[#allocation5 + $0x260] sm:$0xf] }
  0x36   :  { %2545 = vmatpush.bf16.msra.mxu1 %v3463_v6  ;;  %v3886_v38 = vld [vmem:[#allocation5 + $0x3f0] sm:$0xf]  ;;  %v5141_v39 = vld [vmem:[#allocation5 + $0x3f4] sm:$0xf0]  ;;  %v3823_v43 = vor.u32 %v5125_v35, %v3822_v34  ;;  %v5091_v45 = vld [vmem:[#allocation5 + $0x264] sm:$0xf0] }
  0x37   :  { %2558 = vmatpush.bf16.msra.mxu2 %v3527_v7  ;;  %v3750_v46 = vld [vmem:[#allocation5 + $0x2e0] sm:$0xf]  ;;  %v3887_v47 = vor.u32 %v5141_v39, %v3886_v38  ;;  %v5107_v48 = vld [vmem:[#allocation5 + $0x2e4] sm:$0xf0]  ;;  %v3687_v53 = vor.u32 %v5091_v45, %v3686_v44  ;;  %v3678_v54 = vld [vmem:[#allocation5 + $0x250] sm:$0xf] }
  0x38   :  { %2571 = vmatpush.bf16.msra.mxu3 %v3591_v11  ;;  %v3814_v49 = vld [vmem:[#allocation5 + $0x360] sm:$0xf]  ;;  %v5123_v50 = vld [vmem:[#allocation5 + $0x364] sm:$0xf0]  ;;  %v5089_v55 = vld [vmem:[#allocation5 + $0x254] sm:$0xf0]  ;;  %v3751_v57 = vor.u32 %v5107_v48, %v3750_v46 }
  0x39   :  { %2533 = vmatpush.bf16.msra.mxu0 %v3391_v17  ;;  %v3878_v51 = vld [vmem:[#allocation5 + $0x3e0] sm:$0xf]  ;;  %v5139_v52 = vld [vmem:[#allocation5 + $0x3e4] sm:$0xf0]  ;;  %v3742_v56 = vld [vmem:[#allocation5 + $0x2d0] sm:$0xf]  ;;  %v3815_v58 = vor.u32 %v5123_v50, %v3814_v49  ;;  %v3679_v7 = vor.u32 %v5089_v55, %v3678_v54 }
  0x3a   :  { %2546 = vmatpush.bf16.msra.mxu1 %v3455_v20  ;;  %v5105_v59 = vld [vmem:[#allocation5 + $0x2d4] sm:$0xf0]  ;;  %v3806_v60 = vld [vmem:[#allocation5 + $0x350] sm:$0xf]  ;;  %v117_v61 = vld [vmem:[#allocation3 + $0x10] sm:$0xff]  ;;  %v3879_v62 = vor.u32 %v5139_v52, %v3878_v51  ;;  %vm2523_vm0 = vcmask 523264  }
  0x3b   :  { %2559 = vmatpush.bf16.msra.mxu2 %v3519_v21  ;;  %v5121_v63 = vld [vmem:[#allocation5 + $0x354] sm:$0xf0]  ;;  %v5663_v0 = vpack.c.bf16 %v117_v61, %v117_v61  ;;  %v118_v2 = vld [vmem:[#allocation3 + $0x18] sm:$0xff]  ;;  %v3670_v8 = vld [vmem:[#allocation5 + $0x240] sm:$0xf]  ;;  %v3743_v9 = vor.u32 %v5105_v59, %v3742_v56  ;;  %vm3370_vm4 = vcmask 7168  }
  0x3c   :  { %2572 = vmatpush.bf16.msra.mxu3 %v3583_v25  ;;  %v115_v1 = vld [vmem:[#allocation3] sm:$0xff]  ;;  %v3870_v3 = vld [vmem:[#allocation5 + $0x3d0] sm:$0xf]  ;;  %v5667_v6 = vpack.c.bf16 %v118_v2, %v118_v2  ;;  %v3807_v10 = vor.u32 %v5121_v63, %v3806_v60  ;;  %v5087_v11 = vld [vmem:[#allocation5 + $0x244] sm:$0xf0] }
  0x3d   :  { %2534 = vmatpush.bf16.msra.mxu0 %v3383_v32  ;;  %v5137_v4 = vld [vmem:[#allocation5 + $0x3d4] sm:$0xf0]  ;;  %v5665_v5 = vpack.c.bf16 %v115_v1, %v115_v1  ;;  %v3734_v12 = vld [vmem:[#allocation5 + $0x2c0] sm:$0xf]  ;;  %v5103_v15 = vld [vmem:[#allocation5 + $0x2c4] sm:$0xf0]  ;;  %v3671_v21 = vor.u32 %v5087_v11, %v3670_v8 }
  0x3e   :  { %2547 = vmatpush.bf16.msra.mxu1 %v3447_v36  ;;  %v116_v13 = vld [vmem:[#allocation3 + $0x8] sm:$0xff]  ;;  %v3871_v14 = vor.u32 %v5137_v4, %v3870_v3  ;;  %v5119_v17 = vld [vmem:[#allocation5 + $0x344] sm:$0xf0]  ;;  %v3735_v22 = vor.u32 %v5103_v15, %v3734_v12  ;;  %v3662_v24 = vld [vmem:[#allocation5 + $0x230] sm:$0xf] }
  0x3f   :  { %2560 = vmatpush.bf16.msra.mxu2 %v3511_v37  ;;  %v3798_v16 = vld [vmem:[#allocation5 + $0x340] sm:$0xf]  ;;  %v5671_v18 = vpack.c.bf16 %v116_v13, %v116_v13  ;;  %v5135_v20 = vld [vmem:[#allocation5 + $0x3c4] sm:$0xf0]  ;;  %v5085_v25 = vld [vmem:[#allocation5 + $0x234] sm:$0xf0] }
  0x40   :  { %2573 = vmatpush.bf16.msra.mxu3 %v3575_v40  ;;  %2535 = vmatmul.bf16.vlgmr.msra.gmra.mxu0 %v5665_v5  ;;  %v3862_v19 = vld [vmem:[#allocation5 + $0x3c0] sm:$0xf]  ;;  %v3799_v23 = vor.u32 %v5119_v17, %v3798_v16  ;;  %v3726_v26 = vld [vmem:[#allocation5 + $0x2b0] sm:$0xf]  ;;  %v5101_v28 = vld [vmem:[#allocation5 + $0x2b4] sm:$0xf0]  ;;  %v3663_v33 = vor.u32 %v5085_v25, %v3662_v24 }
  0x41   :  { %2579 = vmatpush.bf16.msrb.mxu0 %v3695_v41  ;;  %2548 = vmatmul.bf16.vlgmr.msra.gmra.mxu1 %v5671_v18  ;;  %v3863_v27 = vor.u32 %v5135_v20, %v3862_v19  ;;  %v3790_v29 = vld [vmem:[#allocation5 + $0x330] sm:$0xf]  ;;  %v5117_v30 = vld [vmem:[#allocation5 + $0x334] sm:$0xf0]  ;;  %v3727_v34 = vor.u32 %v5101_v28, %v3726_v26  ;;  %v3654_v36 = vld [vmem:[#allocation5 + $0x220] sm:$0xf] }
  0x42   :  { %2592 = vmatpush.bf16.msrb.mxu1 %v3759_v42  ;;  %2561 = vmatmul.bf16.vlgmr.msra.gmra.mxu2 %v5663_v0  ;;  %v3854_v31 = vld [vmem:[#allocation5 + $0x3b0] sm:$0xf]  ;;  %v5133_v32 = vld [vmem:[#allocation5 + $0x3b4] sm:$0xf0]  ;;  %v3791_v35 = vor.u32 %v5117_v30, %v3790_v29  ;;  %v5083_v37 = vld [vmem:[#allocation5 + $0x224] sm:$0xf0] }
  0x43   :  { %2605 = vmatpush.bf16.msrb.mxu2 %v3823_v43  ;;  %2574 = vmatmul.bf16.vlgmr.msra.gmra.mxu3 %v5667_v6  ;;  %v3718_v38 = vld [vmem:[#allocation5 + $0x2a0] sm:$0xf]  ;;  %v3855_v39 = vor.u32 %v5133_v32, %v3854_v31  ;;  %v5099_v40 = vld [vmem:[#allocation5 + $0x2a4] sm:$0xf0]  ;;  %v3655_v45 = vor.u32 %v5083_v37, %v3654_v36  ;;  %v3646_v48 = vld [vmem:[#allocation5 + $0x210] sm:$0xf] }
  0x44   :  { %2618 = vmatpush.bf16.msrb.mxu3 %v3887_v47  ;;  %v3782_v41 = vld [vmem:[#allocation5 + $0x320] sm:$0xf]  ;;  %v5115_v42 = vld [vmem:[#allocation5 + $0x324] sm:$0xf0]  ;;  %v3719_v46 = vor.u32 %v5099_v40, %v3718_v38  ;;  %v5081_v49 = vld [vmem:[#allocation5 + $0x214] sm:$0xf0] }
  0x45   :  { %2580 = vmatpush.bf16.msrb.mxu0 %v3687_v53  ;;  %v3846_v43 = vld [vmem:[#allocation5 + $0x3a0] sm:$0xf]  ;;  %v5131_v44 = vld [vmem:[#allocation5 + $0x3a4] sm:$0xf0]  ;;  %v3783_v47 = vor.u32 %v5115_v42, %v3782_v41  ;;  %v3710_v50 = vld [vmem:[#allocation5 + $0x290] sm:$0xf] }
  0x46   :  { %2593 = vmatpush.bf16.msrb.mxu1 %v3751_v57  ;;  %v3847_v51 = vor.u32 %v5131_v44, %v3846_v43  ;;  %v5097_v52 = vld [vmem:[#allocation5 + $0x294] sm:$0xf0]  ;;  %v3774_v53 = vld [vmem:[#allocation5 + $0x310] sm:$0xf]  ;;  %v3647_v57 = vor.u32 %v5081_v49, %v3646_v48  ;;  %v5079_v59 = vld [vmem:[#allocation5 + $0x204] sm:$0xf0] }
  0x47   :  { %2606 = vmatpush.bf16.msrb.mxu2 %v3815_v58  ;;  %v5113_v54 = vld [vmem:[#allocation5 + $0x314] sm:$0xf0]  ;;  %v3838_v55 = vld [vmem:[#allocation5 + $0x390] sm:$0xf]  ;;  %v3638_v58 = vld [vmem:[#allocation5 + $0x200] sm:$0xf]  ;;  %v3711_v60 = vor.u32 %v5097_v52, %v3710_v50 }
  0x48   :  { %2619 = vmatpush.bf16.msrb.mxu3 %v3879_v62  ;;  %v5129_v56 = vld [vmem:[#allocation5 + $0x394] sm:$0xf0]  ;;  %v3775_v61 = vor.u32 %v5113_v54, %v3774_v53  ;;  %v3702_v62 = vld [vmem:[#allocation5 + $0x280] sm:$0xf]  ;;  %v5095_v63 = vld [vmem:[#allocation5 + $0x284] sm:$0xf0]  ;;  %v3639_v11 = vor.u32 %v5079_v59, %v3638_v58 }
  0x49   :  { %2581 = vmatpush.bf16.msrb.mxu0 %v3679_v7  ;;  %v3766_v1 = vld [vmem:[#allocation5 + $0x300] sm:$0xf]  ;;  %v3839_v2 = vor.u32 %v5129_v56, %v3838_v55  ;;  %v5111_v3 = vld [vmem:[#allocation5 + $0x304] sm:$0xf0]  ;;  %v3950_v8 = vld [vmem:[#allocation5 + $0x470] sm:$0xf]  ;;  %v3703_v15 = vor.u32 %v5095_v63, %v3702_v62 }
  0x4a   :  { %2594 = vmatpush.bf16.msrb.mxu1 %v3743_v9  ;;  %v3830_v4 = vld [vmem:[#allocation5 + $0x380] sm:$0xf]  ;;  %v5127_v7 = vld [vmem:[#allocation5 + $0x384] sm:$0xf0]  ;;  %v5157_v9 = vld [vmem:[#allocation5 + $0x474] sm:$0xf0]  ;;  %v3767_v16 = vor.u32 %v5111_v3, %v3766_v1 }
  0x4b   :  { %2607 = vmatpush.bf16.msrb.mxu2 %v3807_v10  ;;  %v4014_v10 = vld [vmem:[#allocation5 + $0x4f0] sm:$0xf]  ;;  %v5173_v12 = vld [vmem:[#allocation5 + $0x4f4] sm:$0xf0]  ;;  %v121_v20 = vld [vmem:[#allocation3 + $0x30] sm:$0xff] }
  0x4c   :  { %2620 = vmatpush.bf16.msrb.mxu3 %v3871_v14  ;;  %v4078_v13 = vld [vmem:[#allocation5 + $0x570] sm:$0xf]  ;;  %v5189_v14 = vld [vmem:[#allocation5 + $0x574] sm:$0xf0]  ;;  %v4015_v26 = vor.u32 %v5173_v12, %v4014_v10  ;;  %v5155_v28 = vld [vmem:[#allocation5 + $0x464] sm:$0xf0]  ;;  %v5675_v32 = vpack.c.bf16 %v121_v20, %v121_v20 }
  0x4d   :  { %2582 = vmatpush.bf16.msrb.mxu0 %v3671_v21  ;;  %v4142_v17 = vld [vmem:[#allocation5 + $0x5f0] sm:$0xf]  ;;  %v5205_v19 = vld [vmem:[#allocation5 + $0x5f4] sm:$0xf0]  ;;  %v3831_v21 = vor.u32 %v5127_v7, %v3830_v4  ;;  %v4006_v29 = vld [vmem:[#allocation5 + $0x4e0] sm:$0xf] }
  0x4e   :  { %2595 = vmatpush.bf16.msrb.mxu1 %v3735_v22  ;;  %v3951_v22 = vor.u32 %v5157_v9, %v3950_v8  ;;  %v119_v24 = vld [vmem:[#allocation3 + $0x20] sm:$0xff]  ;;  %v122_v25 = vld [vmem:[#allocation3 + $0x38] sm:$0xff]  ;;  %v120_v30 = vld [vmem:[#allocation3 + $0x28] sm:$0xff]  ;;  %v4143_v31 = vor.u32 %v5205_v19, %v4142_v17 }
  0x4f   :  { %2608 = vmatpush.bf16.msrb.mxu2 %v3799_v23  ;;  %v3942_v23 = vld [vmem:[#allocation5 + $0x460] sm:$0xf]  ;;  %v5203_v37 = vld [vmem:[#allocation5 + $0x5e4] sm:$0xf0]  ;;  %v5677_v38 = vpack.c.bf16 %v119_v24, %v119_v24  ;;  %v5681_v41 = vpack.c.bf16 %v120_v30, %v120_v30  ;;  %v3934_v44 = vld [vmem:[#allocation5 + $0x450] sm:$0xf] }
  0x50   :  { %2621 = vmatpush.bf16.msrb.mxu3 %v3863_v27  ;;  %v4079_v27 = vor.u32 %v5189_v14, %v4078_v13  ;;  %v4134_v36 = vld [vmem:[#allocation5 + $0x5e0] sm:$0xf]  ;;  %v3943_v40 = vor.u32 %v5155_v28, %v3942_v23  ;;  %v5169_v48 = vld [vmem:[#allocation5 + $0x4d4] sm:$0xf0]  ;;  %v4062_v49 = vld [vmem:[#allocation5 + $0x550] sm:$0xf] }
  0x51   :  { %2583 = vmatpush.bf16.msrb.mxu0 %v3663_v33  ;;  %v5171_v33 = vld [vmem:[#allocation5 + $0x4e4] sm:$0xf0]  ;;  %v5185_v50 = vld [vmem:[#allocation5 + $0x554] sm:$0xf0]  ;;  %v3926_v56 = vld [vmem:[#allocation5 + $0x440] sm:$0xf] }
  0x52   :  { %2596 = vmatpush.bf16.msrb.mxu1 %v3727_v34  ;;  %v4070_v34 = vld [vmem:[#allocation5 + $0x560] sm:$0xf]  ;;  %v4007_v42 = vor.u32 %v5171_v33, %v4006_v29  ;;  %v5201_v52 = vld [vmem:[#allocation5 + $0x5d4] sm:$0xf0]  ;;  %v4063_v55 = vor.u32 %v5185_v50, %v4062_v49  ;;  %v5183_v62 = vld [vmem:[#allocation5 + $0x544] sm:$0xf0] }
  0x53   :  { %2609 = vmatpush.bf16.msrb.mxu2 %v3791_v35  ;;  %v5187_v35 = vld [vmem:[#allocation5 + $0x564] sm:$0xf0]  ;;  %v3990_v58 = vld [vmem:[#allocation5 + $0x4c0] sm:$0xf]  ;;  %v3918_v7 = vld [vmem:[#allocation5 + $0x430] sm:$0xf] }
  0x54   :  { %2622 = vmatpush.bf16.msrb.mxu3 %v3855_v39  ;;  %v5679_v39 = vpack.c.bf16 %v122_v25, %v122_v25  ;;  %v4071_v43 = vor.u32 %v5187_v35, %v4070_v34  ;;  %v4118_v63 = vld [vmem:[#allocation5 + $0x5c0] sm:$0xf]  ;;  %v5199_v1 = vld [vmem:[#allocation5 + $0x5c4] sm:$0xf0]  ;;  %v5149_v8 = vld [vmem:[#allocation5 + $0x434] sm:$0xf0] }
  0x55   :  { %2584 = vmatpush.bf16.msrb.mxu0 %v3655_v45  ;;  %v5153_v45 = vld [vmem:[#allocation5 + $0x454] sm:$0xf0]  ;;  %v3982_v9 = vld [vmem:[#allocation5 + $0x4b0] sm:$0xf]  ;;  %v4119_v10 = vor.u32 %v5199_v1, %v4118_v63  ;;  %v3910_v20 = vld [vmem:[#allocation5 + $0x420] sm:$0xf] }
  0x56   :  { %2597 = vmatpush.bf16.msrb.mxu1 %v3719_v46  ;;  %v3998_v46 = vld [vmem:[#allocation5 + $0x4d0] sm:$0xf]  ;;  %v3935_v53 = vor.u32 %v5153_v45, %v3934_v44  ;;  %v5181_v13 = vld [vmem:[#allocation5 + $0x534] sm:$0xf0]  ;;  %v5163_v24 = vld [vmem:[#allocation5 + $0x4a4] sm:$0xf0] }
  0x57   :  { %2610 = vmatpush.bf16.msrb.mxu2 %v3783_v47  ;;  %v4135_v47 = vor.u32 %v5203_v37, %v4134_v36  ;;  %v3999_v54 = vor.u32 %v5169_v48, %v3998_v46  ;;  %v4046_v12 = vld [vmem:[#allocation5 + $0x530] sm:$0xf]  ;;  %v4038_v25 = vld [vmem:[#allocation5 + $0x520] sm:$0xf]  ;;  %v5195_v28 = vld [vmem:[#allocation5 + $0x5a4] sm:$0xf0] }
  0x58   :  { %2623 = vmatpush.bf16.msrb.mxu3 %v3847_v51  ;;  %v4126_v51 = vld [vmem:[#allocation5 + $0x5d0] sm:$0xf]  ;;  %v4047_v19 = vor.u32 %v5181_v13, %v4046_v12  ;;  %v5145_v34 = vld [vmem:[#allocation5 + $0x414] sm:$0xf0]  ;;  %v3894_v45 = vld [vmem:[#allocation5 + $0x400] sm:$0xf] }
  0x59   :  { %2585 = vmatpush.bf16.msrb.mxu0 %v3647_v57  ;;  %v5151_v57 = vld [vmem:[#allocation5 + $0x444] sm:$0xf0]  ;;  %v4127_v59 = vor.u32 %v5201_v52, %v4126_v51  ;;  %v4110_v14 = vld [vmem:[#allocation5 + $0x5b0] sm:$0xf]  ;;  %v5161_v37 = vld [vmem:[#allocation5 + $0x494] sm:$0xf0] }
  0x5a   :  { %2598 = vmatpush.bf16.msrb.mxu1 %v3711_v60  ;;  %v5167_v60 = vld [vmem:[#allocation5 + $0x4c4] sm:$0xf0]  ;;  %v3902_v33 = vld [vmem:[#allocation5 + $0x410] sm:$0xf]  ;;  %v5193_v44 = vld [vmem:[#allocation5 + $0x594] sm:$0xf0] }
  0x5b   :  { %2611 = vmatpush.bf16.msrb.mxu2 %v3775_v61  ;;  %v4054_v61 = vld [vmem:[#allocation5 + $0x540] sm:$0xf]  ;;  %v3991_v3 = vor.u32 %v5167_v60, %v3990_v58  ;;  %v3966_v35 = vld [vmem:[#allocation5 + $0x490] sm:$0xf]  ;;  %v3903_v46 = vor.u32 %v5145_v34, %v3902_v33  ;;  %v5159_v49 = vld [vmem:[#allocation5 + $0x484] sm:$0xf0] }
  0x5c   :  { %2624 = vmatpush.bf16.msrb.mxu3 %v3839_v2  ;;  %v3927_v2 = vor.u32 %v5151_v57, %v3926_v56  ;;  %v4055_v4 = vor.u32 %v5183_v62, %v4054_v61  ;;  %v3958_v48 = vld [vmem:[#allocation5 + $0x480] sm:$0xf]  ;;  %v3967_v50 = vor.u32 %v5161_v37, %v3966_v35  ;;  %v5191_v56 = vld [vmem:[#allocation5 + $0x584] sm:$0xf0]  ;;  %v4206_v57 = vld [vmem:[#allocation5 + $0x670] sm:$0xf] }
  0x5d   :  { %2586 = vmatpush.bf16.msrb.mxu0 %v3639_v11  ;;  %v5165_v11 = vld [vmem:[#allocation5 + $0x4b4] sm:$0xf0]  ;;  %v4022_v52 = vld [vmem:[#allocation5 + $0x500] sm:$0xf]  ;;  %v4334_v62 = vld [vmem:[#allocation5 + $0x770] sm:$0xf]  ;;  %v3959_v1 = vor.u32 %v5159_v49, %v3958_v48 }
  0x5e   :  { %2599 = vmatpush.bf16.msrb.mxu1 %v3703_v15  ;;  %v5197_v15 = vld [vmem:[#allocation5 + $0x5b4] sm:$0xf0]  ;;  %v3983_v17 = vor.u32 %v5165_v11, %v3982_v9  ;;  %v124_v11 = vld [vmem:[#allocation3 + $0x48] sm:$0xff]  ;;  %v126_v12 = vld [vmem:[#allocation3 + $0x58] sm:$0xff] }
  0x5f   :  { %2612 = vmatpush.bf16.msrb.mxu2 %v3767_v16  ;;  %v3919_v16 = vor.u32 %v5149_v8, %v3918_v7  ;;  %v4111_v23 = vor.u32 %v5197_v15, %v4110_v14  ;;  %v5221_v58 = vld [vmem:[#allocation5 + $0x674] sm:$0xf0]  ;;  %v4198_v15 = vld [vmem:[#allocation5 + $0x660] sm:$0xf]  ;;  %v4190_v33 = vld [vmem:[#allocation5 + $0x650] sm:$0xf] }
  0x60   :  { %2625 = vmatpush.bf16.msrb.mxu3 %v3831_v21  ;;  %2587 = vmatmul.bf16.vlgmr.msrb.gmra.mxu0 %v5677_v38  ;;  %v5147_v21 = vld [vmem:[#allocation5 + $0x424] sm:$0xf0]  ;;  %v5237_v60 = vld [vmem:[#allocation5 + $0x6f4] sm:$0xf0]  ;;  %v4207_v9 = vor.u32 %v5221_v58, %v4206_v57  ;;  %v4254_v35 = vld [vmem:[#allocation5 + $0x6d0] sm:$0xf] }
  0x61   :  { %2631 = vmatpush.bf16.msra.mxu0 %v3951_v22  ;;  %2600 = vmatmul.bf16.vlgmr.msrb.gmra.mxu1 %v5681_v41  ;;  %v3974_v22 = vld [vmem:[#allocation5 + $0x4a0] sm:$0xf]  ;;  %v3911_v29 = vor.u32 %v5147_v21, %v3910_v20  ;;  %v5253_v63 = vld [vmem:[#allocation5 + $0x774] sm:$0xf0]  ;;  %v5235_v21 = vld [vmem:[#allocation5 + $0x6e4] sm:$0xf0] }
  0x62   :  { %2644 = vmatpush.bf16.msra.mxu1 %v4015_v26  ;;  %2613 = vmatmul.bf16.vlgmr.msrb.gmra.mxu2 %v5675_v32  ;;  %v5179_v26 = vld [vmem:[#allocation5 + $0x524] sm:$0xf0]  ;;  %v3975_v30 = vor.u32 %v5163_v24, %v3974_v22  ;;  %v123_v7 = vld [vmem:[#allocation3 + $0x40] sm:$0xff]  ;;  %v4335_v14 = vor.u32 %v5253_v63, %v4334_v62  ;;  %v4326_v22 = vld [vmem:[#allocation5 + $0x760] sm:$0xf] }
  0x63   :  { %2657 = vmatpush.bf16.msra.mxu2 %v4079_v27  ;;  %2626 = vmatmul.bf16.vlgmr.msrb.gmra.mxu3 %v5679_v39  ;;  %v4102_v27 = vld [vmem:[#allocation5 + $0x5a0] sm:$0xf]  ;;  %v5687_v20 = vpack.c.bf16 %v123_v7, %v123_v7  ;;  %v5217_v34 = vld [vmem:[#allocation5 + $0x654] sm:$0xf0]  ;;  %v5215_v49 = vld [vmem:[#allocation5 + $0x644] sm:$0xf0] }
  0x64   :  { %2670 = vmatpush.bf16.msra.mxu3 %v4143_v31  ;;  %v4039_v31 = vor.u32 %v5179_v26, %v4038_v25  ;;  %v4103_v36 = vor.u32 %v5195_v28, %v4102_v27  ;;  %v5691_v25 = vpack.c.bf16 %v124_v11, %v124_v11  ;;  %v4390_v26 = vld [vmem:[#allocation5 + $0x7e0] sm:$0xf]  ;;  %v5267_v27 = vld [vmem:[#allocation5 + $0x7e4] sm:$0xf0]  ;;  %v5693_v28 = vpack.c.bf16 %v126_v12, %v126_v12  ;;  %v5233_v37 = vld [vmem:[#allocation5 + $0x6d4] sm:$0xf0] }
  0x65   :  { %2632 = vmatpush.bf16.msra.mxu0 %v3943_v40  ;;  %v4030_v40 = vld [vmem:[#allocation5 + $0x510] sm:$0xf]  ;;  %v4182_v48 = vld [vmem:[#allocation5 + $0x640] sm:$0xf]  ;;  %v5261_v7 = vld [vmem:[#allocation5 + $0x7b4] sm:$0xf0] }
  0x66   :  { %2645 = vmatpush.bf16.msra.mxu1 %v4007_v42  ;;  %v5177_v42 = vld [vmem:[#allocation5 + $0x514] sm:$0xf0]  ;;  %v4183_v57 = vor.u32 %v5215_v49, %v4182_v48  ;;  %v4238_v62 = vld [vmem:[#allocation5 + $0x6b0] sm:$0xf]  ;;  %v4166_v11 = vld [vmem:[#allocation5 + $0x620] sm:$0xf] }
  0x67   :  { %2658 = vmatpush.bf16.msra.mxu2 %v4071_v43  ;;  %v4094_v43 = vld [vmem:[#allocation5 + $0x590] sm:$0xf]  ;;  %v4031_v51 = vor.u32 %v5177_v42, %v4030_v40  ;;  %v5249_v42 = vld [vmem:[#allocation5 + $0x754] sm:$0xf0]  ;;  %v5211_v12 = vld [vmem:[#allocation5 + $0x624] sm:$0xf0] }
  0x68   :  { %2671 = vmatpush.bf16.msra.mxu3 %v4135_v47  ;;  %v5143_v47 = vld [vmem:[#allocation5 + $0x404] sm:$0xf0]  ;;  %v4318_v40 = vld [vmem:[#allocation5 + $0x750] sm:$0xf]  ;;  %v4278_v48 = vld [vmem:[#allocation5 + $0x700] sm:$0xf] }
  0x69   :  { %2633 = vmatpush.bf16.msra.mxu0 %v3935_v53  ;;  %v5175_v53 = vld [vmem:[#allocation5 + $0x504] sm:$0xf0]  ;;  %v3895_v61 = vor.u32 %v5143_v47, %v3894_v45  ;;  %v4191_v45 = vor.u32 %v5217_v34, %v4190_v33  ;;  %v4319_v47 = vor.u32 %v5249_v42, %v4318_v40  ;;  %v5225_v33 = vld [vmem:[#allocation5 + $0x694] sm:$0xf0]  ;;  %v4286_v34 = vld [vmem:[#allocation5 + $0x710] sm:$0xf] }
  0x6a   :  { %2646 = vmatpush.bf16.msra.mxu1 %v3999_v54  ;;  %v4086_v54 = vld [vmem:[#allocation5 + $0x580] sm:$0xf] }
  0x6b   :  { %2659 = vmatpush.bf16.msra.mxu2 %v4063_v55  ;;  %v4095_v55 = vor.u32 %v5193_v44, %v4094_v43  ;;  %v4087_v8 = vor.u32 %v5191_v56, %v4086_v54  ;;  %v4382_v43 = vld [vmem:[#allocation5 + $0x7d0] sm:$0xf]  ;;  %v5265_v44 = vld [vmem:[#allocation5 + $0x7d4] sm:$0xf0]  ;;  %v5247_v54 = vld [vmem:[#allocation5 + $0x744] sm:$0xf0] }
  0x6c   :  { %2672 = vmatpush.bf16.msra.mxu3 %v4127_v59  ;;  %v4270_v59 = vld [vmem:[#allocation5 + $0x6f0] sm:$0xf]  ;;  %v5263_v56 = vld [vmem:[#allocation5 + $0x7c4] sm:$0xf0]  ;;  %v4150_v42 = vld [vmem:[#allocation5 + $0x600] sm:$0xf] }
  0x6d   :  { %2634 = vmatpush.bf16.msra.mxu0 %v3927_v2  ;;  %v4023_v2 = vor.u32 %v5175_v53, %v4022_v52  ;;  %v4271_v13 = vor.u32 %v5237_v60, %v4270_v59  ;;  %v5231_v52 = vld [vmem:[#allocation5 + $0x6c4] sm:$0xf0]  ;;  %v4310_v53 = vld [vmem:[#allocation5 + $0x740] sm:$0xf]  ;;  %v4174_v60 = vld [vmem:[#allocation5 + $0x630] sm:$0xf] }
  0x6e   :  { %2647 = vmatpush.bf16.msra.mxu1 %v3991_v3  ;;  %v4398_v3 = vld [vmem:[#allocation5 + $0x7f0] sm:$0xf]  ;;  %v4311_v59 = vor.u32 %v5247_v54, %v4310_v53  ;;  %v5285_v54 = vld [vmem:[#allocation5 + $0x874] sm:$0xf0] }
  0x6f   :  { %2660 = vmatpush.bf16.msra.mxu2 %v4055_v4  ;;  %v5269_v4 = vld [vmem:[#allocation5 + $0x7f4] sm:$0xf0]  ;;  %v4462_v53 = vld [vmem:[#allocation5 + $0x870] sm:$0xf] }
  0x70   :  { %2673 = vmatpush.bf16.msra.mxu3 %v4119_v10  ;;  %v125_v10 = vld [vmem:[#allocation3 + $0x50] sm:$0xff] }
  0x71   :  { %2635 = vmatpush.bf16.msra.mxu0 %v3919_v16  ;;  %v5219_v16 = vld [vmem:[#allocation5 + $0x664] sm:$0xf0]  ;;  %v5689_v24 = vpack.c.bf16 %v125_v10, %v125_v10 }
  0x72   :  { %2648 = vmatpush.bf16.msra.mxu1 %v3983_v17  ;;  %v4262_v17 = vld [vmem:[#allocation5 + $0x6e0] sm:$0xf] }
  0x73   :  { %2661 = vmatpush.bf16.msra.mxu2 %v4047_v19  ;;  %v4399_v19 = vor.u32 %v5269_v4, %v4398_v3  ;;  %v5245_v3 = vld [vmem:[#allocation5 + $0x734] sm:$0xf0]  ;;  %v4366_v4 = vld [vmem:[#allocation5 + $0x7b0] sm:$0xf] }
  0x74   :  { %2674 = vmatpush.bf16.msra.mxu3 %v4111_v23  ;;  %v5251_v23 = vld [vmem:[#allocation5 + $0x764] sm:$0xf0] }
  0x75   :  { %2636 = vmatpush.bf16.msra.mxu0 %v3911_v29  ;;  %v4199_v29 = vor.u32 %v5219_v16, %v4198_v15  ;;  %v5227_v15 = vld [vmem:[#allocation5 + $0x6a4] sm:$0xf0]  ;;  %v4294_v16 = vld [vmem:[#allocation5 + $0x720] sm:$0xf] }
  0x76   :  { %2649 = vmatpush.bf16.msra.mxu1 %v3975_v30  ;;  %v4263_v30 = vor.u32 %v5235_v21, %v4262_v17  ;;  %v5243_v17 = vld [vmem:[#allocation5 + $0x724] sm:$0xf0] }
  0x77   :  { %2662 = vmatpush.bf16.msra.mxu2 %v4039_v31  ;;  %v4327_v31 = vor.u32 %v5251_v23, %v4326_v22  ;;  %v5259_v21 = vld [vmem:[#allocation5 + $0x7a4] sm:$0xf0]  ;;  %v4167_v22 = vor.u32 %v5211_v12, %v4166_v11  ;;  %v4454_v11 = vld [vmem:[#allocation5 + $0x860] sm:$0xf] }
  0x78   :  { %2675 = vmatpush.bf16.msra.mxu3 %v4103_v36  ;;  %v4391_v36 = vor.u32 %v5267_v27, %v4390_v26  ;;  %v4295_v26 = vor.u32 %v5243_v17, %v4294_v16  ;;  %v4158_v27 = vld [vmem:[#allocation5 + $0x610] sm:$0xf]  ;;  %v5283_v12 = vld [vmem:[#allocation5 + $0x864] sm:$0xf0]  ;;  %v4582_v17 = vld [vmem:[#allocation5 + $0x960] sm:$0xf] }
  0x79   :  { %2637 = vmatpush.bf16.msra.mxu0 %v3903_v46  ;;  %v4255_v46 = vor.u32 %v5233_v37, %v4254_v35  ;;  %v5241_v35 = vld [vmem:[#allocation5 + $0x714] sm:$0xf0]  ;;  %v5299_v16 = vld [vmem:[#allocation5 + $0x8e4] sm:$0xf0] }
  0x7a   :  { %2650 = vmatpush.bf16.msra.mxu1 %v3967_v50  ;;  %v4246_v50 = vld [vmem:[#allocation5 + $0x6c0] sm:$0xf]  ;;  %v5257_v37 = vld [vmem:[#allocation5 + $0x794] sm:$0xf0] }
  0x7b   :  { %2663 = vmatpush.bf16.msra.mxu2 %v4031_v51  ;;  %v4383_v51 = vor.u32 %v5265_v44, %v4382_v43  ;;  %v4247_v58 = vor.u32 %v5231_v52, %v4246_v50  ;;  %v5207_v43 = vld [vmem:[#allocation5 + $0x604] sm:$0xf0] }
  0x7c   :  { %2676 = vmatpush.bf16.msra.mxu3 %v4095_v55  ;;  %v4374_v55 = vld [vmem:[#allocation5 + $0x7c0] sm:$0xf]  ;;  %v5239_v50 = vld [vmem:[#allocation5 + $0x704] sm:$0xf0] }
  0x7d   :  { %2638 = vmatpush.bf16.msra.mxu0 %v3895_v61  ;;  %v5213_v61 = vld [vmem:[#allocation5 + $0x634] sm:$0xf0]  ;;  %v4375_v63 = vor.u32 %v5263_v56, %v4374_v55  ;;  %v5255_v52 = vld [vmem:[#allocation5 + $0x784] sm:$0xf0]  ;;  %v4526_v55 = vld [vmem:[#allocation5 + $0x8f0] sm:$0xf]  ;;  %v4151_v56 = vor.u32 %v5207_v43, %v4150_v42 }
  0x7e   :  { %2651 = vmatpush.bf16.msra.mxu1 %v3959_v1  ;;  %v5229_v1 = vld [vmem:[#allocation5 + $0x6b4] sm:$0xf0]  ;;  %v4638_v43 = vld [vmem:[#allocation5 + $0x9d0] sm:$0xf] }
  0x7f   :  { %2664 = vmatpush.bf16.msra.mxu2 %v4023_v2  ;;  %v4302_v2 = vld [vmem:[#allocation5 + $0x730] sm:$0xf]  ;;  %v5313_v42 = vld [vmem:[#allocation5 + $0x954] sm:$0xf0] }
  0x80   :  { %2677 = vmatpush.bf16.msra.mxu3 %v4087_v8  ;;  %2639 = vmatmul.bf16.vlgmr.msra.gmra.mxu0 %v5687_v20  ;;  %v4175_v8 = vor.u32 %v5213_v61, %v4174_v60  ;;  %v4303_v10 = vor.u32 %v5245_v3, %v4302_v2  ;;  %v4279_v61 = vor.u32 %v5239_v50, %v4278_v48  ;;  %v4438_v48 = vld [vmem:[#allocation5 + $0x840] sm:$0xf] }
  0x81   :  { %2683 = vmatpush.bf16.msrb.mxu0 %v4207_v9  ;;  %2652 = vmatmul.bf16.vlgmr.msra.gmra.mxu1 %v5691_v25  ;;  %v4239_v9 = vor.u32 %v5229_v1, %v4238_v62  ;;  %v4654_v62 = vld [vmem:[#allocation5 + $0x9f0] sm:$0xf]  ;;  %v127_v1 = vld [vmem:[#allocation3 + $0x60] sm:$0xff]  ;;  %v4463_v3 = vor.u32 %v5285_v54, %v4462_v53  ;;  %v4502_v50 = vld [vmem:[#allocation5 + $0x8c0] sm:$0xf] }
  0x82   :  { %2696 = vmatpush.bf16.msrb.mxu1 %v4271_v13  ;;  %2665 = vmatmul.bf16.vlgmr.msra.gmra.mxu2 %v5689_v24  ;;  %v4230_v13 = vld [vmem:[#allocation5 + $0x6a0] sm:$0xf]  ;;  %v5311_v54 = vld [vmem:[#allocation5 + $0x944] sm:$0xf0] }
  0x83   :  { %2709 = vmatpush.bf16.msrb.mxu2 %v4335_v14  ;;  %2678 = vmatmul.bf16.vlgmr.msra.gmra.mxu3 %v5693_v28  ;;  %v4367_v14 = vor.u32 %v5261_v7, %v4366_v4  ;;  %v4231_v23 = vor.u32 %v5227_v15, %v4230_v13  ;;  %v129_v4 = vld [vmem:[#allocation3 + $0x70] sm:$0xff]  ;;  %v128_v7 = vld [vmem:[#allocation3 + $0x68] sm:$0xff]  ;;  %v5699_v15 = vpack.c.bf16 %v127_v1, %v127_v1  ;;  %v5293_v1 = vld [vmem:[#allocation5 + $0x8b4] sm:$0xf0] }
  0x84   :  { %2722 = vmatpush.bf16.msrb.mxu3 %v4399_v19  ;;  %v4358_v19 = vld [vmem:[#allocation5 + $0x7a0] sm:$0xf] }
  0x85   :  { %2684 = vmatpush.bf16.msrb.mxu0 %v4199_v29  ;;  %v5209_v29 = vld [vmem:[#allocation5 + $0x614] sm:$0xf0]  ;;  %v4518_v13 = vld [vmem:[#allocation5 + $0x8e0] sm:$0xf] }
  0x86   :  { %2697 = vmatpush.bf16.msrb.mxu1 %v4263_v30  ;;  %v4222_v30 = vld [vmem:[#allocation5 + $0x690] sm:$0xf]  ;;  %v4159_v40 = vor.u32 %v5209_v29, %v4158_v27  ;;  %v4455_v29 = vor.u32 %v5283_v12, %v4454_v11  ;;  %v4566_v53 = vld [vmem:[#allocation5 + $0x940] sm:$0xf]  ;;  %v5275_v12 = vld [vmem:[#allocation5 + $0x824] sm:$0xf0] }
  0x87   :  { %2710 = vmatpush.bf16.msrb.mxu2 %v4327_v31  ;;  %v4359_v31 = vor.u32 %v5259_v21, %v4358_v19  ;;  %v4223_v44 = vor.u32 %v5225_v33, %v4222_v30  ;;  %v5315_v19 = vld [vmem:[#allocation5 + $0x964] sm:$0xf0]  ;;  %v5701_v21 = vpack.c.bf16 %v129_v4, %v129_v4  ;;  %v4519_v30 = vor.u32 %v5299_v16, %v4518_v13  ;;  %v4446_v33 = vld [vmem:[#allocation5 + $0x850] sm:$0xf]  ;;  %v4422_v11 = vld [vmem:[#allocation5 + $0x820] sm:$0xf] }
  0x88   :  { %2723 = vmatpush.bf16.msrb.mxu3 %v4391_v36  ;;  %v4350_v36 = vld [vmem:[#allocation5 + $0x790] sm:$0xf]  ;;  %v4486_v13 = vld [vmem:[#allocation5 + $0x8a0] sm:$0xf]  ;;  %v5291_v16 = vld [vmem:[#allocation5 + $0x8a4] sm:$0xf0] }
  0x89   :  { %2685 = vmatpush.bf16.msrb.mxu0 %v4191_v45  ;;  %v4287_v45 = vor.u32 %v5241_v35, %v4286_v34  ;;  %v4351_v49 = vor.u32 %v5257_v37, %v4350_v36  ;;  %v5281_v34 = vld [vmem:[#allocation5 + $0x854] sm:$0xf0]  ;;  %v4510_v35 = vld [vmem:[#allocation5 + $0x8d0] sm:$0xf] }
  0x8a   :  { %2698 = vmatpush.bf16.msrb.mxu1 %v4255_v46  ;;  %v4214_v46 = vld [vmem:[#allocation5 + $0x680] sm:$0xf]  ;;  %v5297_v37 = vld [vmem:[#allocation5 + $0x8d4] sm:$0xf0]  ;;  %v4622_v4 = vld [vmem:[#allocation5 + $0x9b0] sm:$0xf] }
  0x8b   :  { %2711 = vmatpush.bf16.msrb.mxu2 %v4319_v47  ;;  %v5223_v47 = vld [vmem:[#allocation5 + $0x684] sm:$0xf0] }
  0x8c   :  { %2724 = vmatpush.bf16.msrb.mxu3 %v4383_v51  ;;  %v4342_v51 = vld [vmem:[#allocation5 + $0x780] sm:$0xf]  ;;  %v4215_v60 = vor.u32 %v5223_v47, %v4214_v46  ;;  %v4511_v46 = vor.u32 %v5297_v37, %v4510_v35  ;;  %v4478_v35 = vld [vmem:[#allocation5 + $0x890] sm:$0xf]  ;;  %v5289_v37 = vld [vmem:[#allocation5 + $0x894] sm:$0xf0] }
  0x8d   :  { %2686 = vmatpush.bf16.msrb.mxu0 %v4183_v57  ;;  %v5301_v57 = vld [vmem:[#allocation5 + $0x8f4] sm:$0xf0]  ;;  %v4343_v2 = vor.u32 %v5255_v52, %v4342_v51  ;;  %v5295_v52 = vld [vmem:[#allocation5 + $0x8c4] sm:$0xf0] }
  0x8e   :  { %2699 = vmatpush.bf16.msrb.mxu1 %v4247_v58  ;;  %v4590_v58 = vld [vmem:[#allocation5 + $0x970] sm:$0xf] }
  0x8f   :  { %2712 = vmatpush.bf16.msrb.mxu2 %v4311_v59  ;;  %v5317_v59 = vld [vmem:[#allocation5 + $0x974] sm:$0xf0] }
  0x90   :  { %2725 = vmatpush.bf16.msrb.mxu3 %v4375_v63  ;;  %v5333_v63 = vld [vmem:[#allocation5 + $0x9f4] sm:$0xf0] }
  0x91   :  { %2687 = vmatpush.bf16.msrb.mxu0 %v4175_v8  ;;  %v130_v8 = vld [vmem:[#allocation3 + $0x78] sm:$0xff] }
  0x92   :  { %2700 = vmatpush.bf16.msrb.mxu1 %v4239_v9  ;;  %v4527_v9 = vor.u32 %v5301_v57, %v4526_v55  ;;  %v5705_v27 = vpack.c.bf16 %v130_v8, %v130_v8  ;;  %v4630_v55 = vld [vmem:[#allocation5 + $0x9c0] sm:$0xf] }
  0x93   :  { %2713 = vmatpush.bf16.msrb.mxu2 %v4303_v10  ;;  %v4591_v10 = vor.u32 %v5317_v59, %v4590_v58  ;;  %v4503_v58 = vor.u32 %v5295_v52, %v4502_v50  ;;  %v4567_v59 = vor.u32 %v5311_v54, %v4566_v53  ;;  %v4470_v50 = vld [vmem:[#allocation5 + $0x880] sm:$0xf]  ;;  %v5303_v54 = vld [vmem:[#allocation5 + $0x904] sm:$0xf0] }
  0x94   :  { %2726 = vmatpush.bf16.msrb.mxu3 %v4367_v14  ;;  %v4655_v14 = vor.u32 %v5333_v63, %v4654_v62  ;;  %v4494_v62 = vld [vmem:[#allocation5 + $0x8b0] sm:$0xf]  ;;  %v4534_v52 = vld [vmem:[#allocation5 + $0x900] sm:$0xf] }
  0x95   :  { %2688 = vmatpush.bf16.msrb.mxu0 %v4167_v22  ;;  %v5703_v22 = vpack.c.bf16 %v128_v7, %v128_v7  ;;  %v5325_v7 = vld [vmem:[#allocation5 + $0x9b4] sm:$0xf0] }
  0x96   :  { %2701 = vmatpush.bf16.msrb.mxu1 %v4231_v23  ;;  %v4646_v23 = vld [vmem:[#allocation5 + $0x9e0] sm:$0xf] }
  0x97   :  { %2714 = vmatpush.bf16.msrb.mxu2 %v4295_v26  ;;  %v5331_v26 = vld [vmem:[#allocation5 + $0x9e4] sm:$0xf0] }
  0x98   :  { %2727 = vmatpush.bf16.msrb.mxu3 %v4359_v31  ;;  %v4583_v31 = vor.u32 %v5315_v19, %v4582_v17  ;;  %v4647_v36 = vor.u32 %v5331_v26, %v4646_v23  ;;  %v4550_v17 = vld [vmem:[#allocation5 + $0x920] sm:$0xf]  ;;  %v5307_v19 = vld [vmem:[#allocation5 + $0x924] sm:$0xf0] }
  0x99   :  { %2689 = vmatpush.bf16.msrb.mxu0 %v4159_v40  ;;  %v4574_v40 = vld [vmem:[#allocation5 + $0x950] sm:$0xf]  ;;  %v4614_v23 = vld [vmem:[#allocation5 + $0x9a0] sm:$0xf]  ;;  %v5323_v26 = vld [vmem:[#allocation5 + $0x9a4] sm:$0xf0] }
  0x9a   :  { %2702 = vmatpush.bf16.msrb.mxu1 %v4223_v44  ;;  %v5329_v44 = vld [vmem:[#allocation5 + $0x9d4] sm:$0xf0]  ;;  %v4575_v47 = vor.u32 %v5313_v42, %v4574_v40  ;;  %v4542_v40 = vld [vmem:[#allocation5 + $0x910] sm:$0xf] }
  0x9b   :  { %2715 = vmatpush.bf16.msrb.mxu2 %v4287_v45  ;;  %v4447_v45 = vor.u32 %v5281_v34, %v4446_v33  ;;  %v4639_v51 = vor.u32 %v5329_v44, %v4638_v43  ;;  %v4414_v33 = vld [vmem:[#allocation5 + $0x810] sm:$0xf]  ;;  %v5273_v34 = vld [vmem:[#allocation5 + $0x814] sm:$0xf0] }
  0x9c   :  { %2728 = vmatpush.bf16.msrb.mxu3 %v4351_v49  ;;  %v5279_v49 = vld [vmem:[#allocation5 + $0x844] sm:$0xf0]  ;;  %v5305_v42 = vld [vmem:[#allocation5 + $0x914] sm:$0xf0]  ;;  %v4606_v43 = vld [vmem:[#allocation5 + $0x990] sm:$0xf] }
  0x9d   :  { %2690 = vmatpush.bf16.msrb.mxu0 %v4151_v56  ;;  %v5327_v56 = vld [vmem:[#allocation5 + $0x9c4] sm:$0xf0]  ;;  %v4439_v57 = vor.u32 %v5279_v49, %v4438_v48  ;;  %v5321_v44 = vld [vmem:[#allocation5 + $0x994] sm:$0xf0]  ;;  %v4479_v48 = vor.u32 %v5289_v37, %v4478_v35  ;;  %v4543_v49 = vor.u32 %v5305_v42, %v4542_v40  ;;  %v4902_v35 = vld [vmem:[#allocation5 + $0xbe0] sm:$0xf] }
  0x9e   :  { %2703 = vmatpush.bf16.msrb.mxu1 %v4215_v60  ;;  %v4430_v60 = vld [vmem:[#allocation5 + $0x830] sm:$0xf]  ;;  %v4631_v63 = vor.u32 %v5327_v56, %v4630_v55  ;;  %v4607_v53 = vor.u32 %v5321_v44, %v4606_v43  ;;  %v4598_v55 = vld [vmem:[#allocation5 + $0x980] sm:$0xf]  ;;  %v5319_v56 = vld [vmem:[#allocation5 + $0x984] sm:$0xf0] }
  0x9f   :  { %2716 = vmatpush.bf16.msrb.mxu2 %v4279_v61  ;;  %v5277_v61 = vld [vmem:[#allocation5 + $0x834] sm:$0xf0]  ;;  %v4702_v44 = vld [vmem:[#allocation5 + $0xa50] sm:$0xf] }
  0xa0   :  { %2729 = vmatpush.bf16.msrb.mxu3 %v4343_v2  ;;  %2691 = vmatmul.bf16.vlgmr.msrb.gmra.mxu0 %v5699_v15  ;;  %v4558_v2 = vld [vmem:[#allocation5 + $0x930] sm:$0xf]  ;;  %v4431_v8 = vor.u32 %v5277_v61, %v4430_v60  ;;  %v5365_v61 = vld [vmem:[#allocation5 + $0xaf4] sm:$0xf0] }
  0xa1   :  { %2735 = vmatpush.bf16.msra.mxu0 %v4463_v3  ;;  %2704 = vmatmul.bf16.vlgmr.msrb.gmra.mxu1 %v5703_v22  ;;  %v5309_v3 = vld [vmem:[#allocation5 + $0x934] sm:$0xf0] }
  0xa2   :  { %2748 = vmatpush.bf16.msra.mxu1 %v4527_v9  ;;  %2717 = vmatmul.bf16.vlgmr.msrb.gmra.mxu2 %v5701_v21  ;;  %v4495_v9 = vor.u32 %v5293_v1, %v4494_v62  ;;  %v4846_v62 = vld [vmem:[#allocation5 + $0xb70] sm:$0xf] }
  0xa3   :  { %2761 = vmatpush.bf16.msra.mxu2 %v4591_v10  ;;  %2730 = vmatmul.bf16.vlgmr.msrb.gmra.mxu3 %v5705_v27  ;;  %v4559_v10 = vor.u32 %v5309_v3, %v4558_v2  ;;  %v4535_v2 = vor.u32 %v5303_v54, %v4534_v52  ;;  %v4910_v3 = vld [vmem:[#allocation5 + $0xbf0] sm:$0xf]  ;;  %v5393_v52 = vld [vmem:[#allocation5 + $0xbd4] sm:$0xf0]  ;;  %v4694_v54 = vld [vmem:[#allocation5 + $0xa40] sm:$0xf] }
  0xa4   :  { %2774 = vmatpush.bf16.msra.mxu3 %v4655_v14  ;;  %v4623_v14 = vor.u32 %v5325_v7, %v4622_v4  ;;  %v5397_v4 = vld [vmem:[#allocation5 + $0xbf4] sm:$0xf0] }
  0xa5   :  { %2736 = vmatpush.bf16.msra.mxu0 %v4455_v29  ;;  %v4423_v29 = vor.u32 %v5275_v12, %v4422_v11  ;;  %v131_v7 = vld [vmem:[#allocation3 + $0x80] sm:$0xff]  ;;  %v132_v11 = vld [vmem:[#allocation3 + $0x88] sm:$0xff]  ;;  %v134_v12 = vld [vmem:[#allocation3 + $0x98] sm:$0xff] }
  0xa6   :  { %2749 = vmatpush.bf16.msra.mxu1 %v4519_v30  ;;  %v4487_v30 = vor.u32 %v5291_v16, %v4486_v13  ;;  %v4710_v16 = vld [vmem:[#allocation5 + $0xa60] sm:$0xf]  ;;  %v5717_v37 = vpack.c.bf16 %v134_v12, %v134_v12 }
  0xa7   :  { %2762 = vmatpush.bf16.msra.mxu2 %v4583_v31  ;;  %v4551_v31 = vor.u32 %v5307_v19, %v4550_v17  ;;  %v5347_v17 = vld [vmem:[#allocation5 + $0xa64] sm:$0xf0]  ;;  %v4774_v19 = vld [vmem:[#allocation5 + $0xae0] sm:$0xf] }
  0xa8   :  { %2775 = vmatpush.bf16.msra.mxu3 %v4647_v36  ;;  %v4615_v36 = vor.u32 %v5323_v26, %v4614_v23  ;;  %v4911_v23 = vor.u32 %v5397_v4, %v4910_v3  ;;  %v5711_v26 = vpack.c.bf16 %v131_v7, %v131_v7  ;;  %v4711_v40 = vor.u32 %v5347_v17, %v4710_v16  ;;  %v5373_v16 = vld [vmem:[#allocation5 + $0xb34] sm:$0xf0]  ;;  %v4878_v17 = vld [vmem:[#allocation5 + $0xbb0] sm:$0xf] }
  0xa9   :  { %2737 = vmatpush.bf16.msra.mxu0 %v4447_v45  ;;  %v4415_v45 = vor.u32 %v5273_v34, %v4414_v33  ;;  %v5715_v34 = vpack.c.bf16 %v132_v11, %v132_v11  ;;  %v4750_v11 = vld [vmem:[#allocation5 + $0xab0] sm:$0xf] }
  0xaa   :  { %2750 = vmatpush.bf16.msra.mxu1 %v4511_v46  ;;  %v4406_v46 = vld [vmem:[#allocation5 + $0x800] sm:$0xf] }
  0xab   :  { %2763 = vmatpush.bf16.msra.mxu2 %v4575_v47  ;;  %v5271_v47 = vld [vmem:[#allocation5 + $0x804] sm:$0xf0] }
  0xac   :  { %2776 = vmatpush.bf16.msra.mxu3 %v4639_v51  ;;  %v5287_v51 = vld [vmem:[#allocation5 + $0x884] sm:$0xf0]  ;;  %v4407_v60 = vor.u32 %v5271_v47, %v4406_v46  ;;  %v4766_v46 = vld [vmem:[#allocation5 + $0xad0] sm:$0xf] }
  0xad   :  { %2738 = vmatpush.bf16.msra.mxu0 %v4439_v57  ;;  %v4718_v57 = vld [vmem:[#allocation5 + $0xa70] sm:$0xf]  ;;  %v4471_v1 = vor.u32 %v5287_v51, %v4470_v50  ;;  %v5377_v50 = vld [vmem:[#allocation5 + $0xb54] sm:$0xf0] }
  0xae   :  { %2751 = vmatpush.bf16.msra.mxu1 %v4503_v58  ;;  %v5349_v58 = vld [vmem:[#allocation5 + $0xa74] sm:$0xf0]  ;;  %v4894_v51 = vld [vmem:[#allocation5 + $0xbd0] sm:$0xf] }
  0xaf   :  { %2764 = vmatpush.bf16.msra.mxu2 %v4567_v59  ;;  %v4782_v59 = vld [vmem:[#allocation5 + $0xaf0] sm:$0xf] }
  0xb0   :  { %2777 = vmatpush.bf16.msra.mxu3 %v4631_v63  ;;  %v5381_v63 = vld [vmem:[#allocation5 + $0xb74] sm:$0xf0]  ;;  %v4783_v13 = vor.u32 %v5365_v61, %v4782_v59  ;;  %v557_v59 = vld [vmem:[#allocation7] sm:$0x3]  ;;  %v5359_v61 = vld [vmem:[#allocation5 + $0xac4] sm:$0xf0] }
  0xb1   :  { %2739 = vmatpush.bf16.msra.mxu0 %v4431_v8  ;;  %v4599_v8 = vor.u32 %v5319_v56, %v4598_v55  ;;  %v559_v4 = vperm.slane %v557_v59, 0 }
  0xb2   :  { %2752 = vmatpush.bf16.msra.mxu1 %v4495_v9  ;;  %v4719_v9 = vor.u32 %v5349_v58, %v4718_v57  ;;  %v5343_v57 = vld [vmem:[#allocation5 + $0xa44] sm:$0xf0]  ;;  %v4758_v58 = vld [vmem:[#allocation5 + $0xac0] sm:$0xf] }
  0xb3   :  { %2765 = vmatpush.bf16.msra.mxu2 %v4559_v10  ;;  %v133_v10 = vld [vmem:[#allocation3 + $0x90] sm:$0xff]  ;;  %v4695_v3 = vor.u32 %v5343_v57, %v4694_v54  ;;  %v4759_v7 = vor.u32 %v5359_v61, %v4758_v58  ;;  %v5337_v57 = vld [vmem:[#allocation5 + $0xa14] sm:$0xf0]  ;;  %v4734_v58 = vld [vmem:[#allocation5 + $0xa90] sm:$0xf] }
  0xb4   :  { %2778 = vmatpush.bf16.msra.mxu3 %v4623_v14  ;;  %v4847_v14 = vor.u32 %v5381_v63, %v4846_v62  ;;  %v5713_v33 = vpack.c.bf16 %v133_v10, %v133_v10  ;;  %v4822_v62 = vld [vmem:[#allocation5 + $0xb40] sm:$0xf]  ;;  %v5375_v63 = vld [vmem:[#allocation5 + $0xb44] sm:$0xf0]  ;;  %v5341_v10 = vld [vmem:[#allocation5 + $0xa34] sm:$0xf0] }
  0xb5   :  { %2740 = vmatpush.bf16.msra.mxu0 %v4423_v29  ;;  %v5363_v29 = vld [vmem:[#allocation5 + $0xae4] sm:$0xf0]  ;;  %v4798_v61 = vld [vmem:[#allocation5 + $0xb10] sm:$0xf] }
  0xb6   :  { %2753 = vmatpush.bf16.msra.mxu1 %v4487_v30  ;;  %v4838_v30 = vld [vmem:[#allocation5 + $0xb60] sm:$0xf]  ;;  %v4775_v42 = vor.u32 %v5363_v29, %v4774_v19  ;;  %v5389_v19 = vld [vmem:[#allocation5 + $0xbb4] sm:$0xf0] }
  0xb7   :  { %2766 = vmatpush.bf16.msra.mxu2 %v4551_v31  ;;  %v5379_v31 = vld [vmem:[#allocation5 + $0xb64] sm:$0xf0] }
  0xb8   :  { %2779 = vmatpush.bf16.msra.mxu3 %v4615_v36  ;;  %v5395_v36 = vld [vmem:[#allocation5 + $0xbe4] sm:$0xf0]  ;;  %v4839_v43 = vor.u32 %v5379_v31, %v4838_v30 }
  0xb9   :  { %2741 = vmatpush.bf16.msra.mxu0 %v4415_v45  ;;  %v5345_v45 = vld [vmem:[#allocation5 + $0xa54] sm:$0xf0]  ;;  %v4903_v47 = vor.u32 %v5395_v36, %v4902_v35  ;;  %v4678_v36 = vld [vmem:[#allocation5 + $0xa20] sm:$0xf] }
  0xba   :  { %2754 = vmatpush.bf16.msra.mxu1 %v4479_v48  ;;  %v5361_v48 = vld [vmem:[#allocation5 + $0xad4] sm:$0xf0] }
  0xbb   :  { %2767 = vmatpush.bf16.msra.mxu2 %v4543_v49  ;;  %v4830_v49 = vld [vmem:[#allocation5 + $0xb50] sm:$0xf]  ;;  %v4767_v55 = vor.u32 %v5361_v48, %v4766_v46  ;;  %v4806_v46 = vld [vmem:[#allocation5 + $0xb20] sm:$0xf] }
  0xbc   :  { %2780 = vmatpush.bf16.msra.mxu3 %v4607_v53  ;;  %v4703_v53 = vor.u32 %v5345_v45, %v4702_v44  ;;  %v4831_v56 = vor.u32 %v5377_v50, %v4830_v49  ;;  %v4879_v44 = vor.u32 %v5389_v19, %v4878_v17  ;;  %v5355_v45 = vld [vmem:[#allocation5 + $0xaa4] sm:$0xf0]  ;;  %v4870_v49 = vld [vmem:[#allocation5 + $0xba0] sm:$0xf] }
  0xbd   :  { %2742 = vmatpush.bf16.msra.mxu0 %v4407_v60  ;;  %v4895_v60 = vor.u32 %v5393_v52, %v4894_v51  ;;  %v5387_v50 = vld [vmem:[#allocation5 + $0xba4] sm:$0xf0] }
  0xbe   :  { %2755 = vmatpush.bf16.msra.mxu1 %v4471_v1  ;;  %v4886_v1 = vld [vmem:[#allocation5 + $0xbc0] sm:$0xf]  ;;  %v4871_v59 = vor.u32 %v5387_v50, %v4870_v49  ;;  %v5367_v19 = vld [vmem:[#allocation5 + $0xb04] sm:$0xf0]  ;;  %v135_v49 = vld [vmem:[#allocation3 + $0xa0] sm:$0xff] }
  0xbf   :  { %2768 = vmatpush.bf16.msra.mxu2 %v4535_v2  ;;  %v5391_v2 = vld [vmem:[#allocation5 + $0xbc4] sm:$0xf0] }
  0xc0   :  { %2781 = vmatpush.bf16.msra.mxu3 %v4599_v8  ;;  %2743 = vmatmul.bf16.vlgmr.msra.gmra.mxu0 %v5711_v26  ;;  %v4823_v8 = vor.u32 %v5375_v63, %v4822_v62  ;;  %v4887_v12 = vor.u32 %v5391_v2, %v4886_v1  ;;  %v5369_v62 = vld [vmem:[#allocation5 + $0xb14] sm:$0xf0]  ;;  %v4862_v1 = vld [vmem:[#allocation5 + $0xb90] sm:$0xf] }
  0xc1   :  { %2787 = vmatpush.bf16.msrb.mxu0 %v4719_v9  ;;  %2756 = vmatmul.bf16.vlgmr.msra.gmra.mxu1 %v5715_v34  ;;  %v4686_v9 = vld [vmem:[#allocation5 + $0xa30] sm:$0xf]  ;;  %v5385_v2 = vld [vmem:[#allocation5 + $0xb94] sm:$0xf0] }
  0xc2   :  { %2800 = vmatpush.bf16.msrb.mxu1 %v4783_v13  ;;  %2769 = vmatmul.bf16.vlgmr.msra.gmra.mxu2 %v5713_v33  ;;  %v5357_v13 = vld [vmem:[#allocation5 + $0xab4] sm:$0xf0]  ;;  %v4687_v29 = vor.u32 %v5341_v10, %v4686_v9  ;;  %v5335_v9 = vld [vmem:[#allocation5 + $0xa04] sm:$0xf0]  ;;  %v4863_v17 = vor.u32 %v5385_v2, %v4862_v1  ;;  %v5042_v1 = vld [vmem:[#allocation5 + $0xe4] sm:$0xf] }
  0xc3   :  { %2813 = vmatpush.bf16.msrb.mxu2 %v4847_v14  ;;  %2782 = vmatmul.bf16.vlgmr.msra.gmra.mxu3 %v5717_v37  ;;  %v4814_v14 = vld [vmem:[#allocation5 + $0xb30] sm:$0xf]  ;;  %v4751_v31 = vor.u32 %v5357_v13, %v4750_v11  ;;  %v4799_v11 = vor.u32 %v5369_v62, %v4798_v61  ;;  %v5351_v13 = vld [vmem:[#allocation5 + $0xa84] sm:$0xf0]  ;;  %v5725_v62 = vpack.c.bf16 %v135_v49, %v135_v49  ;;  %v3496_v2 = vld [vmem:[#allocation5 + $0xe8] sm:$0xf0] }
  0xc4   :  { %2826 = vmatpush.bf16.msrb.mxu3 %v4911_v23  ;;  %v2536_v23 = vpop.f32.mrf.mxu0  ;;  %v4815_v35 = vor.u32 %v5373_v16, %v4814_v14  ;;  %v4790_v14 = vld [vmem:[#allocation5 + $0xb00] sm:$0xf]  ;;  %v3480_v49 = vld [vmem:[#allocation5 + $0xc8] sm:$0xf0] }
  0xc5   :  { %2788 = vmatpush.bf16.msrb.mxu0 %v4711_v40  ;;  %v2537_v30 = vadd.f32 %v2536_v23, %v559_v4  ;;  %v5339_v40 = vld [vmem:[#allocation5 + $0xa24] sm:$0xf0]  ;;  %v2562_v51 = vpop.f32.mrf.mxu2  ;;  %v4854_v23 = vld [vmem:[#allocation5 + $0xb80] sm:$0xf] }
  0xc6   :  { %2801 = vmatpush.bf16.msrb.mxu1 %v4775_v42  ;;  %v4742_v42 = vld [vmem:[#allocation5 + $0xaa0] sm:$0xf]  ;;  %v4679_v52 = vor.u32 %v5339_v40, %v4678_v36  ;;  %v2575_v63 = vpop.f32.mrf.mxu3 }
  0xc7   :  { %2814 = vmatpush.bf16.msrb.mxu2 %v4839_v43  ;;  %v2549_v43 = vpop.f32.mrf.mxu1  ;;  %v4743_v54 = vor.u32 %v5355_v45, %v4742_v42  ;;  %v3440_v42 = vld [vmem:[#allocation5 + $0x78] sm:$0xf0] }
  0xc8   :  { %2827 = vmatpush.bf16.msrb.mxu3 %v4903_v47  ;;  %v5371_v47 = vld [vmem:[#allocation5 + $0xb24] sm:$0xf0]  ;;  %v2550_v48 = vadd.f32 %v2549_v43, %v2537_v30  ;;  %v4942_v30 = vld [vmem:[#allocation5 + $0xc30] sm:$0xf]  ;;  %v5044_v43 = vld [vmem:[#allocation5 + $0xf4] sm:$0xf] }
  0xc9   :  { %2789 = vmatpush.bf16.msrb.mxu0 %v4703_v53 }
  0xca   :  { %2802 = vmatpush.bf16.msrb.mxu1 %v4767_v55  ;;  %v2563_v53 = vadd.f32 %v2562_v51, %v2550_v48  ;;  %v4807_v55 = vor.u32 %v5371_v47, %v4806_v46  ;;  %v4791_v46 = vor.u32 %v5367_v19, %v4790_v14  ;;  %v5060_v47 = vld [vmem:[#allocation5 + $0x174] sm:$0xf]  ;;  %v3568_v48 = vld [vmem:[#allocation5 + $0x178] sm:$0xf0]  ;;  %v4926_v14 = vld [vmem:[#allocation5 + $0xc10] sm:$0xf] }
  0xcb   :  { %2815 = vmatpush.bf16.msrb.mxu2 %v4831_v56  ;;  %v4670_v56 = vld [vmem:[#allocation5 + $0xa10] sm:$0xf]  ;;  %v3571_v61 = vor.u32 %v5060_v47, %v3568_v48  ;;  %v5038_v48 = vld [vmem:[#allocation5 + $0xc4] sm:$0xf] }
  0xcc   :  { %2828 = vmatpush.bf16.msrb.mxu3 %v4895_v60  ;;  %v5353_v60 = vld [vmem:[#allocation5 + $0xa94] sm:$0xf0]  ;;  %v2538_v4 = vpop.f32.mrf.mxu0 }
  0xcd   :  { %2790 = vmatpush.bf16.msrb.mxu0 %v4695_v3  ;;  %v5723_v3 = vadd.f32 %v2575_v63, %v2563_v53  ;;  %v4735_v10 = vor.u32 %v5353_v60, %v4734_v58  ;;  %v2564_v36 = vpop.f32.mrf.mxu2  ;;  %v136_v53 = vld [vmem:[#allocation3 + $0xa8] sm:$0xff]  ;;  %v3432_v63 = vld [vmem:[#allocation5 + $0x68] sm:$0xf0] }
  0xce   :  { %2803 = vmatpush.bf16.msrb.mxu1 %v4759_v7  ;;  %v4671_v7 = vor.u32 %v5337_v57, %v4670_v56  ;;  %v4934_v58 = vld [vmem:[#allocation5 + $0xc20] sm:$0xf]  ;;  %v5026_v60 = vld [vmem:[#allocation5 + $0x64] sm:$0xf] }
  0xcf   :  { %2816 = vmatpush.bf16.msrb.mxu2 %v4823_v8  ;;  %v4662_v8 = vld [vmem:[#allocation5 + $0xa00] sm:$0xf]  ;;  %v2551_v16 = vpop.f32.mrf.mxu1 }
  0xd0   :  { %2829 = vmatpush.bf16.msrb.mxu3 %v4887_v12  ;;  %v4726_v12 = vld [vmem:[#allocation5 + $0xa80] sm:$0xf]  ;;  %v4663_v40 = vor.u32 %v5335_v9, %v4662_v8  ;;  %v5058_v8 = vld [vmem:[#allocation5 + $0x164] sm:$0xf]  ;;  %v3560_v9 = vld [vmem:[#allocation5 + $0x168] sm:$0xf0] }
  0xd1   :  { %2791 = vmatpush.bf16.msrb.mxu0 %v4687_v29  ;;  %v5383_v29 = vld [vmem:[#allocation5 + $0xb84] sm:$0xf0]  ;;  %v4727_v45 = vor.u32 %v5351_v13, %v4726_v12  ;;  %v3435_v12 = vor.u32 %v5026_v60, %v3432_v63  ;;  %v3499_v13 = vor.u32 %v5042_v1, %v3496_v2  ;;  %v5401_v16 = vld [vmem:[#allocation5 + $0xc14] sm:$0xf0]  ;;  %v3563_v19 = vor.u32 %v5058_v8, %v3560_v9  ;;  %v3408_v60 = vld [vmem:[#allocation5 + $0x38] sm:$0xf0] }
  0xd2   :  { %2804 = vmatpush.bf16.msrb.mxu1 %v4751_v31  ;;  %v5405_v31 = vld [vmem:[#allocation5 + $0xc34] sm:$0xf0]  ;;  %v4855_v50 = vor.u32 %v5383_v29, %v4854_v23  ;;  %v3424_v23 = vld [vmem:[#allocation5 + $0x58] sm:$0xf0]  ;;  %v5040_v29 = vld [vmem:[#allocation5 + $0xd4] sm:$0xf]  ;;  %v4927_v36 = vor.u32 %v5401_v16, %v4926_v14 }
  0xd3   :  { %2817 = vmatpush.bf16.msrb.mxu2 %v4815_v35  ;;  %v5028_v35 = vld [vmem:[#allocation5 + $0x74] sm:$0xf]  ;;  %v4943_v51 = vor.u32 %v5405_v31, %v4942_v30  ;;  %v3488_v30 = vld [vmem:[#allocation5 + $0xd8] sm:$0xf0]  ;;  %v3624_v14 = vld [vmem:[#allocation5 + $0x1e8] sm:$0xf0] }
  0xd4   :  { %2830 = vmatpush.bf16.msrb.mxu3 %v4879_v44  ;;  %v3504_v44 = vld [vmem:[#allocation5 + $0xf8] sm:$0xf0]  ;;  %v3443_v56 = vor.u32 %v5028_v35, %v3440_v42  ;;  %v5056_v31 = vld [vmem:[#allocation5 + $0x154] sm:$0xf] }
  0xd5   :  { %2792 = vmatpush.bf16.msrb.mxu0 %v4679_v52  ;;  %v137_v52 = vld [vmem:[#allocation3 + $0xb0] sm:$0xff]  ;;  %v3507_v57 = vor.u32 %v5044_v43, %v3504_v44  ;;  %v3552_v35 = vld [vmem:[#allocation5 + $0x158] sm:$0xf0]  ;;  %v3491_v43 = vor.u32 %v5040_v29, %v3488_v30  ;;  %v5036_v2 = vld [vmem:[#allocation5 + $0xb4] sm:$0xf] }
  0xd6   :  { %2805 = vmatpush.bf16.msrb.mxu1 %v4743_v54  ;;  %v138_v54 = vld [vmem:[#allocation3 + $0xb8] sm:$0xff]  ;;  %v5727_v4 = vpack.c.bf16 %v137_v52, %v137_v52  ;;  %v5399_v44 = vld [vmem:[#allocation5 + $0xc04] sm:$0xf0]  ;;  %v3555_v47 = vor.u32 %v5056_v31, %v3552_v35  ;;  %v3472_v8 = vld [vmem:[#allocation5 + $0xb8] sm:$0xf0] }
  0xd7   :  { %2818 = vmatpush.bf16.msrb.mxu2 %v4807_v55  ;;  %v2577_v55 = vpop.f32.mrf.mxu3  ;;  %v5076_v52 = vld [vmem:[#allocation5 + $0x1f4] sm:$0xf]  ;;  %v139_v16 = vld [vmem:[#allocation3 + $0xc0] sm:$0xff]  ;;  %v3400_v29 = vld [vmem:[#allocation5 + $0x28] sm:$0xf0] }
  0xd8   :  { %2831 = vmatpush.bf16.msrb.mxu3 %v4871_v59  ;;  %v5403_v59 = vld [vmem:[#allocation5 + $0xc24] sm:$0xf0]  ;;  %v5052_v9 = vld [vmem:[#allocation5 + $0x134] sm:$0xf] }
  0xd9   :  { %2793 = vmatpush.bf16.msrb.mxu0 %v4671_v7  ;;  %v5729_v7 = vpack.c.bf16 %v136_v53, %v136_v53  ;;  %v3632_v53 = vld [vmem:[#allocation5 + $0x1f8] sm:$0xf0] }
  0xda   :  { %2806 = vmatpush.bf16.msrb.mxu1 %v4735_v10  ;;  %v5731_v10 = vpack.c.bf16 %v138_v54, %v138_v54  ;;  %v3635_v1 = vor.u32 %v5076_v52, %v3632_v53  ;;  %v5016_v52 = vld [vmem:[#allocation5 + $0x14] sm:$0xf]  ;;  %v3392_v53 = vld [vmem:[#allocation5 + $0x18] sm:$0xf0] }
  0xdb   :  { %2819 = vmatpush.bf16.msrb.mxu2 %v4799_v11  ;;  %v4935_v11 = vor.u32 %v5403_v59, %v4934_v58  ;;  %v5020_v59 = vld [vmem:[#allocation5 + $0x34] sm:$0xf] }
  0xdc   :  { %2832 = vmatpush.bf16.msrb.mxu3 %v4863_v17  ;;  %v5024_v17 = vld [vmem:[#allocation5 + $0x54] sm:$0xf] }
  0xdd   :  { %2794 = vmatpush.bf16.msrb.mxu0 %v4663_v40  ;;  %v4918_v40 = vld [vmem:[#allocation5 + $0xc00] sm:$0xf]  ;;  %v3427_v42 = vor.u32 %v5024_v17, %v3424_v23  ;;  %v2588_v55 = vpop.f32.mrf.mxu0  ;;  %v3411_v17 = vor.u32 %v5020_v59, %v3408_v60  ;;  %v5018_v23 = vld [vmem:[#allocation5 + $0x24] sm:$0xf]  ;;  %v5048_v59 = vld [vmem:[#allocation5 + $0x114] sm:$0xf] }
  0xde   :  { %2807 = vmatpush.bf16.msrb.mxu1 %v4727_v45  ;;  %v5022_v45 = vld [vmem:[#allocation5 + $0x44] sm:$0xf]  ;;  %v4919_v54 = vor.u32 %v5399_v44, %v4918_v40  ;;  %v2589_v58 = vadd.f32 %v2588_v55, %v5723_v3  ;;  %v3464_v40 = vld [vmem:[#allocation5 + $0xa8] sm:$0xf0]  ;;  %v5738_v44 = vpack.c.bf16 %v139_v16, %v139_v16  ;;  %v3520_v60 = vld [vmem:[#allocation5 + $0x118] sm:$0xf0] }
  0xdf   :  { %2820 = vmatpush.bf16.msrb.mxu2 %v4791_v46  ;;  %v3416_v46 = vld [vmem:[#allocation5 + $0x48] sm:$0xf0] }
  0xe0   :  { %2833 = vmatpush.bf16.msrb.mxu3 %v4855_v50  ;;  %2795 = vmatmul.bf16.vlgmr.msrb.gmra.mxu0 %v5725_v62  ;;  %v5054_v50 = vld [vmem:[#allocation5 + $0x144] sm:$0xf]  ;;  %v3448_v16 = vld [vmem:[#allocation5 + $0x88] sm:$0xf0] }
  0xe1   :  { %2843 = vmatpush.bf16.msra.mxu0 %v4943_v51  ;;  %2808 = vmatmul.bf16.vlgmr.msrb.gmra.mxu1 %v5729_v7  ;;  %v3544_v51 = vld [vmem:[#allocation5 + $0x148] sm:$0xf0] }
  0xe2   :  { %2852 = vmatpush.bf16.msra.mxu1 %v3443_v56  ;;  %2821 = vmatmul.bf16.vlgmr.msrb.gmra.mxu2 %v5727_v4  ;;  %v3419_v56 = vor.u32 %v5022_v45, %v3416_v46  ;;  %v3547_v63 = vor.u32 %v5054_v50, %v3544_v51  ;;  %v3528_v45 = vld [vmem:[#allocation5 + $0x128] sm:$0xf0]  ;;  %v5072_v46 = vld [vmem:[#allocation5 + $0x1d4] sm:$0xf]  ;;  %v3403_v50 = vor.u32 %v5018_v23, %v3400_v29  ;;  %v3600_v29 = vld [vmem:[#allocation5 + $0x1b8] sm:$0xf0] }
  0xe3   :  { %2865 = vmatpush.bf16.msra.mxu2 %v3507_v57  ;;  %2834 = vmatmul.bf16.vlgmr.msrb.gmra.mxu3 %v5731_v10  ;;  %v3483_v57 = vor.u32 %v5038_v48, %v3480_v49  ;;  %v5068_v23 = vld [vmem:[#allocation5 + $0x1b4] sm:$0xf] }
  0xe4   :  { %2878 = vmatpush.bf16.msra.mxu3 %v3571_v61  ;;  %v2601_v61 = vpop.f32.mrf.mxu1 }
  0xe5   :  { %2844 = vmatpush.bf16.msra.mxu0 %v4935_v11  ;;  %v3536_v11 = vld [vmem:[#allocation5 + $0x138] sm:$0xf0]  ;;  %v2614_v3 = vpop.f32.mrf.mxu2  ;;  %v2590_v49 = vpop.f32.mrf.mxu0 }
  0xe6   :  { %2853 = vmatpush.bf16.msra.mxu1 %v3435_v12  ;;  %v2602_v12 = vadd.f32 %v2601_v61, %v2589_v58  ;;  %v3539_v30 = vor.u32 %v5052_v9, %v3536_v11  ;;  %v3456_v58 = vld [vmem:[#allocation5 + $0x98] sm:$0xf0]  ;;  %v5070_v61 = vld [vmem:[#allocation5 + $0x1c4] sm:$0xf]  ;;  %v3384_v9 = vld [vmem:[#allocation5 + $0x8] sm:$0xf0] }
  0xe7   :  { %2866 = vmatpush.bf16.msra.mxu2 %v3499_v13  ;;  %v5074_v13 = vld [vmem:[#allocation5 + $0x1e4] sm:$0xf] }
  0xe8   :  { %2879 = vmatpush.bf16.msra.mxu3 %v3563_v19  ;;  %v3475_v19 = vor.u32 %v5036_v2, %v3472_v8  ;;  %v3627_v31 = vor.u32 %v5074_v13, %v3624_v14  ;;  %v2615_v35 = vadd.f32 %v2614_v3, %v2602_v12  ;;  %v5014_v8 = vld [vmem:[#allocation5 + $0x4] sm:$0xf]  ;;  %v3523_v13 = vor.u32 %v5048_v59, %v3520_v60  ;;  %v3816_v59 = vld [vmem:[#allocation5 + $0x368] sm:$0xf0] }
  0xe9   :  { %2845 = vmatpush.bf16.msra.mxu0 %v4927_v36  ;;  %v5034_v36 = vld [vmem:[#allocation5 + $0xa4] sm:$0xf] }
  0xea   :  { %2854 = vmatpush.bf16.msra.mxu1 %v3427_v42  ;;  %v5050_v42 = vld [vmem:[#allocation5 + $0x124] sm:$0xf]  ;;  %v3467_v51 = vor.u32 %v5034_v36, %v3464_v40  ;;  %v3760_v36 = vld [vmem:[#allocation5 + $0x2f8] sm:$0xf0]  ;;  %v3387_v40 = vor.u32 %v5014_v8, %v3384_v9  ;;  %v5088_v8 = vld [vmem:[#allocation5 + $0x254] sm:$0xf] }
  0xeb   :  { %2867 = vmatpush.bf16.msra.mxu2 %v3491_v43  ;;  %v2627_v43 = vpop.f32.mrf.mxu3  ;;  %v3531_v55 = vor.u32 %v5050_v42, %v3528_v45  ;;  %v5030_v11 = vld [vmem:[#allocation5 + $0x84] sm:$0xf]  ;;  %v3824_v45 = vld [vmem:[#allocation5 + $0x378] sm:$0xf0] }
  0xec   :  { %2880 = vmatpush.bf16.msra.mxu3 %v3555_v47  ;;  %v3616_v47 = vld [vmem:[#allocation5 + $0x1d8] sm:$0xf0]  ;;  %v5740_v48 = vadd.f32 %v2627_v43, %v2615_v35  ;;  %v5108_v35 = vld [vmem:[#allocation5 + $0x2f4] sm:$0xf]  ;;  %v3451_v42 = vor.u32 %v5030_v11, %v3448_v16 }
  0xed   :  { %2846 = vmatpush.bf16.msra.mxu0 %v4919_v54  ;;  %v2603_v54 = vpop.f32.mrf.mxu1  ;;  %v2616_v12 = vpop.f32.mrf.mxu2  ;;  %v5124_v43 = vld [vmem:[#allocation5 + $0x374] sm:$0xf]  ;;  %v3680_v11 = vld [vmem:[#allocation5 + $0x258] sm:$0xf0] }
  0xee   :  { %2855 = vmatpush.bf16.msra.mxu1 %v3419_v56  ;;  %v3619_v56 = vor.u32 %v5072_v46, %v3616_v47  ;;  %v3603_v47 = vor.u32 %v5068_v23, %v3600_v29  ;;  %v3827_v54 = vor.u32 %v5124_v43, %v3824_v45  ;;  %v5104_v12 = vld [vmem:[#allocation5 + $0x2d4] sm:$0xf]  ;;  %v3808_v16 = vld [vmem:[#allocation5 + $0x358] sm:$0xf0]  ;;  %v3576_v29 = vld [vmem:[#allocation5 + $0x188] sm:$0xf0] }
  0xef   :  { %2868 = vmatpush.bf16.msra.mxu2 %v3483_v57  ;;  %v5032_v57 = vld [vmem:[#allocation5 + $0x94] sm:$0xf]  ;;  %v3800_v43 = vld [vmem:[#allocation5 + $0x348] sm:$0xf0]  ;;  %v3888_v45 = vld [vmem:[#allocation5 + $0x3f8] sm:$0xf0] }
  0xf0   :  { %2881 = vmatpush.bf16.msra.mxu3 %v3547_v63  ;;  %4948 = vmatmul.msk.bf16.vlgmr.msra.gmra.mxu0 %vm2523_vm0, %v5738_v44  ;;  %v3608_v63 = vld [vmem:[#allocation5 + $0x1c8] sm:$0xf0]  ;;  %v3459_v2 = vor.u32 %v5032_v57, %v3456_v58  ;;  %v5122_v58 = vld [vmem:[#allocation5 + $0x364] sm:$0xf] }
  0xf1   :  { %2891 = vmatpush.bf16.msrb.mxu0 %v3635_v1  ;;  %v3395_v1 = vor.u32 %v5016_v52, %v3392_v53  ;;  %v3611_v14 = vor.u32 %v5070_v61, %v3608_v63  ;;  %v3592_v52 = vld [vmem:[#allocation5 + $0x1a8] sm:$0xf0]  ;;  %v5090_v53 = vld [vmem:[#allocation5 + $0x264] sm:$0xf]  ;;  %v3819_v9 = vor.u32 %v5122_v58, %v3816_v59  ;;  %v5116_v58 = vld [vmem:[#allocation5 + $0x334] sm:$0xf] }
  0xf2   :  { %2856 = vmatpush.bf16.msra.mxu1 %v3411_v17  ;;  %v5046_v17 = vld [vmem:[#allocation5 + $0x104] sm:$0xf]  ;;  %v3752_v57 = vld [vmem:[#allocation5 + $0x2e8] sm:$0xf0]  ;;  %v3792_v59 = vld [vmem:[#allocation5 + $0x338] sm:$0xf0] }
  0xf3   :  { %2869 = vmatpush.bf16.msra.mxu2 %v3475_v19  ;;  %v3512_v19 = vld [vmem:[#allocation5 + $0x108] sm:$0xf0]  ;;  %v2629_v3 = vpop.f32.mrf.mxu3 }
  0xf4   :  { %2882 = vmatpush.bf16.msra.mxu3 %v3539_v30  ;;  %v5092_v30 = vld [vmem:[#allocation5 + $0x274] sm:$0xf]  ;;  %v3515_v46 = vor.u32 %v5046_v17, %v3512_v19  ;;  %v5062_v19 = vld [vmem:[#allocation5 + $0x184] sm:$0xf]  ;;  %v3683_v3 = vor.u32 %v5088_v8, %v3680_v11  ;;  %v3795_v8 = vor.u32 %v5116_v58, %v3792_v59  ;;  %v3768_v58 = vld [vmem:[#allocation5 + $0x308] sm:$0xf0] }
  0xf5   :  { %2892 = vmatpush.bf16.msrb.mxu0 %v3627_v31  ;;  %v3696_v31 = vld [vmem:[#allocation5 + $0x278] sm:$0xf0] }
  0xf6   :  { %2857 = vmatpush.bf16.msra.mxu1 %v3403_v50  ;;  %v3699_v49 = vor.u32 %v5092_v30, %v3696_v31  ;;  %v3763_v50 = vor.u32 %v5108_v35, %v3760_v36  ;;  %v5086_v30 = vld [vmem:[#allocation5 + $0x244] sm:$0xf]  ;;  %v3672_v31 = vld [vmem:[#allocation5 + $0x248] sm:$0xf0] }
  0xf7   :  { %2870 = vmatpush.bf16.msra.mxu2 %v3467_v51  ;;  %v5066_v51 = vld [vmem:[#allocation5 + $0x1a4] sm:$0xf] }
  0xf8   :  { %2883 = vmatpush.bf16.msra.mxu3 %v3531_v55  ;;  %v3688_v55 = vld [vmem:[#allocation5 + $0x268] sm:$0xf0]  ;;  %v3595_v60 = vor.u32 %v5066_v51, %v3592_v52  ;;  %v5102_v36 = vld [vmem:[#allocation5 + $0x2c4] sm:$0xf]  ;;  %v5084_v51 = vld [vmem:[#allocation5 + $0x234] sm:$0xf] }
  0xf9   :  { %2893 = vmatpush.bf16.msrb.mxu0 %v3619_v56  ;;  %v5106_v56 = vld [vmem:[#allocation5 + $0x2e4] sm:$0xf]  ;;  %v3691_v61 = vor.u32 %v5090_v53, %v3688_v55  ;;  %v3664_v52 = vld [vmem:[#allocation5 + $0x238] sm:$0xf0] }
  0xfa   :  { %2858 = vmatpush.bf16.msra.mxu1 %v3395_v1  ;;  %v3755_v63 = vor.u32 %v5106_v56, %v3752_v57  ;;  %v5064_v1 = vld [vmem:[#allocation5 + $0x194] sm:$0xf]  ;;  %v3728_v57 = vld [vmem:[#allocation5 + $0x2b8] sm:$0xf0] }
  0xfb   :  { %2871 = vmatpush.bf16.msra.mxu2 %v3459_v2  ;;  %v3584_v2 = vld [vmem:[#allocation5 + $0x198] sm:$0xf0]  ;;  %v5100_v56 = vld [vmem:[#allocation5 + $0x2b4] sm:$0xf] }
  0xfc   :  { %2884 = vmatpush.bf16.msra.mxu3 %v3523_v13  ;;  %v3744_v13 = vld [vmem:[#allocation5 + $0x2d8] sm:$0xf0]  ;;  %v3587_v17 = vor.u32 %v5064_v1, %v3584_v2  ;;  %v5082_v1 = vld [vmem:[#allocation5 + $0x224] sm:$0xf]  ;;  %v3656_v2 = vld [vmem:[#allocation5 + $0x228] sm:$0xf0] }
  0xfd   :  { %2894 = vmatpush.bf16.msrb.mxu0 %v3611_v14  ;;  %v5120_v14 = vld [vmem:[#allocation5 + $0x354] sm:$0xf]  ;;  %v3747_v23 = vor.u32 %v5104_v12, %v3744_v13  ;;  %v5098_v12 = vld [vmem:[#allocation5 + $0x2a4] sm:$0xf]  ;;  %v3720_v13 = vld [vmem:[#allocation5 + $0x2a8] sm:$0xf0] }
  0xfe   :  { %2859 = vmatpush.bf16.msra.mxu1 %v3387_v40  ;;  %v3811_v35 = vor.u32 %v5120_v14, %v3808_v16  ;;  %v5118_v40 = vld [vmem:[#allocation5 + $0x344] sm:$0xf] }
  0xff   :  { %2872 = vmatpush.bf16.msra.mxu2 %v3451_v42  ;;  %v2640_v42 = vpop.f32.mrf.mxu0  ;;  %v3803_v53 = vor.u32 %v5118_v40, %v3800_v43  ;;  %v5114_v14 = vld [vmem:[#allocation5 + $0x324] sm:$0xf]  ;;  %v3648_v40 = vld [vmem:[#allocation5 + $0x218] sm:$0xf0] }
 0x100   :  { %2885 = vmatpush.bf16.msra.mxu3 %v3515_v46  ;;  %v3579_v46 = vor.u32 %v5062_v19, %v3576_v29  ;;  %v3784_v19 = vld [vmem:[#allocation5 + $0x328] sm:$0xf0] }
 0x101   :  { %2895 = vmatpush.bf16.msrb.mxu0 %v3603_v47  ;;  %2860 = vmatmul.bf16.vlgmr.msra.gmra.mxu1 %v5665_v5  ;;  %v2641_v5 = vadd.f32 %v2640_v42, %v5740_v48  ;;  %v2653_v47 = vpop.f32.mrf.mxu1  ;;  %v3667_v48 = vor.u32 %v5084_v51, %v3664_v52  ;;  %v3787_v42 = vor.u32 %v5114_v14, %v3784_v19  ;;  %v5078_v51 = vld [vmem:[#allocation5 + $0x204] sm:$0xf]  ;;  %v3640_v52 = vld [vmem:[#allocation5 + $0x208] sm:$0xf0] }
 0x102   :  { %2904 = vmatpush.bf16.msrb.mxu1 %v3699_v49  ;;  %2873 = vmatmul.bf16.vlgmr.msra.gmra.mxu2 %v5671_v18  ;;  %v3736_v18 = vld [vmem:[#allocation5 + $0x2c8] sm:$0xf0]  ;;  %v3675_v49 = vor.u32 %v5086_v30, %v3672_v31 }
 0x103   :  { %2917 = vmatpush.bf16.msrb.mxu2 %v3763_v50  ;;  %2886 = vmatmul.bf16.vlgmr.msra.gmra.mxu3 %v5663_v0  ;;  %v5140_v0 = vld [vmem:[#allocation5 + $0x3f4] sm:$0xf]  ;;  %v3739_v50 = vor.u32 %v5102_v36, %v3736_v18  ;;  %v3723_v36 = vor.u32 %v5098_v12, %v3720_v13  ;;  %v4080_v13 = vld [vmem:[#allocation5 + $0x578] sm:$0xf0] }
 0x104   :  { %2930 = vmatpush.bf16.msrb.mxu3 %v3827_v54  ;;  %v2654_v54 = vadd.f32 %v2653_v47, %v2641_v5  ;;  %v3891_v55 = vor.u32 %v5140_v0, %v3888_v45  ;;  %v5080_v18 = vld [vmem:[#allocation5 + $0x214] sm:$0xf]  ;;  %v3712_v45 = vld [vmem:[#allocation5 + $0x298] sm:$0xf0]  ;;  %v5134_v47 = vld [vmem:[#allocation5 + $0x3c4] sm:$0xf] }
 0x105   :  { %2896 = vmatpush.bf16.msrb.mxu0 %v3595_v60  ;;  %v5138_v60 = vld [vmem:[#allocation5 + $0x3e4] sm:$0xf]  ;;  %v5096_v0 = vld [vmem:[#allocation5 + $0x294] sm:$0xf] }
 0x106   :  { %2905 = vmatpush.bf16.msrb.mxu1 %v3691_v61  ;;  %v3880_v61 = vld [vmem:[#allocation5 + $0x3e8] sm:$0xf0]  ;;  %v5112_v5 = vld [vmem:[#allocation5 + $0x314] sm:$0xf] }
 0x107   :  { %2918 = vmatpush.bf16.msrb.mxu2 %v3755_v63  ;;  %v3731_v63 = vor.u32 %v5100_v56, %v3728_v57  ;;  %v3883_v11 = vor.u32 %v5138_v60, %v3880_v61  ;;  %v2642_v29 = vpop.f32.mrf.mxu0  ;;  %v3704_v56 = vld [vmem:[#allocation5 + $0x288] sm:$0xf0]  ;;  %v5110_v57 = vld [vmem:[#allocation5 + $0x304] sm:$0xf]  ;;  %v5132_v60 = vld [vmem:[#allocation5 + $0x3b4] sm:$0xf] }
 0x108   :  { %2931 = vmatpush.bf16.msrb.mxu3 %v3819_v9  ;;  %v2666_v9 = vpop.f32.mrf.mxu2  ;;  %v3856_v61 = vld [vmem:[#allocation5 + $0x3b8] sm:$0xf0]  ;;  %v5188_v12 = vld [vmem:[#allocation5 + $0x574] sm:$0xf]  ;;  %v3771_v14 = vor.u32 %v5110_v57, %v3768_v58  ;;  %v5154_v29 = vld [vmem:[#allocation5 + $0x464] sm:$0xf] }
 0x109   :  { %2897 = vmatpush.bf16.msrb.mxu0 %v3587_v17  ;;  %v2667_v16 = vadd.f32 %v2666_v9, %v2654_v54  ;;  %v2679_v17 = vpop.f32.mrf.mxu3  ;;  %v2655_v30 = vpop.f32.mrf.mxu1  ;;  %v3643_v9 = vor.u32 %v5078_v51, %v3640_v52  ;;  %v4000_v51 = vld [vmem:[#allocation5 + $0x4d8] sm:$0xf0]  ;;  %v5184_v52 = vld [vmem:[#allocation5 + $0x554] sm:$0xf]  ;;  %v3832_v58 = vld [vmem:[#allocation5 + $0x388] sm:$0xf0] }
 0x10a   :  { %2906 = vmatpush.bf16.msrb.mxu1 %v3683_v3  ;;  %v5136_v3 = vld [vmem:[#allocation5 + $0x3d4] sm:$0xf]  ;;  %v4083_v30 = vor.u32 %v5188_v12, %v4080_v13 }
 0x10b   :  { %2919 = vmatpush.bf16.msrb.mxu2 %v3747_v23  ;;  %v3872_v23 = vld [vmem:[#allocation5 + $0x3d8] sm:$0xf0]  ;;  %v5749_v31 = vadd.f32 %v2679_v17, %v2667_v16  ;;  %v3859_v16 = vor.u32 %v5132_v60, %v3856_v61  ;;  %v5166_v61 = vld [vmem:[#allocation5 + $0x4c4] sm:$0xf] }
 0x10c   :  { %2932 = vmatpush.bf16.msrb.mxu3 %v3811_v35  ;;  %v3659_v35 = vor.u32 %v5082_v1, %v3656_v2  ;;  %v3875_v43 = vor.u32 %v5136_v3, %v3872_v23  ;;  %v3952_v1 = vld [vmem:[#allocation5 + $0x478] sm:$0xf0]  ;;  %v5172_v2 = vld [vmem:[#allocation5 + $0x4f4] sm:$0xf]  ;;  %v5130_v3 = vld [vmem:[#allocation5 + $0x3a4] sm:$0xf] }
 0x10d   :  { %2898 = vmatpush.bf16.msrb.mxu0 %v3579_v46  ;;  %v3776_v46 = vld [vmem:[#allocation5 + $0x318] sm:$0xf0]  ;;  %v3848_v23 = vld [vmem:[#allocation5 + $0x3a8] sm:$0xf0] }
 0x10e   :  { %2907 = vmatpush.bf16.msrb.mxu1 %v3675_v49  ;;  %v3651_v49 = vor.u32 %v5080_v18, %v3648_v40  ;;  %v3779_v54 = vor.u32 %v5112_v5, %v3776_v46  ;;  %v4008_v18 = vld [vmem:[#allocation5 + $0x4e8] sm:$0xf0]  ;;  %v5186_v40 = vld [vmem:[#allocation5 + $0x564] sm:$0xf]  ;;  %v5128_v5 = vld [vmem:[#allocation5 + $0x394] sm:$0xf] }
 0x10f   :  { %2920 = vmatpush.bf16.msrb.mxu2 %v3739_v50  ;;  %v3715_v50 = vor.u32 %v5096_v0, %v3712_v45  ;;  %v3840_v46 = vld [vmem:[#allocation5 + $0x398] sm:$0xf0] }
 0x110   :  { %2933 = vmatpush.bf16.msrb.mxu3 %v3803_v53  ;;  %2899 = vmatmul.bf16.vlgmr.msrb.gmra.mxu0 %v5667_v6  ;;  %v3864_v6 = vld [vmem:[#allocation5 + $0x3c8] sm:$0xf0]  ;;  %v5094_v53 = vld [vmem:[#allocation5 + $0x284] sm:$0xf]  ;;  %v2668_v59 = vpop.f32.mrf.mxu2 }
 0x111   :  { %2943 = vmatpush.bf16.msra.mxu0 %v3891_v55  ;;  %v3867_v55 = vor.u32 %v5134_v47, %v3864_v6  ;;  %v5152_v47 = vld [vmem:[#allocation5 + $0x454] sm:$0xf]  ;;  %v5150_v59 = vld [vmem:[#allocation5 + $0x444] sm:$0xf] }
 0x112   :  { %2908 = vmatpush.bf16.msrb.mxu1 %v3667_v48  ;;  %v5156_v48 = vld [vmem:[#allocation5 + $0x474] sm:$0xf] }
 0x113   :  { %2921 = vmatpush.bf16.msrb.mxu2 %v3731_v63  ;;  %v2681_v63 = vpop.f32.mrf.mxu3  ;;  %v3955_v17 = vor.u32 %v5156_v48, %v3952_v1  ;;  %v3992_v48 = vld [vmem:[#allocation5 + $0x4c8] sm:$0xf0] }
 0x114   :  { %2934 = vmatpush.bf16.msrb.mxu3 %v3795_v8  ;;  %v4016_v8 = vld [vmem:[#allocation5 + $0x4f8] sm:$0xf0]  ;;  %v5182_v63 = vld [vmem:[#allocation5 + $0x544] sm:$0xf]  ;;  %v4056_v1 = vld [vmem:[#allocation5 + $0x548] sm:$0xf0]  ;;  %v3995_v13 = vor.u32 %v5166_v61, %v3992_v48 }
 0x115   :  { %2944 = vmatpush.bf16.msra.mxu0 %v3883_v11  ;;  %v3707_v11 = vor.u32 %v5094_v53, %v3704_v56  ;;  %v4019_v19 = vor.u32 %v5172_v2, %v4016_v8  ;;  %v4064_v53 = vld [vmem:[#allocation5 + $0x558] sm:$0xf0] }
 0x116   :  { %2909 = vmatpush.bf16.msrb.mxu1 %v3659_v35  ;;  %v3944_v35 = vld [vmem:[#allocation5 + $0x468] sm:$0xf0]  ;;  %v4067_v60 = vor.u32 %v5184_v52, %v4064_v53  ;;  %v4144_v2 = vld [vmem:[#allocation5 + $0x5f8] sm:$0xf0]  ;;  %v5200_v52 = vld [vmem:[#allocation5 + $0x5d4] sm:$0xf] }
 0x117   :  { %2922 = vmatpush.bf16.msrb.mxu2 %v3723_v36  ;;  %v5170_v36 = vld [vmem:[#allocation5 + $0x4e4] sm:$0xf]  ;;  %v3947_v0 = vor.u32 %v5154_v29, %v3944_v35  ;;  %v3984_v29 = vld [vmem:[#allocation5 + $0x4b8] sm:$0xf0] }
 0x118   :  { %2935 = vmatpush.bf16.msrb.mxu3 %v3787_v42  ;;  %v4072_v42 = vld [vmem:[#allocation5 + $0x568] sm:$0xf0]  ;;  %v4011_v45 = vor.u32 %v5170_v36, %v4008_v18  ;;  %v4048_v35 = vld [vmem:[#allocation5 + $0x538] sm:$0xf0]  ;;  %v5202_v36 = vld [vmem:[#allocation5 + $0x5e4] sm:$0xf] }
 0x119   :  { %2945 = vmatpush.bf16.msra.mxu0 %v3875_v43  ;;  %v3851_v43 = vor.u32 %v5130_v3, %v3848_v23  ;;  %v4075_v6 = vor.u32 %v5186_v40, %v4072_v42  ;;  %v5164_v23 = vld [vmem:[#allocation5 + $0x4b4] sm:$0xf]  ;;  %v4136_v18 = vld [vmem:[#allocation5 + $0x5e8] sm:$0xf0]  ;;  %v5146_v42 = vld [vmem:[#allocation5 + $0x424] sm:$0xf] }
 0x11a   :  { %2910 = vmatpush.bf16.msrb.mxu1 %v3651_v49  ;;  %v3936_v49 = vld [vmem:[#allocation5 + $0x458] sm:$0xf0]  ;;  %v3987_v40 = vor.u32 %v5164_v23, %v3984_v29  ;;  %v5196_v23 = vld [vmem:[#allocation5 + $0x5b4] sm:$0xf] }
 0x11b   :  { %2923 = vmatpush.bf16.msrb.mxu2 %v3715_v50  ;;  %v5168_v50 = vld [vmem:[#allocation5 + $0x4d4] sm:$0xf]  ;;  %v3939_v56 = vor.u32 %v5152_v47, %v3936_v49  ;;  %v3976_v47 = vld [vmem:[#allocation5 + $0x4a8] sm:$0xf0]  ;;  %v4128_v53 = vld [vmem:[#allocation5 + $0x5d8] sm:$0xf0] }
 0x11c   :  { %2936 = vmatpush.bf16.msrb.mxu3 %v3779_v54  ;;  %v3843_v54 = vor.u32 %v5128_v5, %v3840_v46  ;;  %v4003_v57 = vor.u32 %v5168_v50, %v4000_v51  ;;  %v4139_v5 = vor.u32 %v5202_v36, %v4136_v18  ;;  %v5162_v46 = vld [vmem:[#allocation5 + $0x4a4] sm:$0xf]  ;;  %v4040_v51 = vld [vmem:[#allocation5 + $0x528] sm:$0xf0]  ;;  %v4131_v61 = vor.u32 %v5200_v52, %v4128_v53  ;;  %v3968_v48 = vld [vmem:[#allocation5 + $0x498] sm:$0xf0] }
 0x11d   :  { %2946 = vmatpush.bf16.msra.mxu0 %v3867_v55  ;;  %v5126_v55 = vld [vmem:[#allocation5 + $0x384] sm:$0xf]  ;;  %v4112_v29 = vld [vmem:[#allocation5 + $0x5b8] sm:$0xf0]  ;;  %v5236_v18 = vld [vmem:[#allocation5 + $0x6f4] sm:$0xf] }
 0x11e   :  { %2911 = vmatpush.bf16.msrb.mxu1 %v3643_v9  ;;  %v3835_v9 = vor.u32 %v5126_v55, %v3832_v58  ;;  %v3979_v58 = vor.u32 %v5162_v46, %v3976_v47  ;;  %v4208_v36 = vld [vmem:[#allocation5 + $0x678] sm:$0xf0]  ;;  %v4200_v52 = vld [vmem:[#allocation5 + $0x668] sm:$0xf0]  ;;  %v5234_v53 = vld [vmem:[#allocation5 + $0x6e4] sm:$0xf] }
 0x11f   :  { %2924 = vmatpush.bf16.msrb.mxu2 %v3707_v11  ;;  %v2705_v11 = vpop.f32.mrf.mxu1 }
 0x120   :  { %2937 = vmatpush.bf16.msrb.mxu3 %v3771_v14  ;;  %v5148_v14 = vld [vmem:[#allocation5 + $0x434] sm:$0xf] }
 0x121   :  { %2947 = vmatpush.bf16.msra.mxu0 %v3859_v16  ;;  %2912 = vmatmul.bf16.vlgmr.msrb.gmra.mxu1 %v5677_v38  ;;  %v5204_v38 = vld [vmem:[#allocation5 + $0x5f4] sm:$0xf]  ;;  %v3920_v16 = vld [vmem:[#allocation5 + $0x438] sm:$0xf0] }
 0x122   :  { %2956 = vmatpush.bf16.msra.mxu1 %v3955_v17  ;;  %2925 = vmatmul.bf16.vlgmr.msrb.gmra.mxu2 %v5681_v41  ;;  %v3928_v41 = vld [vmem:[#allocation5 + $0x448] sm:$0xf0]  ;;  %v4059_v17 = vor.u32 %v5182_v63, %v4056_v1  ;;  %v4147_v3 = vor.u32 %v5204_v38, %v4144_v2  ;;  %v5176_v63 = vld [vmem:[#allocation5 + $0x514] sm:$0xf]  ;;  %v5198_v1 = vld [vmem:[#allocation5 + $0x5c4] sm:$0xf] }
 0x123   :  { %2969 = vmatpush.bf16.msra.mxu2 %v4019_v19  ;;  %2938 = vmatmul.bf16.vlgmr.msrb.gmra.mxu3 %v5675_v32  ;;  %v2692_v32 = vpop.f32.mrf.mxu0  ;;  %v3931_v12 = vor.u32 %v5150_v59, %v3928_v41  ;;  %v5144_v59 = vld [vmem:[#allocation5 + $0x414] sm:$0xf]  ;;  %v3904_v41 = vld [vmem:[#allocation5 + $0x418] sm:$0xf0]  ;;  %v4120_v38 = vld [vmem:[#allocation5 + $0x5c8] sm:$0xf0] }
 0x124   :  { %2982 = vmatpush.bf16.msra.mxu3 %v4083_v30  ;;  %v2693_v8 = vadd.f32 %v2692_v32, %v5749_v31  ;;  %v5180_v30 = vld [vmem:[#allocation5 + $0x534] sm:$0xf]  ;;  %v3923_v31 = vor.u32 %v5148_v14, %v3920_v16  ;;  %v4032_v32 = vld [vmem:[#allocation5 + $0x518] sm:$0xf0]  ;;  %v3907_v2 = vor.u32 %v5144_v59, %v3904_v41  ;;  %v4123_v14 = vor.u32 %v5198_v1, %v4120_v38  ;;  %v3960_v16 = vld [vmem:[#allocation5 + $0x488] sm:$0xf0] }
 0x125   :  { %2948 = vmatpush.bf16.msra.mxu0 %v3851_v43  ;;  %v3912_v43 = vld [vmem:[#allocation5 + $0x428] sm:$0xf0]  ;;  %v4256_v1 = vld [vmem:[#allocation5 + $0x6d8] sm:$0xf0]  ;;  %v5248_v38 = vld [vmem:[#allocation5 + $0x754] sm:$0xf] }
 0x126   :  { %2957 = vmatpush.bf16.msra.mxu1 %v3947_v0  ;;  %v2706_v19 = vadd.f32 %v2705_v11, %v2693_v8  ;;  %v4051_v0 = vor.u32 %v5180_v30, %v4048_v35  ;;  %v2731_v50 = vpop.f32.mrf.mxu3  ;;  %v3896_v11 = vld [vmem:[#allocation5 + $0x408] sm:$0xf0]  ;;  %v5220_v30 = vld [vmem:[#allocation5 + $0x674] sm:$0xf] }
 0x127   :  { %2970 = vmatpush.bf16.msra.mxu2 %v4011_v45  ;;  %v2718_v45 = vpop.f32.mrf.mxu2  ;;  %v2707_v55 = vpop.f32.mrf.mxu1  ;;  %v4211_v46 = vor.u32 %v5220_v30, %v4208_v36 }
 0x128   :  { %2983 = vmatpush.bf16.msra.mxu3 %v4075_v6  ;;  %v5178_v6 = vld [vmem:[#allocation5 + $0x524] sm:$0xf]  ;;  %v2719_v49 = vadd.f32 %v2718_v45, %v2706_v19  ;;  %v4024_v19 = vld [vmem:[#allocation5 + $0x508] sm:$0xf0] }
 0x129   :  { %2949 = vmatpush.bf16.msra.mxu0 %v3843_v54  ;;  %v5250_v55 = vld [vmem:[#allocation5 + $0x764] sm:$0xf] }
 0x12a   :  { %2958 = vmatpush.bf16.msra.mxu1 %v3939_v56  ;;  %v5756_v56 = vadd.f32 %v2731_v50, %v2719_v49  ;;  %v4104_v49 = vld [vmem:[#allocation5 + $0x5a8] sm:$0xf0]  ;;  %v5218_v50 = vld [vmem:[#allocation5 + $0x664] sm:$0xf] }
 0x12b   :  { %2971 = vmatpush.bf16.msra.mxu2 %v4003_v57  ;;  %v2694_v54 = vpop.f32.mrf.mxu0  ;;  %v3915_v57 = vor.u32 %v5146_v42, %v3912_v43  ;;  %v5252_v43 = vld [vmem:[#allocation5 + $0x774] sm:$0xf]  ;;  %v4203_v59 = vor.u32 %v5218_v50, %v4200_v52  ;;  %v4392_v50 = vld [vmem:[#allocation5 + $0x7e8] sm:$0xf0]  ;;  %v5210_v52 = vld [vmem:[#allocation5 + $0x624] sm:$0xf] }
 0x12c   :  { %2984 = vmatpush.bf16.msra.mxu3 %v4067_v60  ;;  %v4043_v60 = vor.u32 %v5178_v6, %v4040_v51  ;;  %v5194_v6 = vld [vmem:[#allocation5 + $0x5a4] sm:$0xf]  ;;  %v4264_v54 = vld [vmem:[#allocation5 + $0x6e8] sm:$0xf0] }
 0x12d   :  { %2950 = vmatpush.bf16.msra.mxu0 %v3835_v9  ;;  %v5142_v9 = vld [vmem:[#allocation5 + $0x404] sm:$0xf]  ;;  %v4267_v41 = vor.u32 %v5234_v53, %v4264_v54  ;;  %v4168_v53 = vld [vmem:[#allocation5 + $0x628] sm:$0xf0] }
 0x12e   :  { %2959 = vmatpush.bf16.msra.mxu1 %v3931_v12  ;;  %v5158_v12 = vld [vmem:[#allocation5 + $0x484] sm:$0xf]  ;;  %v2733_v35 = vpop.f32.mrf.mxu3 }
 0x12f   :  { %2972 = vmatpush.bf16.msra.mxu2 %v3995_v13  ;;  %v4035_v13 = vor.u32 %v5176_v63, %v4032_v32  ;;  %v3963_v42 = vor.u32 %v5158_v12, %v3960_v16  ;;  %v4192_v63 = vld [vmem:[#allocation5 + $0x658] sm:$0xf0]  ;;  %v5232_v32 = vld [vmem:[#allocation5 + $0x6d4] sm:$0xf] }
 0x130   :  { %2985 = vmatpush.bf16.msra.mxu3 %v4059_v17  ;;  %2951 = vmatmul.bf16.vlgmr.msra.gmra.mxu0 %v5679_v39  ;;  %v5160_v39 = vld [vmem:[#allocation5 + $0x494] sm:$0xf]  ;;  %v5174_v17 = vld [vmem:[#allocation5 + $0x504] sm:$0xf]  ;;  %v4259_v12 = vor.u32 %v5232_v32, %v4256_v1 }
 0x131   :  { %2995 = vmatpush.bf16.msrb.mxu0 %v4147_v3  ;;  %v3971_v8 = vor.u32 %v5160_v39, %v3968_v48  ;;  %v2720_v3 = vpop.f32.mrf.mxu2  ;;  %v4027_v45 = vor.u32 %v5174_v17, %v4024_v19  ;;  %v5216_v39 = vld [vmem:[#allocation5 + $0x654] sm:$0xf]  ;;  %v5230_v17 = vld [vmem:[#allocation5 + $0x6c4] sm:$0xf]  ;;  %v4248_v19 = vld [vmem:[#allocation5 + $0x6c8] sm:$0xf0] }
 0x132   :  { %2960 = vmatpush.bf16.msra.mxu1 %v3923_v31  ;;  %v4272_v31 = vld [vmem:[#allocation5 + $0x6f8] sm:$0xf0]  ;;  %v5246_v3 = vld [vmem:[#allocation5 + $0x744] sm:$0xf] }
 0x133   :  { %2973 = vmatpush.bf16.msra.mxu2 %v3987_v40  ;;  %v3899_v40 = vor.u32 %v5142_v9, %v3896_v11  ;;  %v4275_v47 = vor.u32 %v5236_v18, %v4272_v31  ;;  %v5190_v9 = vld [vmem:[#allocation5 + $0x584] sm:$0xf]  ;;  %v4195_v11 = vor.u32 %v5216_v39, %v4192_v63  ;;  %v4251_v31 = vor.u32 %v5230_v17, %v4248_v19  ;;  %v4296_v39 = vld [vmem:[#allocation5 + $0x728] sm:$0xf0]  ;;  %v4384_v63 = vld [vmem:[#allocation5 + $0x7d8] sm:$0xf0] }
 0x134   :  { %2986 = vmatpush.bf16.msra.mxu3 %v4051_v0  ;;  %v4336_v0 = vld [vmem:[#allocation5 + $0x778] sm:$0xf0]  ;;  %v5262_v17 = vld [vmem:[#allocation5 + $0x7c4] sm:$0xf]  ;;  %v4376_v19 = vld [vmem:[#allocation5 + $0x7c8] sm:$0xf0] }
 0x135   :  { %2996 = vmatpush.bf16.msrb.mxu0 %v4139_v5  ;;  %v4115_v5 = vor.u32 %v5196_v23, %v4112_v29  ;;  %v4339_v51 = vor.u32 %v5252_v43, %v4336_v0  ;;  %v4312_v23 = vld [vmem:[#allocation5 + $0x748] sm:$0xf0]  ;;  %v4400_v29 = vld [vmem:[#allocation5 + $0x7f8] sm:$0xf0] }
 0x136   :  { %2961 = vmatpush.bf16.msra.mxu1 %v3915_v57  ;;  %v4328_v57 = vld [vmem:[#allocation5 + $0x768] sm:$0xf0]  ;;  %v4315_v43 = vor.u32 %v5246_v3, %v4312_v23  ;;  %v5206_v23 = vld [vmem:[#allocation5 + $0x604] sm:$0xf] }
 0x137   :  { %2974 = vmatpush.bf16.msra.mxu2 %v3979_v58  ;;  %v4107_v58 = vor.u32 %v5194_v6, %v4104_v49  ;;  %v4331_v48 = vor.u32 %v5250_v55, %v4328_v57  ;;  %v4304_v6 = vld [vmem:[#allocation5 + $0x738] sm:$0xf0]  ;;  %v5266_v49 = vld [vmem:[#allocation5 + $0x7e4] sm:$0xf] }
 0x138   :  { %2987 = vmatpush.bf16.msra.mxu3 %v4043_v60  ;;  %v5192_v60 = vld [vmem:[#allocation5 + $0x594] sm:$0xf]  ;;  %v4395_v57 = vor.u32 %v5266_v49, %v4392_v50 }
 0x139   :  { %2997 = vmatpush.bf16.msrb.mxu0 %v4131_v61  ;;  %v4096_v61 = vld [vmem:[#allocation5 + $0x598] sm:$0xf0]  ;;  %v5316_v50 = vld [vmem:[#allocation5 + $0x974] sm:$0xf] }
 0x13a   :  { %2962 = vmatpush.bf16.msra.mxu1 %v3907_v2  ;;  %v4320_v2 = vld [vmem:[#allocation5 + $0x758] sm:$0xf0] }
 0x13b   :  { %2975 = vmatpush.bf16.msra.mxu2 %v3971_v8  ;;  %v4099_v8 = vor.u32 %v5192_v60, %v4096_v61  ;;  %v4323_v16 = vor.u32 %v5248_v38, %v4320_v2  ;;  %v4171_v2 = vor.u32 %v5210_v52, %v4168_v53 }
 0x13c   :  { %2988 = vmatpush.bf16.msra.mxu3 %v4035_v13  ;;  %v4088_v13 = vld [vmem:[#allocation5 + $0x588] sm:$0xf0] }
 0x13d   :  { %2998 = vmatpush.bf16.msrb.mxu0 %v4123_v14  ;;  %v5214_v14 = vld [vmem:[#allocation5 + $0x644] sm:$0xf]  ;;  %v4091_v35 = vor.u32 %v5190_v9, %v4088_v13  ;;  %v5208_v9 = vld [vmem:[#allocation5 + $0x614] sm:$0xf] }
 0x13e   :  { %2963 = vmatpush.bf16.msra.mxu1 %v3899_v40  ;;  %v2757_v36 = vpop.f32.mrf.mxu1  ;;  %v5212_v40 = vld [vmem:[#allocation5 + $0x634] sm:$0xf] }
 0x13f   :  { %2976 = vmatpush.bf16.msra.mxu2 %v3963_v42  ;;  %v4176_v42 = vld [vmem:[#allocation5 + $0x638] sm:$0xf0] }
 0x140   :  { %2989 = vmatpush.bf16.msra.mxu3 %v4027_v45 }
 0x141   :  { %2999 = vmatpush.bf16.msrb.mxu0 %v4115_v5  ;;  %2964 = vmatmul.bf16.vlgmr.msra.gmra.mxu1 %v5687_v20  ;;  %v4184_v20 = vld [vmem:[#allocation5 + $0x648] sm:$0xf0]  ;;  %v5228_v5 = vld [vmem:[#allocation5 + $0x6b4] sm:$0xf] }
 0x142   :  { %3008 = vmatpush.bf16.msrb.mxu1 %v4211_v46  ;;  %2977 = vmatmul.bf16.vlgmr.msra.gmra.mxu2 %v5691_v25  ;;  %v2744_v25 = vpop.f32.mrf.mxu0  ;;  %v4187_v18 = vor.u32 %v5214_v14, %v4184_v20  ;;  %v4240_v46 = vld [vmem:[#allocation5 + $0x6b8] sm:$0xf0]  ;;  %v5240_v20 = vld [vmem:[#allocation5 + $0x714] sm:$0xf] }
 0x143   :  { %3021 = vmatpush.bf16.msrb.mxu2 %v4275_v47  ;;  %2990 = vmatmul.bf16.vlgmr.msra.gmra.mxu3 %v5689_v24  ;;  %v5268_v24 = vld [vmem:[#allocation5 + $0x7f4] sm:$0xf]  ;;  %v2745_v30 = vadd.f32 %v2744_v25, %v5756_v56  ;;  %v4179_v56 = vor.u32 %v5212_v40, %v4176_v42  ;;  %v4224_v14 = vld [vmem:[#allocation5 + $0x698] sm:$0xf0] }
 0x144   :  { %3034 = vmatpush.bf16.msrb.mxu3 %v4339_v51  ;;  %v4403_v45 = vor.u32 %v5268_v24, %v4400_v29  ;;  %v5244_v47 = vld [vmem:[#allocation5 + $0x734] sm:$0xf]  ;;  %v4243_v51 = vor.u32 %v5228_v5, %v4240_v46  ;;  %v4152_v24 = vld [vmem:[#allocation5 + $0x608] sm:$0xf0]  ;;  %v5222_v29 = vld [vmem:[#allocation5 + $0x684] sm:$0xf] }
 0x145   :  { %3000 = vmatpush.bf16.msrb.mxu0 %v4107_v58  ;;  %v2758_v0 = vadd.f32 %v2757_v36, %v2745_v30  ;;  %v4307_v54 = vor.u32 %v5244_v47, %v4304_v6  ;;  %v2770_v55 = vpop.f32.mrf.mxu2  ;;  %v5226_v58 = vld [vmem:[#allocation5 + $0x6a4] sm:$0xf]  ;;  %v4216_v36 = vld [vmem:[#allocation5 + $0x688] sm:$0xf0]  ;;  %v5260_v42 = vld [vmem:[#allocation5 + $0x7b4] sm:$0xf]  ;;  %v4155_v6 = vor.u32 %v5206_v23, %v4152_v24 }
 0x146   :  { %3009 = vmatpush.bf16.msrb.mxu1 %v4203_v59  ;;  %v4232_v59 = vld [vmem:[#allocation5 + $0x6a8] sm:$0xf0]  ;;  %v2783_v61 = vpop.f32.mrf.mxu3  ;;  %v2759_v1 = vpop.f32.mrf.mxu1  ;;  %v4464_v5 = vld [vmem:[#allocation5 + $0x878] sm:$0xf0]  ;;  %v5300_v46 = vld [vmem:[#allocation5 + $0x8f4] sm:$0xf]  ;;  %v4219_v49 = vor.u32 %v5222_v29, %v4216_v36 }
 0x147   :  { %3022 = vmatpush.bf16.msrb.mxu2 %v4267_v41  ;;  %v5242_v41 = vld [vmem:[#allocation5 + $0x724] sm:$0xf]  ;;  %v2771_v60 = vadd.f32 %v2770_v55, %v2758_v0  ;;  %v5284_v0 = vld [vmem:[#allocation5 + $0x874] sm:$0xf]  ;;  %v4528_v47 = vld [vmem:[#allocation5 + $0x8f8] sm:$0xf0] }
 0x148   :  { %3035 = vmatpush.bf16.msrb.mxu3 %v4331_v48  ;;  %v5264_v48 = vld [vmem:[#allocation5 + $0x7d4] sm:$0xf]  ;;  %v4467_v53 = vor.u32 %v5284_v0, %v4464_v5  ;;  %v5258_v55 = vld [vmem:[#allocation5 + $0x7a4] sm:$0xf]  ;;  %v4568_v36 = vld [vmem:[#allocation5 + $0x948] sm:$0xf0] }
 0x149   :  { %3001 = vmatpush.bf16.msrb.mxu0 %v4099_v8  ;;  %v5763_v38 = vadd.f32 %v2783_v61, %v2771_v60  ;;  %v4235_v8 = vor.u32 %v5226_v58, %v4232_v59  ;;  %v4387_v13 = vor.u32 %v5264_v48, %v4384_v63  ;;  %v5282_v58 = vld [vmem:[#allocation5 + $0x864] sm:$0xf]  ;;  %v4520_v61 = vld [vmem:[#allocation5 + $0x8e8] sm:$0xf0]  ;;  %v4432_v5 = vld [vmem:[#allocation5 + $0x838] sm:$0xf0] }
 0x14a   :  { %3010 = vmatpush.bf16.msrb.mxu1 %v4195_v11  ;;  %v2746_v32 = vpop.f32.mrf.mxu0  ;;  %v4160_v11 = vld [vmem:[#allocation5 + $0x618] sm:$0xf0]  ;;  %v5298_v60 = vld [vmem:[#allocation5 + $0x8e4] sm:$0xf]  ;;  %v4584_v48 = vld [vmem:[#allocation5 + $0x968] sm:$0xf0] }
 0x14b   :  { %3023 = vmatpush.bf16.msrb.mxu2 %v4259_v12  ;;  %v4299_v12 = vor.u32 %v5242_v41, %v4296_v39  ;;  %v4163_v3 = vor.u32 %v5208_v9, %v4160_v11  ;;  %v4456_v41 = vld [vmem:[#allocation5 + $0x868] sm:$0xf0]  ;;  %v5314_v39 = vld [vmem:[#allocation5 + $0x964] sm:$0xf]  ;;  %v4523_v1 = vor.u32 %v5298_v60, %v4520_v61  ;;  %v5280_v9 = vld [vmem:[#allocation5 + $0x854] sm:$0xf] }
 0x14c   :  { %3036 = vmatpush.bf16.msrb.mxu3 %v4323_v16  ;;  %v4288_v16 = vld [vmem:[#allocation5 + $0x718] sm:$0xf0]  ;;  %v4459_v32 = vor.u32 %v5282_v58, %v4456_v41  ;;  %v4587_v11 = vor.u32 %v5314_v39, %v4584_v48  ;;  %v5278_v23 = vld [vmem:[#allocation5 + $0x844] sm:$0xf]  ;;  %v4488_v61 = vld [vmem:[#allocation5 + $0x8a8] sm:$0xf0] }
 0x14d   :  { %3002 = vmatpush.bf16.msrb.mxu0 %v4091_v35  ;;  %v4291_v30 = vor.u32 %v5240_v20, %v4288_v16  ;;  %v4379_v35 = vor.u32 %v5262_v17, %v4376_v19  ;;  %v2772_v40 = vpop.f32.mrf.mxu2  ;;  %v4576_v20 = vld [vmem:[#allocation5 + $0x958] sm:$0xf0]  ;;  %v5254_v17 = vld [vmem:[#allocation5 + $0x784] sm:$0xf] }
 0x14e   :  { %3011 = vmatpush.bf16.msrb.mxu1 %v4187_v18  ;;  %v5238_v18 = vld [vmem:[#allocation5 + $0x704] sm:$0xf] }
 0x14f   :  { %3024 = vmatpush.bf16.msrb.mxu2 %v4251_v31  ;;  %v4280_v31 = vld [vmem:[#allocation5 + $0x708] sm:$0xf0]  ;;  %v5294_v29 = vld [vmem:[#allocation5 + $0x8c4] sm:$0xf] }
 0x150   :  { %3037 = vmatpush.bf16.msrb.mxu3 %v4315_v43  ;;  %3003 = vmatmul.bf16.vlgmr.msrb.gmra.mxu0 %v5693_v28  ;;  %v5224_v28 = vld [vmem:[#allocation5 + $0x694] sm:$0xf]  ;;  %v4368_v43 = vld [vmem:[#allocation5 + $0x7b8] sm:$0xf0]  ;;  %v5290_v60 = vld [vmem:[#allocation5 + $0x8a4] sm:$0xf] }
 0x151   :  { %3047 = vmatpush.bf16.msra.mxu0 %v4403_v45  ;;  %v4227_v25 = vor.u32 %v5224_v28, %v4224_v14  ;;  %v2785_v45 = vpop.f32.mrf.mxu3  ;;  %v4371_v52 = vor.u32 %v5260_v42, %v4368_v43  ;;  %v4512_v28 = vld [vmem:[#allocation5 + $0x8d8] sm:$0xf0]  ;;  %v5312_v14 = vld [vmem:[#allocation5 + $0x954] sm:$0xf]  ;;  %v5306_v39 = vld [vmem:[#allocation5 + $0x924] sm:$0xf] }
 0x152   :  { %3012 = vmatpush.bf16.msrb.mxu1 %v4179_v56  ;;  %v4592_v56 = vld [vmem:[#allocation5 + $0x978] sm:$0xf0]  ;;  %v4579_v24 = vor.u32 %v5312_v14, %v4576_v20  ;;  %v5276_v45 = vld [vmem:[#allocation5 + $0x834] sm:$0xf] }
 0x153   :  { %3025 = vmatpush.bf16.msrb.mxu2 %v4243_v51  ;;  %v4283_v51 = vor.u32 %v5238_v18, %v4280_v31  ;;  %v4595_v59 = vor.u32 %v5316_v50, %v4592_v56  ;;  %v4656_v18 = vld [vmem:[#allocation5 + $0x9f8] sm:$0xf0]  ;;  %v5308_v56 = vld [vmem:[#allocation5 + $0x934] sm:$0xf] }
 0x154   :  { %3038 = vmatpush.bf16.msrb.mxu3 %v4307_v54  ;;  %v4531_v54 = vor.u32 %v5300_v46, %v4528_v47  ;;  %v4496_v50 = vld [vmem:[#allocation5 + $0x8b8] sm:$0xf0] }
 0x155   :  { %3048 = vmatpush.bf16.msra.mxu0 %v4395_v57  ;;  %v4360_v57 = vld [vmem:[#allocation5 + $0x7a8] sm:$0xf0]  ;;  %v4416_v14 = vld [vmem:[#allocation5 + $0x818] sm:$0xf0] }
 0x156   :  { %3013 = vmatpush.bf16.msrb.mxu1 %v4171_v2  ;;  %v4363_v63 = vor.u32 %v5258_v55, %v4360_v57  ;;  %v5256_v2 = vld [vmem:[#allocation5 + $0x794] sm:$0xf]  ;;  %v5274_v55 = vld [vmem:[#allocation5 + $0x824] sm:$0xf]  ;;  %v4424_v57 = vld [vmem:[#allocation5 + $0x828] sm:$0xf0] }
 0x157   :  { %3026 = vmatpush.bf16.msrb.mxu2 %v4235_v8  ;;  %v4352_v8 = vld [vmem:[#allocation5 + $0x798] sm:$0xf0] }
 0x158   :  { %3039 = vmatpush.bf16.msrb.mxu3 %v4299_v12  ;;  %v4448_v12 = vld [vmem:[#allocation5 + $0x858] sm:$0xf0]  ;;  %v4355_v16 = vor.u32 %v5256_v2, %v4352_v8  ;;  %v5328_v2 = vld [vmem:[#allocation5 + $0x9d4] sm:$0xf] }
 0x159   :  { %3049 = vmatpush.bf16.msra.mxu0 %v4387_v13  ;;  %v5296_v13 = vld [vmem:[#allocation5 + $0x8d4] sm:$0xf]  ;;  %v4451_v19 = vor.u32 %v5280_v9, %v4448_v12  ;;  %v4640_v8 = vld [vmem:[#allocation5 + $0x9d8] sm:$0xf0]  ;;  %v4427_v12 = vor.u32 %v5274_v55, %v4424_v57  ;;  %v5322_v55 = vld [vmem:[#allocation5 + $0x9a4] sm:$0xf] }
 0x15a   :  { %3014 = vmatpush.bf16.msrb.mxu1 %v4163_v3  ;;  %v4515_v3 = vor.u32 %v5296_v13, %v4512_v28  ;;  %v4491_v13 = vor.u32 %v5290_v60, %v4488_v61  ;;  %v5272_v28 = vld [vmem:[#allocation5 + $0x814] sm:$0xf]  ;;  %v4616_v57 = vld [vmem:[#allocation5 + $0x9a8] sm:$0xf0]  ;;  %v5362_v60 = vld [vmem:[#allocation5 + $0xae4] sm:$0xf] }
 0x15b   :  { %3027 = vmatpush.bf16.msrb.mxu2 %v4227_v25  ;;  %v4344_v25 = vld [vmem:[#allocation5 + $0x788] sm:$0xf0] }
 0x15c   :  { %3040 = vmatpush.bf16.msrb.mxu3 %v4291_v30  ;;  %v4504_v30 = vld [vmem:[#allocation5 + $0x8c8] sm:$0xf0]  ;;  %v4347_v40 = vor.u32 %v5254_v17, %v4344_v25  ;;  %v4480_v17 = vld [vmem:[#allocation5 + $0x898] sm:$0xf0]  ;;  %v5326_v25 = vld [vmem:[#allocation5 + $0x9c4] sm:$0xf] }
 0x15d   :  { %3050 = vmatpush.bf16.msra.mxu0 %v4379_v35  ;;  %v5310_v35 = vld [vmem:[#allocation5 + $0x944] sm:$0xf]  ;;  %v4507_v0 = vor.u32 %v5294_v29, %v4504_v30  ;;  %v4408_v30 = vld [vmem:[#allocation5 + $0x808] sm:$0xf0] }
 0x15e   :  { %3015 = vmatpush.bf16.msrb.mxu1 %v4155_v6  ;;  %v2809_v42 = vpop.f32.mrf.mxu1  ;;  %v4571_v46 = vor.u32 %v5310_v35, %v4568_v36  ;;  %v5270_v29 = vld [vmem:[#allocation5 + $0x804] sm:$0xf]  ;;  %v4776_v61 = vld [vmem:[#allocation5 + $0xae8] sm:$0xf0] }
 0x15f   :  { %3028 = vmatpush.bf16.msrb.mxu2 %v4219_v49  ;;  %v5292_v49 = vld [vmem:[#allocation5 + $0x8b4] sm:$0xf]  ;;  %v5286_v35 = vld [vmem:[#allocation5 + $0x884] sm:$0xf] }
 0x160   :  { %3041 = vmatpush.bf16.msrb.mxu3 %v4283_v51  ;;  %v4560_v51 = vld [vmem:[#allocation5 + $0x938] sm:$0xf0] }
 0x161   :  { %3051 = vmatpush.bf16.msra.mxu0 %v4371_v52  ;;  %3016 = vmatmul.bf16.vlgmr.msrb.gmra.mxu1 %v5699_v15  ;;  %v4440_v15 = vld [vmem:[#allocation5 + $0x848] sm:$0xf0]  ;;  %v5330_v52 = vld [vmem:[#allocation5 + $0x9e4] sm:$0xf]  ;;  %v4563_v58 = vor.u32 %v5308_v56, %v4560_v51  ;;  %v5380_v56 = vld [vmem:[#allocation5 + $0xb74] sm:$0xf] }
 0x162   :  { %3060 = vmatpush.bf16.msra.mxu1 %v4467_v53  ;;  %3029 = vmatmul.bf16.vlgmr.msrb.gmra.mxu2 %v5703_v22  ;;  %v2796_v22 = vpop.f32.mrf.mxu0  ;;  %v4443_v43 = vor.u32 %v5278_v23, %v4440_v15  ;;  %v4648_v53 = vld [vmem:[#allocation5 + $0x9e8] sm:$0xf0]  ;;  %v4419_v15 = vor.u32 %v5272_v28, %v4416_v14  ;;  %v4848_v51 = vld [vmem:[#allocation5 + $0xb78] sm:$0xf0]  ;;  %v5360_v28 = vld [vmem:[#allocation5 + $0xad4] sm:$0xf] }
 0x163   :  { %3073 = vmatpush.bf16.msra.mxu2 %v4531_v54  ;;  %3042 = vmatmul.bf16.vlgmr.msrb.gmra.mxu3 %v5701_v21  ;;  %v5332_v21 = vld [vmem:[#allocation5 + $0x9f4] sm:$0xf]  ;;  %v2797_v31 = vadd.f32 %v2796_v22, %v5763_v38  ;;  %v4435_v38 = vor.u32 %v5276_v45, %v4432_v5  ;;  %v4499_v54 = vor.u32 %v5292_v49, %v4496_v50  ;;  %v4632_v23 = vld [vmem:[#allocation5 + $0x9c8] sm:$0xf0]  ;;  %v4768_v14 = vld [vmem:[#allocation5 + $0xad8] sm:$0xf0] }
 0x164   :  { %3086 = vmatpush.bf16.msra.mxu3 %v4595_v59  ;;  %v4659_v6 = vor.u32 %v5332_v21, %v4656_v18  ;;  %v4651_v41 = vor.u32 %v5330_v52, %v4648_v53  ;;  %v4635_v36 = vor.u32 %v5326_v25, %v4632_v23  ;;  %v4472_v21 = vld [vmem:[#allocation5 + $0x888] sm:$0xf0]  ;;  %v5302_v18 = vld [vmem:[#allocation5 + $0x904] sm:$0xf]  ;;  %v4411_v49 = vor.u32 %v5270_v29, %v4408_v30 }
 0x165   :  { %3052 = vmatpush.bf16.msra.mxu0 %v4363_v63  ;;  %v2810_v47 = vadd.f32 %v2809_v42, %v2797_v31  ;;  %v2822_v59 = vpop.f32.mrf.mxu2  ;;  %v4536_v31 = vld [vmem:[#allocation5 + $0x908] sm:$0xf0]  ;;  %v5324_v42 = vld [vmem:[#allocation5 + $0x9b4] sm:$0xf]  ;;  %v4475_v50 = vor.u32 %v5286_v35, %v4472_v21  ;;  %v4771_v23 = vor.u32 %v5360_v28, %v4768_v14  ;;  %v5374_v35 = vld [vmem:[#allocation5 + $0xb44] sm:$0xf] }
 0x166   :  { %3061 = vmatpush.bf16.msra.mxu1 %v4459_v32  ;;  %v2835_v32 = vpop.f32.mrf.mxu3  ;;  %v2811_v9 = vpop.f32.mrf.mxu1  ;;  %v4539_v52 = vor.u32 %v5302_v18, %v4536_v31  ;;  %v4760_v30 = vld [vmem:[#allocation5 + $0xac8] sm:$0xf0]  ;;  %v4912_v21 = vld [vmem:[#allocation5 + $0xbf8] sm:$0xf0] }
 0x167   :  { %3074 = vmatpush.bf16.msra.mxu2 %v4523_v1  ;;  %v2823_v48 = vadd.f32 %v2822_v59, %v2810_v47  ;;  %v4552_v1 = vld [vmem:[#allocation5 + $0x928] sm:$0xf0]  ;;  %v5364_v47 = vld [vmem:[#allocation5 + $0xaf4] sm:$0xf]  ;;  %v4851_v59 = vor.u32 %v5380_v56, %v4848_v51  ;;  %v4816_v56 = vld [vmem:[#allocation5 + $0xb38] sm:$0xf0] }
 0x168   :  { %3087 = vmatpush.bf16.msra.mxu3 %v4587_v11  ;;  %v4555_v20 = vor.u32 %v5306_v39, %v4552_v1  ;;  %v5378_v39 = vld [vmem:[#allocation5 + $0xb64] sm:$0xf]  ;;  %v4779_v1 = vor.u32 %v5362_v60, %v4776_v61  ;;  %v5344_v9 = vld [vmem:[#allocation5 + $0xa54] sm:$0xf]  ;;  %v4744_v60 = vld [vmem:[#allocation5 + $0xaa8] sm:$0xf0] }
 0x169   :  { %3053 = vmatpush.bf16.msra.mxu0 %v4355_v16  ;;  %v5770_v11 = vadd.f32 %v2835_v32, %v2823_v48  ;;  %v4643_v16 = vor.u32 %v5328_v2, %v4640_v8  ;;  %v4840_v48 = vld [vmem:[#allocation5 + $0xb68] sm:$0xf0]  ;;  %v5320_v2 = vld [vmem:[#allocation5 + $0x994] sm:$0xf]  ;;  %v4608_v8 = vld [vmem:[#allocation5 + $0x998] sm:$0xf0] }
 0x16a   :  { %3062 = vmatpush.bf16.msra.mxu1 %v4451_v19  ;;  %v2798_v63 = vpop.f32.mrf.mxu0  ;;  %v5304_v19 = vld [vmem:[#allocation5 + $0x914] sm:$0xf]  ;;  %v5394_v51 = vld [vmem:[#allocation5 + $0xbe4] sm:$0xf]  ;;  %v4672_v28 = vld [vmem:[#allocation5 + $0xa18] sm:$0xf0] }
 0x16b   :  { %3075 = vmatpush.bf16.msra.mxu2 %v4515_v3  ;;  %v4544_v3 = vld [vmem:[#allocation5 + $0x918] sm:$0xf0]  ;;  %v4619_v63 = vor.u32 %v5322_v55, %v4616_v57  ;;  %v4680_v55 = vld [vmem:[#allocation5 + $0xa28] sm:$0xf0]  ;;  %v5370_v61 = vld [vmem:[#allocation5 + $0xb24] sm:$0xf] }
 0x16c   :  { %3088 = vmatpush.bf16.msra.mxu3 %v4579_v24  ;;  %v4547_v22 = vor.u32 %v5304_v19, %v4544_v3  ;;  %v5318_v19 = vld [vmem:[#allocation5 + $0x984] sm:$0xf]  ;;  %v4600_v3 = vld [vmem:[#allocation5 + $0x988] sm:$0xf0] }
 0x16d   :  { %3054 = vmatpush.bf16.msra.mxu0 %v4347_v40  ;;  %v2824_v40 = vpop.f32.mrf.mxu2  ;;  %v4603_v18 = vor.u32 %v5318_v19, %v4600_v3  ;;  %v4800_v19 = vld [vmem:[#allocation5 + $0xb18] sm:$0xf0]  ;;  %v4888_v3 = vld [vmem:[#allocation5 + $0xbc8] sm:$0xf0] }
 0x16e   :  { %3063 = vmatpush.bf16.msra.mxu1 %v4443_v43  ;;  %v4624_v43 = vld [vmem:[#allocation5 + $0x9b8] sm:$0xf0]  ;;  %v2837_v45 = vpop.f32.mrf.mxu3 }
 0x16f   :  { %3076 = vmatpush.bf16.msra.mxu2 %v4507_v0  ;;  %v5348_v0 = vld [vmem:[#allocation5 + $0xa74] sm:$0xf]  ;;  %v4627_v53 = vor.u32 %v5324_v42, %v4624_v43 }
 0x170   :  { %3089 = vmatpush.bf16.msra.mxu3 %v4571_v46  ;;  %3055 = vmatmul.bf16.vlgmr.msra.gmra.mxu0 %v5705_v27  ;;  %v5288_v27 = vld [vmem:[#allocation5 + $0x894] sm:$0xf]  ;;  %v4720_v46 = vld [vmem:[#allocation5 + $0xa78] sm:$0xf0] }
 0x171   :  { %3099 = vmatpush.bf16.msrb.mxu0 %v4659_v6  ;;  %v4483_v24 = vor.u32 %v5288_v27, %v4480_v17  ;;  %v4784_v6 = vld [vmem:[#allocation5 + $0xaf8] sm:$0xf0]  ;;  %v4611_v17 = vor.u32 %v5320_v2, %v4608_v8  ;;  %v5340_v43 = vld [vmem:[#allocation5 + $0xa34] sm:$0xf] }
 0x172   :  { %3064 = vmatpush.bf16.msra.mxu1 %v4435_v38  ;;  %v5772_v5 = vpop.f32.mrf.mxu0  ;;  %v4723_v38 = vor.u32 %v5348_v0, %v4720_v46  ;;  %v4832_v27 = vld [vmem:[#allocation5 + $0xb58] sm:$0xf0] }
 0x173   :  { %3077 = vmatpush.bf16.msra.mxu2 %v4499_v54  ;;  %v4787_v54 = vor.u32 %v5364_v47, %v4784_v6  ;;  %v4688_v0 = vld [vmem:[#allocation5 + $0xa38] sm:$0xf0]  ;;  %v5356_v47 = vld [vmem:[#allocation5 + $0xab4] sm:$0xf] }
 0x174   :  { %3090 = vmatpush.bf16.msra.mxu3 %v4563_v58  ;;  %v5346_v58 = vld [vmem:[#allocation5 + $0xa64] sm:$0xf]  ;;  %v4752_v6 = vld [vmem:[#allocation5 + $0xab8] sm:$0xf0] }
 0x175   :  { %3100 = vmatpush.bf16.msrb.mxu0 %v4651_v41  ;;  %v4712_v41 = vld [vmem:[#allocation5 + $0xa68] sm:$0xf0] }
 0x176   :  { %3065 = vmatpush.bf16.msra.mxu1 %v4427_v12  ;;  %v4715_v32 = vor.u32 %v5346_v58, %v4712_v41  ;;  %v4843_v12 = vor.u32 %v5378_v39, %v4840_v48  ;;  %v5354_v41 = vld [vmem:[#allocation5 + $0xaa4] sm:$0xf] }
 0x177   :  { %3078 = vmatpush.bf16.msra.mxu2 %v4491_v13  ;;  %v4704_v13 = vld [vmem:[#allocation5 + $0xa58] sm:$0xf0] }
 0x178   :  { %3091 = vmatpush.bf16.msra.mxu3 %v4555_v20  ;;  %v4707_v25 = vor.u32 %v5344_v9, %v4704_v13  ;;  %v5336_v13 = vld [vmem:[#allocation5 + $0xa14] sm:$0xf] }
 0x179   :  { %3101 = vmatpush.bf16.msrb.mxu0 %v4643_v16  ;;  %v5376_v16 = vld [vmem:[#allocation5 + $0xb54] sm:$0xf] }
 0x17a   :  { %3066 = vmatpush.bf16.msra.mxu1 %v4419_v15  ;;  %v2850_v20 = vpop.f32.mrf.mxu0  ;;  %v4696_v15 = vld [vmem:[#allocation5 + $0xa48] sm:$0xf0]  ;;  %v4835_v29 = vor.u32 %v5376_v16, %v4832_v27  ;;  %v5352_v16 = vld [vmem:[#allocation5 + $0xa94] sm:$0xf]  ;;  %v4736_v27 = vld [vmem:[#allocation5 + $0xa98] sm:$0xf0] }
 0x17b   :  { %3079 = vmatpush.bf16.msra.mxu2 %v4483_v24  ;;  %v5358_v24 = vld [vmem:[#allocation5 + $0xac4] sm:$0xf] }
 0x17c   :  { %3092 = vmatpush.bf16.msra.mxu3 %v4547_v22  ;;  %v4763_v42 = vor.u32 %v5358_v24, %v4760_v30  ;;  %v4664_v24 = vld [vmem:[#allocation5 + $0xa08] sm:$0xf0] }
 0x17d   :  { %3102 = vmatpush.bf16.msrb.mxu0 %v4635_v36  ;;  %v5396_v36 = vld [vmem:[#allocation5 + $0xbf4] sm:$0xf] }
 0x17e   :  { %3067 = vmatpush.bf16.msra.mxu1 %v4411_v49  ;;  %v2861_v31 = vpop.f32.mrf.mxu1  ;;  %v4915_v46 = vor.u32 %v5396_v36, %v4912_v21  ;;  %v5372_v49 = vld [vmem:[#allocation5 + $0xb34] sm:$0xf]  ;;  %v5366_v36 = vld [vmem:[#allocation5 + $0xb04] sm:$0xf] }
 0x17f   :  { %3080 = vmatpush.bf16.msra.mxu2 %v4475_v50  ;;  %v4819_v58 = vor.u32 %v5372_v49, %v4816_v56  ;;  %v4872_v56 = vld [vmem:[#allocation5 + $0xba8] sm:$0xf0] }
 0x180   :  { %3093 = vmatpush.bf16.msra.mxu3 %v4539_v52  ;;  %v4904_v52 = vld [vmem:[#allocation5 + $0xbe8] sm:$0xf0] }
 0x181   :  { %3103 = vmatpush.bf16.msrb.mxu0 %v4627_v53  ;;  %3068 = vmatmul.bf16.vlgmr.msra.gmra.mxu1 %v5711_v26  ;;  %v5342_v26 = vld [vmem:[#allocation5 + $0xa44] sm:$0xf]  ;;  %v4691_v53 = vor.u32 %v5340_v43, %v4688_v0  ;;  %v4944_v43 = vld [vmem:[#allocation5 + $0xc38] sm:$0xf0] }
 0x182   :  { %3112 = vmatpush.bf16.msrb.mxu1 %v4723_v38  ;;  %3081 = vmatmul.bf16.vlgmr.msra.gmra.mxu2 %v5715_v34  ;;  %v5439_v34 = vld [vmem:[#allocation7] sm:$0x3]  ;;  %v4699_v40 = vor.u32 %v5342_v26, %v4696_v15  ;;  %v4755_v38 = vor.u32 %v5356_v47, %v4752_v6  ;;  %v4739_v26 = vor.u32 %v5352_v16, %v4736_v27  ;;  %v5334_v15 = vld [vmem:[#allocation5 + $0xa04] sm:$0xf]  ;;  %v5408_v16 = vld [vmem:[#allocation8 + $0x10] sm:$0xff] }
 0x183   :  { %3125 = vmatpush.bf16.msrb.mxu2 %v4787_v54  ;;  %3094 = vmatmul.bf16.vlgmr.msra.gmra.mxu3 %v5713_v33  ;;  %v560_v22 = vperm.slane %v5439_v34, 1  ;;  %v4824_v33 = vld [vmem:[#allocation5 + $0xb48] sm:$0xf0]  ;;  %v5338_v54 = vld [vmem:[#allocation5 + $0xa24] sm:$0xf]  ;;  %v4667_v0 = vor.u32 %v5334_v15, %v4664_v24  ;;  %v5413_v6 = vld [vmem:[#allocation8 + $0x38] sm:$0xff] }
 0x184   :  { %3138 = vmatpush.bf16.msrb.mxu3 %v4851_v59  ;;  %v4827_v45 = vor.u32 %v5374_v35, %v4824_v33  ;;  %v4907_v59 = vor.u32 %v5394_v51, %v4904_v52  ;;  %v4683_v9 = vor.u32 %v5338_v54, %v4680_v55  ;;  %v4728_v33 = vld [vmem:[#allocation5 + $0xa88] sm:$0xf0]  ;;  %v5402_v51 = vld [vmem:[#allocation5 + $0xc24] sm:$0xf]  ;;  %v5412_v54 = vld [vmem:[#allocation8 + $0x30] sm:$0xff] }
 0x185   :  { %3104 = vmatpush.bf16.msrb.mxu0 %v4619_v63  ;;  %v2862_v50 = vadd.f32 %v2861_v31, %v560_v22  ;;  %v2874_v57 = vpop.f32.mrf.mxu2  ;;  %v4808_v63 = vld [vmem:[#allocation5 + $0xb28] sm:$0xf0]  ;;  %v5350_v22 = vld [vmem:[#allocation5 + $0xa84] sm:$0xf]  ;;  %v5388_v31 = vld [vmem:[#allocation5 + $0xbb4] sm:$0xf] }
 0x186   :  { %3113 = vmatpush.bf16.msrb.mxu1 %v4715_v32  ;;  %v2887_v48 = vpop.f32.mrf.mxu3  ;;  %v5392_v32 = vld [vmem:[#allocation5 + $0xbd4] sm:$0xf]  ;;  %v2863_v8 = vpop.f32.mrf.mxu1  ;;  %v4811_v14 = vor.u32 %v5370_v61, %v4808_v63  ;;  %v4936_v52 = vld [vmem:[#allocation5 + $0xc28] sm:$0xf0] }
 0x187   :  { %3126 = vmatpush.bf16.msrb.mxu2 %v4779_v1  ;;  %v2875_v39 = vadd.f32 %v2874_v57, %v2862_v50  ;;  %v4896_v1 = vld [vmem:[#allocation5 + $0xbd8] sm:$0xf0]  ;;  %v5386_v50 = vld [vmem:[#allocation5 + $0xba4] sm:$0xf]  ;;  %v4939_v55 = vor.u32 %v5402_v51, %v4936_v52  ;;  %v5384_v57 = vld [vmem:[#allocation5 + $0xb94] sm:$0xf] }
 0x188   :  { %3139 = vmatpush.bf16.msrb.mxu3 %v4843_v12  ;;  %v4747_v12 = vor.u32 %v5354_v41, %v4744_v60  ;;  %v4899_v20 = vor.u32 %v5392_v32, %v4896_v1  ;;  %v4928_v41 = vld [vmem:[#allocation5 + $0xc18] sm:$0xf0]  ;;  %v5411_v61 = vld [vmem:[#allocation8 + $0x28] sm:$0xff]  ;;  %v5398_v32 = vld [vmem:[#allocation5 + $0xc04] sm:$0xf] }
 0x189   :  { %3105 = vmatpush.bf16.msrb.mxu0 %v4611_v17  ;;  %v2888_v2 = vadd.f32 %v2887_v48, %v2875_v39  ;;  %v5368_v17 = vld [vmem:[#allocation5 + $0xb14] sm:$0xf]  ;;  %v5382_v48 = vld [vmem:[#allocation5 + $0xb84] sm:$0xf]  ;;  %v4856_v63 = vld [vmem:[#allocation5 + $0xb88] sm:$0xf0] }
 0x18a   :  { %3114 = vmatpush.bf16.msrb.mxu1 %v4707_v25  ;;  %v4803_v35 = vor.u32 %v5368_v17, %v4800_v19  ;;  %v4920_v1 = vld [vmem:[#allocation5 + $0xc08] sm:$0xf0]  ;;  %v5417_v51 = vld [vmem:[#allocation8 + $0x58] sm:$0xff] }
 0x18b   :  { %3127 = vmatpush.bf16.msrb.mxu2 %v4771_v23  ;;  %v4675_v23 = vor.u32 %v5336_v13, %v4672_v28  ;;  %v5407_v19 = vld [vmem:[#allocation8 + $0x8] sm:$0xff] }
 0x18c   :  { %3140 = vmatpush.bf16.msrb.mxu3 %v4835_v29 }
 0x18d   :  { %3106 = vmatpush.bf16.msrb.mxu0 %v4603_v18  ;;  %v2900_v25 = vpop.f32.mrf.mxu0  ;;  %v2876_v30 = vpop.f32.mrf.mxu2  ;;  %v4792_v18 = vld [vmem:[#allocation5 + $0xb08] sm:$0xf0] }
 0x18e   :  { %3115 = vmatpush.bf16.msrb.mxu1 %v4699_v40  ;;  %v5778_v29 = vadd.f32 %v2900_v25, %v2888_v2  ;;  %v2889_v21 = vpop.f32.mrf.mxu3  ;;  %v4880_v40 = vld [vmem:[#allocation5 + $0xbb8] sm:$0xf0]  ;;  %v4859_v2 = vor.u32 %v5382_v48, %v4856_v63 }
 0x18f   :  { %3128 = vmatpush.bf16.msrb.mxu2 %v4763_v42  ;;  %v5404_v42 = vld [vmem:[#allocation5 + $0xc34] sm:$0xf]  ;;  %v4883_v47 = vor.u32 %v5388_v31, %v4880_v40 }
 0x190   :  { %3141 = vmatpush.bf16.msrb.mxu3 %v4827_v45  ;;  %3107 = vmatmul.bf16.vlgmr.msrb.gmra.mxu0 %v5717_v37  ;;  %v5390_v37 = vld [vmem:[#allocation5 + $0xbc4] sm:$0xf]  ;;  %v4731_v45 = vor.u32 %v5350_v22, %v4728_v33  ;;  %v4947_v49 = vor.u32 %v5404_v42, %v4944_v43  ;;  %v5421_v43 = vld [vmem:[#allocation8 + $0x78] sm:$0xff] }
 0x191   :  { %3151 = vmatpush.bf16.msra.mxu0 %v4915_v46  ;;  %v4891_v34 = vor.u32 %v5390_v37, %v4888_v3  ;;  %v4795_v46 = vor.u32 %v5366_v36, %v4792_v18  ;;  %v2849_v3 = vadd.f32 %v5772_v5, %v5770_v11 }
 0x192   :  { %3116 = vmatpush.bf16.msrb.mxu1 %v4691_v53 }
 0x193   :  { %3129 = vmatpush.bf16.msrb.mxu2 %v4755_v38  ;;  %v4875_v38 = vor.u32 %v5386_v50, %v4872_v56  ;;  %v5418_v50 = vld [vmem:[#allocation8 + $0x60] sm:$0xff] }
 0x194   :  { %3142 = vmatpush.bf16.msrb.mxu3 %v4819_v58  ;;  %v4864_v58 = vld [vmem:[#allocation5 + $0xb98] sm:$0xf0] }
 0x195   :  { %3152 = vmatpush.bf16.msra.mxu0 %v4907_v59  ;;  %v2902_v53 = vpop.f32.mrf.mxu0  ;;  %v5400_v59 = vld [vmem:[#allocation5 + $0xc14] sm:$0xf]  ;;  %v4867_v60 = vor.u32 %v5384_v57, %v4864_v58  ;;  %v5415_v57 = vld [vmem:[#allocation8 + $0x48] sm:$0xff] }
 0x196   :  { %3117 = vmatpush.bf16.msrb.mxu1 %v4683_v9  ;;  %v4931_v39 = vor.u32 %v5400_v59, %v4928_v41 }
 0x197   :  { %3130 = vmatpush.bf16.msrb.mxu2 %v4747_v12 }
 0x198   :  { %3143 = vmatpush.bf16.msrb.mxu3 %v4811_v14 }
 0x199   :  { %3153 = vmatpush.bf16.msra.mxu0 %v4899_v20 }
 0x19a   :  { %3118 = vmatpush.bf16.msrb.mxu1 %v4675_v23  ;;  %v5406_v23 = vld [vmem:[#allocation8] sm:$0xff] }
 0x19b   :  { %3131 = vmatpush.bf16.msrb.mxu2 %v4739_v26  ;;  %v3177_v26 = vmax.f32 %v2849_v3, 0.0 }
 0x19c   :  { %3144 = vmatpush.bf16.msrb.mxu3 %v4803_v35 }
 0x19d   :  { %3154 = vmatpush.bf16.msra.mxu0 %v4891_v34  ;;  %v3179_v15 = vpack.c.bf16 %v3177_v26, %v3177_v26 }
 0x19e   :  { %3119 = vmatpush.bf16.msrb.mxu1 %v4667_v0  ;;  %v2913_v8 = vpop.f32.mrf.mxu1 }
 0x19f   :  { %3132 = vmatpush.bf16.msrb.mxu2 %v4731_v45  ;;  %v2914_v9 = vadd.f32 %v2913_v8, %v5778_v29  ;;  %v5420_v45 = vld [vmem:[#allocation8 + $0x70] sm:$0xff] }
 0x1a0   :  { %3145 = vmatpush.bf16.msrb.mxu3 %v4795_v46 }
 0x1a1   :  { %3155 = vmatpush.bf16.msra.mxu0 %v4883_v47  ;;  %3120 = vmatmul.bf16.vlgmr.msrb.gmra.mxu1 %v5725_v62  ;;  %v5410_v62 = vld [vmem:[#allocation8 + $0x20] sm:$0xff] }
 0x1a2   :  { %3168 = vmatpush.bf16.msra.mxu1 %v4947_v49  ;;  %3133 = vmatmul.bf16.vlgmr.msrb.gmra.mxu2 %v5729_v7  ;;  %v4923_v7 = vor.u32 %v5398_v32, %v4920_v1  ;;  %v5419_v49 = vld [vmem:[#allocation8 + $0x68] sm:$0xff] }
 0x1a3   :  { %3313 = vmatpush.bf16.msra.mxu2 %v5413_v6  ;;  %3146 = vmatmul.bf16.vlgmr.msrb.gmra.mxu3 %v5727_v4  ;;  %v5409_v4 = vld [vmem:[#allocation8 + $0x18] sm:$0xff] }
 0x1a4   :  { %3326 = vmatpush.bf16.msra.mxu3 %v5421_v43 }
 0x1a5   :  { %3156 = vmatpush.bf16.msra.mxu0 %v4875_v38  ;;  %v2926_v12 = vpop.f32.mrf.mxu2  ;;  %v5416_v38 = vld [vmem:[#allocation8 + $0x50] sm:$0xff] }
 0x1a6   :  { %3169 = vmatpush.bf16.msra.mxu1 %v4939_v55  ;;  %v2927_v13 = vadd.f32 %v2926_v12, %v2914_v9  ;;  %v2939_v28 = vpop.f32.mrf.mxu3  ;;  %v2915_v20 = vpop.f32.mrf.mxu1 }
 0x1a7   :  { %3314 = vmatpush.bf16.msra.mxu2 %v5412_v54 }
 0x1a8   :  { %v2940_v14 = vadd.f32 %v2939_v28, %v2927_v13  ;;  %3327 = vmatpush.bf16.msra.mxu3 %v5420_v45 }
 0x1a9   :  { %3157 = vmatpush.bf16.msra.mxu0 %v4867_v60  ;;  %v5414_v60 = vld [vmem:[#allocation8 + $0x40] sm:$0xff] }
 0x1aa   :  { %3170 = vmatpush.bf16.msra.mxu1 %v4931_v39 }
 0x1ab   :  { %3315 = vmatpush.bf16.msra.mxu2 %v5411_v61 }
 0x1ac   :  { %3328 = vmatpush.bf16.msra.mxu3 %v5419_v49 }
 0x1ad   :  { %3158 = vmatpush.bf16.msra.mxu0 %v4859_v2  ;;  %v2952_v27 = vpop.f32.mrf.mxu0  ;;  %v2928_v37 = vpop.f32.mrf.mxu2 }
 0x1ae   :  { %3171 = vmatpush.bf16.msra.mxu1 %v4923_v7  ;;  %v2953_v17 = vadd.f32 %v2952_v27, %v2940_v14  ;;  %v2941_v25 = vpop.f32.mrf.mxu3 }
 0x1af   :  { %3316 = vmatpush.bf16.msra.mxu2 %v5410_v62 }
 0x1b0   :  { %3159 = vmatmul.bf16.vlgmr.msra.gmra.mxu0 %v5731_v10  ;;  %3329 = vmatpush.bf16.msra.mxu3 %v5418_v50 }
 0x1b1   :  { %4949 = vmatmul.msk.bf16.vlgmr.msra.gmra.mxu1 %vm2523_vm0, %v5738_v44 }
 0x1b3   :  { %3317 = vmatpush.bf16.msra.mxu2 %v5409_v4 }
 0x1b4   :  { %3330 = vmatpush.bf16.msra.mxu3 %v5417_v51 }
 0x1b5   :  { %v2954_v10 = vpop.f32.mrf.mxu0 }
 0x1b7   :  { %3318 = vmatpush.bf16.msra.mxu2 %v5408_v16 }
 0x1b8   :  { %3331 = vmatpush.bf16.msra.mxu3 %v5416_v38 }
 0x1bb   :  { %3319 = vmatpush.bf16.msra.mxu2 %v5407_v19 }
 0x1bc   :  { %3332 = vmatpush.bf16.msra.mxu3 %v5415_v57 }
 0x1be   :  { %v2965_v24 = vpop.f32.mrf.mxu1 }
 0x1bf   :  { %3320 = vmatpush.bf16.msra.mxu2 %v5406_v23  ;;  %v2966_v29 = vadd.f32 %v2965_v24, %v2953_v17 }
 0x1c0   :  { %3333 = vmatpush.bf16.msra.mxu3 %v5414_v60 }
 0x1c2   :  { %3321 = vmatmul.bf16.vlgmr.msra.gmra.mxu2 %v3179_v15  ;;  %v5432_v15 = vld [vmem:[#allocation10] ss:$0 sm:$0xff] }
 0x1c5   :  { %v2978_v30 = vpop.f32.mrf.mxu2 }
 0x1c6   :  { %v2991_v44 = vpop.f32.mrf.mxu3  ;;  %v2979_v35 = vadd.f32 %v2978_v30, %v2966_v29  ;;  %v2967_v34 = vpop.f32.mrf.mxu1 }
 0x1c8   :  { %v2992_v22 = vadd.f32 %v2991_v44, %v2979_v35  ;;  %v5433_v44 = vld [vmem:[#allocation11] ss:$0 sm:$0xff] }
 0x1cd   :  { %v3004_v33 = vpop.f32.mrf.mxu0  ;;  %v2980_v21 = vpop.f32.mrf.mxu2 }
 0x1ce   :  { %v3005_v36 = vadd.f32 %v3004_v33, %v2992_v22  ;;  %v2993_v18 = vpop.f32.mrf.mxu3  ;;  %v5434_v33 = vld [vmem:[#allocation2] ss:$0 sm:$0xff] }
 0x1d5   :  { %v3006_v11 = vpop.f32.mrf.mxu0 }
 0x1de   :  { %v3017_v5 = vpop.f32.mrf.mxu1 }
 0x1df   :  { %v3018_v41 = vadd.f32 %v3017_v5, %v3005_v36 }
 0x1e5   :  { %v3030_v31 = vpop.f32.mrf.mxu2 }
 0x1e6   :  { %v3043_v40 = vpop.f32.mrf.mxu3  ;;  %v3019_v42 = vpop.f32.mrf.mxu1  ;;  %v3031_v61 = vadd.f32 %v3030_v31, %v3018_v41 }
 0x1e8   :  { %v3044_v48 = vadd.f32 %v3043_v40, %v3031_v61 }
 0x1ed   :  { %v3056_v0 = vpop.f32.mrf.mxu0  ;;  %v3032_v46 = vpop.f32.mrf.mxu2 }
 0x1ee   :  { %v3045_v47 = vpop.f32.mrf.mxu3  ;;  %v3057_v63 = vadd.f32 %v3056_v0, %v3044_v48 }
 0x1f5   :  { %v3058_v6 = vpop.f32.mrf.mxu0 }
 0x1fe   :  { %v3069_v56 = vpop.f32.mrf.mxu1 }
 0x1ff   :  { %v3070_v32 = vadd.f32 %v3069_v56, %v3057_v63 }
 0x205   :  { %v3082_v52 = vpop.f32.mrf.mxu2 }
 0x206   :  { %v3095_v53 = vpop.f32.mrf.mxu3  ;;  %v3071_v54 = vpop.f32.mrf.mxu1  ;;  %v3083_v1 = vadd.f32 %v3082_v52, %v3070_v32 }
 0x208   :  { %v3096_v8 = vadd.f32 %v3095_v53, %v3083_v1 }
 0x20d   :  { %v3108_v55 = vpop.f32.mrf.mxu0  ;;  %v3084_v58 = vpop.f32.mrf.mxu2 }
 0x20e   :  { %v3097_v59 = vpop.f32.mrf.mxu3  ;;  %v3109_v62 = vadd.f32 %v3108_v55, %v3096_v8 }
 0x215   :  { %v3110_v39 = vpop.f32.mrf.mxu0 }
 0x21e   :  { %v3121_v2 = vpop.f32.mrf.mxu1 }
 0x21f   :  { %v3122_v7 = vadd.f32 %v3121_v2, %v3109_v62 }
 0x225   :  { %v3134_v9 = vpop.f32.mrf.mxu2 }
 0x226   :  { %v3147_v4 = vpop.f32.mrf.mxu3  ;;  %v3135_v12 = vadd.f32 %v3134_v9, %v3122_v7  ;;  %v3123_v13 = vpop.f32.mrf.mxu1 }
 0x228   :  { %v3148_v28 = vadd.f32 %v3147_v4, %v3135_v12 }
 0x22d   :  { %v3160_v14 = vpop.f32.mrf.mxu0  ;;  %v3136_v16 = vpop.f32.mrf.mxu2 }
 0x22e   :  { %v3161_v20 = vadd.f32 %v3160_v14, %v3148_v28  ;;  %v3149_v27 = vpop.f32.mrf.mxu3  ;;  %v3173_v17 = vpop.f32.mrf.mxu1 }
 0x230   :  { %v3174_v19 = vadd.f32 %v3173_v17, %v3161_v20 }
 0x232   :  { %v3178_v37 = vmax.f32 %v3174_v19, 0.0 }
 0x234   :  { %v3180_v3 = vpack.c.bf16 %v3178_v37, %v3178_v37 }
 0x235   :  { %v3162_v25 = vpop.f32.mrf.mxu0 }
 0x236   :  { %3334 = vmatmul.bf16.vlgmr.msra.gmra.mxu3 %v3180_v3  ;;  %v3175_v23 = vpop.f32.mrf.mxu1 }
 0x245   :  { %v3322_v26 = vpop.f32.mrf.mxu2 }
 0x246   :  { %v3323_v24 = vadd.f32 %v5432_v15, %v3322_v26 }
 0x24d   :  { %v3324_v10 = vpop.f32.mrf.mxu2 }
 0x2b9   :  { %v3335_v29 = vpop.f32.mrf.mxu3 }
 0x2ba   :  { %v3336_v30 = vadd.f32 %v3335_v29, %v3323_v24 }
 0x2bc   :  { %v3339_v35 = vmax.f32 %v3336_v30, 0.0 }
 0x2be   :  { %v3344_v34 = vmul.f32 %v5433_v44, %v3339_v35 }
 0x2c0   :  { %3345 = vadd.xlane.f32.xlu0 %v3344_v34 }
 0x2c1   :  { %v3337_v22 = vpop.f32.mrf.mxu3 }
 0x333   :  { %v3346_v36 = vpop.xlane.xlu0 %3345 }
 0x334   :  { %v3351_v21 = vadd.f32 %v5434_v33, %v3346_v36 }
 0x336   :  { %v3352_v18 = vsub.f32 0.0, %v3351_v21 }
 0x338   :  { %v3353_v11 = vmul.f32 1.442695, %v3352_v18 }
 0x33a   :  { %5435 = vpow2.f32 %v3353_v11 }
 0x340   :  { %v5436_v5 = vpop.eup %5435 }
 0x341   :  { %v3355_v31 = vadd.f32 1.0, %v5436_v5 }
 0x343   :  { %5437 = vrcp.f32 %v3355_v31  ;;  %v3367_v0 = vand.u32 2147483648, %v3355_v31  ;;  %v3365_v46 = vand.u32 2147483647, %v3355_v31  ;;  %vm3361_vm2 = vweird.f32 %v3355_v31 }
 0x345   :  { %v3368_v6 = vor.u32 1.1754944e-38, %v3367_v0  ;;  %vm3366_vm5 = vcmp.eq.f32.partialorder %v3365_v46, 8.507059e+37 }
 0x349   :  { %v5438_v40 = vpop.eup %5437 }
 0x34a   :  { %v3357_v42 = vmul.f32 %v5438_v40, %v3355_v31  ;;  %vm3362_vm1 = vweird.f32 %v5438_v40 }
 0x34b   :  { %vm3363_vm3 = vmor %vm3361_vm2, %vm3362_vm1 }
 0x34c   :  { %v3358_v43 = vsub.f32 1.0, %v3357_v42 }
 0x34e   :  { %v3359_v45 = vmul.f32 %v5438_v40, %v3358_v43 }
 0x350   :  { %v3360_v47 = vadd.f32 %v5438_v40, %v3359_v45 }
 0x352   :  { %v3364_v49 = vsel %vm3363_vm3, %v5438_v40, %v3360_v47 }
 0x353   :  { %v3369_v50 = vsel %vm3366_vm5, %v3368_v6, %v3364_v49 }
 0x354   :  { %3371 = vst.msk [vmem:[%s5799_s7] sm:$0xff] %vm3370_vm4, %v3369_v50 }
 0x355   :  { %3376 = vsyncpa [#allocation4], 1 }
 0x356   :  { %3377 = vsyncpa [#allocation6], 1 }
 0x357   :  { %3378 = vsyncpa [#allocation9], 1 }
 0x358   :  { %3379 = vsyncpa [#allocation12], 1 }

</bundles_post_ra>
